<compile_context>
chip_gen: v5e
topology: v5e:2x2
jax: 0.10.0
libtpu: 0.0.40
codegen_flags: <defaults>
</compile_context>

<pallas_src>
import jax
import jax.numpy as jnp
from jax import lax
from jax.experimental import pallas as pl
from jax.experimental.pallas import tpu as pltpu

NUM_NEURONS = 16
BN_EPS = 1e-5


def _sigmoid(x):
    # Single EUP op per element (tanh); mathematically identical to 1/(1+e^-x).
    return 0.5 * jnp.tanh(0.5 * x) + 0.5


def _net_kernel(x_ref, y0_ref, params_ref, out_ref):
    """Whole-sequence recurrence in one kernel invocation.

    Shapes (batch on the lane axis):
      x_ref:      (steps, batch)
      y0_ref:     (1, batch)
      params_ref: (n, 8)  columns = [w1x, w1y, b1, gamma, beta, w2, b2, pad]
      out_ref:    (steps, batch)
    """
    steps, batch = x_ref.shape
    n = params_ref.shape[0]

    # --- One packed parameter load; slice columns once at kernel entry. ---
    params = params_ref[...]                       # (n, 8)
    w1x = params[:, 0:1]                           # (n, 1)
    w1y = params[:, 1:2]
    b1 = params[:, 2:3]
    gamma = params[:, 3:4]
    beta = params[:, 4:5]
    w2 = params[:, 5:6]
    b2 = params[0:1, 6:7]                          # (1, 1)

    # --- Hoist loop-invariant full-width broadcasts (not CSE'd per-iter). ---
    w1x_b = jnp.broadcast_to(w1x, (n, batch))      # (n, batch)
    w1y_b = jnp.broadcast_to(w1y, (n, batch))
    b1_b = jnp.broadcast_to(b1, (n, batch))

    # --- Hoist the x load: (steps, batch) is only ~2 vregs. ---
    x_all = x_ref[...]                             # (steps, batch)
    inv_batch = jnp.float32(1.0 / batch)

    y = y0_ref[...]                                # (1, batch), carried in vregs

    # Fully unrolled time loop (steps is static and small).
    for i in range(steps):
        x_i = x_all[i:i + 1, :]                    # static sublane slice (1, batch)

        # lin1 on cat([x, y], dim=1) without materializing the concat:
        #   h[f, b] = sigmoid(w1[f,0]*x[b] + w1[f,1]*y[b] + b1[f])
        h = _sigmoid(w1x_b * x_i + w1y_b * y + b1_b)          # (n, batch)

        # BatchNorm1d (training mode) statistics over the batch (lane) axis,
        # single pass: var = E[h^2] - mean^2 (clamped to >= 0).
        s = jnp.sum(h, axis=1, keepdims=True)                 # (n, 1)
        ss = jnp.sum(h * h, axis=1, keepdims=True)            # (n, 1)
        mean = s * inv_batch
        var = jnp.maximum(ss * inv_batch - mean * mean, 0.0)
        scale = gamma * lax.rsqrt(var + BN_EPS)               # (n, 1)
        shift = beta - mean * scale                           # (n, 1)

        # BN affine folded into lin2 (hn never materialized):
        #   y = sigmoid( sum_f h[f]*(scale[f]*w2[f])
        #                + (sum_f shift[f]*w2[f] + b2) )
        w2s = scale * w2                                      # (n, 1)
        bias = jnp.sum(shift * w2, axis=0, keepdims=True) + b2  # (1, 1)
        y = _sigmoid(jnp.sum(h * w2s, axis=0, keepdims=True) + bias)  # (1, batch)

        # Static-index row store (off the serial chain).
        out_ref[i:i + 1, :] = y


@jax.jit
def net_forward(x_bsf, y0, w1, b1, w2, b2, gamma, beta):
    """x_bsf: (batch, steps, 1) float32, as in the PyTorch module.

    Params (JAX layout): w1 (2, n), b1 (n,), w2 (n,), b2 (1,), gamma/beta (n,).
    Returns per-step outputs, time-major, shape (steps, batch).
    """
    batch, steps, feat = x_bsf.shape
    assert feat == 1
    n = w1.shape[1]

    # Re-layout so batch sits on the lane (last) axis inside the kernel.
    x_tm = jnp.transpose(x_bsf[:, :, 0], (1, 0))        # (steps, batch)
    y0_row = jnp.transpose(y0, (1, 0))                  # (1, batch)

    # Pack the 7 tiny parameter vectors into ONE (n, 8) array -> single DMA.
    params = jnp.stack(
        [
            w1[0, :],                                   # w1x
            w1[1, :],                                   # w1y
            b1,
            gamma,
            beta,
            w2,
            jnp.full((n,), b2[0], dtype=jnp.float32),   # b2 (only [0,6] read)
            jnp.zeros((n,), dtype=jnp.float32),         # pad
        ],
        axis=1,
    ).astype(jnp.float32)                               # (n, 8)

    vmem = pl.BlockSpec(memory_space=pltpu.MemorySpace.VMEM)
    out = pl.pallas_call(
        _net_kernel,
        out_shape=jax.ShapeDtypeStruct((steps, batch), jnp.float32),
        in_specs=[vmem, vmem, vmem],
        out_specs=vmem,
    )(x_tm, y0_row, params)

    return out                                           # (steps, batch)


def reference_forward(x_bsf, y0, w1, b1, w2, b2, gamma, beta):
    """Pure-JAX reference mirroring the PyTorch forward (training-mode BN)."""
    batch, steps, _ = x_bsf.shape
    y = y0
    outs = []
    for i in range(steps):
        z = jnp.concatenate([x_bsf[:, i, :], y], axis=1)          # (batch, 2)
        h = jax.nn.sigmoid(z @ w1 + b1[None, :])                  # (batch, n)
        mean = jnp.mean(h, axis=0, keepdims=True)
        var = jnp.mean((h - mean) ** 2, axis=0, keepdims=True)
        h = (h - mean) / jnp.sqrt(var + BN_EPS) * gamma[None, :] + beta[None, :]
        y = jax.nn.sigmoid(h @ w2[:, None] + b2)                  # (batch, 1)
        outs.append(y[:, 0])
    return jnp.stack(outs, axis=0)                                # (steps, batch)


if __name__ == "__main__":
    # Small shapes; batch=128 keeps the lane axis exactly full (BN reductions
    # over lanes need every lane to be valid batch data).
    batch, steps, n = 128, 16, NUM_NEURONS

    key = jax.random.PRNGKey(0)
    kx, ky0, kw1, kb1, kw2, kb2 = jax.random.split(key, 6)

    x = jax.random.normal(kx, (batch, steps, 1), dtype=jnp.float32)
    # self.y = torch.rand(batch, 1): uniform [0, 1)
    y0 = jax.random.uniform(ky0, (batch, 1), dtype=jnp.float32)

    # Deterministic parameter init (shapes per nn.Linear / nn.BatchNorm1d).
    w1 = jax.random.normal(kw1, (2, n), dtype=jnp.float32) * 0.5
    b1 = jax.random.normal(kb1, (n,), dtype=jnp.float32) * 0.1
    w2 = jax.random.normal(kw2, (n,), dtype=jnp.float32) * 0.5
    b2 = jax.random.normal(kb2, (1,), dtype=jnp.float32) * 0.1
    gamma = jnp.ones((n,), dtype=jnp.float32)   # BatchNorm1d.weight default
    beta = jnp.zeros((n,), dtype=jnp.float32)   # BatchNorm1d.bias default

    out = net_forward(x, y0, w1, b1, w2, b2, gamma, beta)
    out = jax.block_until_ready(out)                 # (steps, batch)

    # The PyTorch module returns (list of per-step outputs, final y):
    output_list = [out[i][:, None] for i in range(steps)]   # each (batch, 1)
    final_y = out[-1][:, None]

    ref = reference_forward(x, y0, w1, b1, w2, b2, gamma, beta)
    if not jnp.allclose(out, ref, atol=1e-4, rtol=1e-3):
        max_err = jnp.max(jnp.abs(out - ref))
        raise AssertionError(f"Pallas kernel output mismatch vs reference "
                             f"(max abs err {max_err})")

    _ = (output_list, final_y)
    print("KERNEL_OK")
</pallas_src>

<mosaic_0001>
module attributes {stable_mosaic.version = 11 : i64} {
  func.func @_net_kernel(%arg0: memref<16x128xf32, #tpu.memory_space<vmem>>, %arg1: memref<1x128xf32, #tpu.memory_space<vmem>>, %arg2: memref<16x8xf32, #tpu.memory_space<vmem>>, %arg3: memref<16x128xf32, #tpu.memory_space<vmem>>) attributes {dimension_semantics = [], scalar_prefetch = 0 : i64, scratch_operands = 0 : i64, tpu.core_type = #tpu.core_type<tc>} {
    %c0 = arith.constant 0 : index
    %c0_0 = arith.constant 0 : index
    %0 = vector.load %arg2[%c0, %c0_0] : memref<16x8xf32, #tpu.memory_space<vmem>>, vector<16x8xf32>
    %1 = vector.extract_strided_slice %0 {offsets = [0, 0], sizes = [16, 1], strides = [1, 1]} : vector<16x8xf32> to vector<16x1xf32>
    %2 = vector.extract_strided_slice %0 {offsets = [0, 1], sizes = [16, 1], strides = [1, 1]} : vector<16x8xf32> to vector<16x1xf32>
    %3 = vector.extract_strided_slice %0 {offsets = [0, 2], sizes = [16, 1], strides = [1, 1]} : vector<16x8xf32> to vector<16x1xf32>
    %4 = vector.extract_strided_slice %0 {offsets = [0, 3], sizes = [16, 1], strides = [1, 1]} : vector<16x8xf32> to vector<16x1xf32>
    %5 = vector.extract_strided_slice %0 {offsets = [0, 4], sizes = [16, 1], strides = [1, 1]} : vector<16x8xf32> to vector<16x1xf32>
    %6 = vector.extract_strided_slice %0 {offsets = [0, 5], sizes = [16, 1], strides = [1, 1]} : vector<16x8xf32> to vector<16x1xf32>
    %7 = vector.extract_strided_slice %0 {offsets = [0, 6], sizes = [1, 1], strides = [1, 1]} : vector<16x8xf32> to vector<1x1xf32>
    %8 = vector.shape_cast %1 : vector<16x1xf32> to vector<16x1xf32>
    %9 = vector.broadcast %8 : vector<16x1xf32> to vector<16x128xf32>
    %10 = vector.shape_cast %2 : vector<16x1xf32> to vector<16x1xf32>
    %11 = vector.broadcast %10 : vector<16x1xf32> to vector<16x128xf32>
    %12 = vector.shape_cast %3 : vector<16x1xf32> to vector<16x1xf32>
    %13 = vector.broadcast %12 : vector<16x1xf32> to vector<16x128xf32>
    %c0_1 = arith.constant 0 : index
    %c0_2 = arith.constant 0 : index
    %14 = vector.load %arg0[%c0_1, %c0_2] : memref<16x128xf32, #tpu.memory_space<vmem>>, vector<16x128xf32>
    %c0_3 = arith.constant 0 : index
    %c0_4 = arith.constant 0 : index
    %15 = vector.load %arg1[%c0_3, %c0_4] : memref<1x128xf32, #tpu.memory_space<vmem>>, vector<1x128xf32>
    %16 = vector.extract_strided_slice %14 {offsets = [0, 0], sizes = [1, 128], strides = [1, 1]} : vector<16x128xf32> to vector<1x128xf32>
    %17 = vector.broadcast %16 : vector<1x128xf32> to vector<16x128xf32>
    %18 = arith.mulf %9, %17 : vector<16x128xf32>
    %19 = vector.broadcast %15 : vector<1x128xf32> to vector<16x128xf32>
    %20 = arith.mulf %11, %19 : vector<16x128xf32>
    %21 = arith.addf %18, %20 : vector<16x128xf32>
    %22 = arith.addf %21, %13 : vector<16x128xf32>
    %cst = arith.constant 5.000000e-01 : f32
    %23 = vector.broadcast %cst : f32 to vector<16x128xf32>
    %24 = arith.mulf %23, %22 : vector<16x128xf32>
    %25 = math.tanh %24 : vector<16x128xf32>
    %cst_5 = arith.constant 5.000000e-01 : f32
    %26 = vector.broadcast %cst_5 : f32 to vector<16x128xf32>
    %27 = arith.mulf %26, %25 : vector<16x128xf32>
    %cst_6 = arith.constant 5.000000e-01 : f32
    %28 = vector.broadcast %cst_6 : f32 to vector<16x128xf32>
    %29 = arith.addf %27, %28 : vector<16x128xf32>
    %cst_7 = arith.constant dense<0.000000e+00> : vector<16xf32>
    %30 = vector.multi_reduction <add>, %29, %cst_7 [1] : vector<16x128xf32> to vector<16xf32>
    %31 = vector.shape_cast %30 : vector<16xf32> to vector<16x1xf32>
    %32 = arith.mulf %29, %29 : vector<16x128xf32>
    %cst_8 = arith.constant dense<0.000000e+00> : vector<16xf32>
    %33 = vector.multi_reduction <add>, %32, %cst_8 [1] : vector<16x128xf32> to vector<16xf32>
    %34 = vector.shape_cast %33 : vector<16xf32> to vector<16x1xf32>
    %cst_9 = arith.constant 7.812500e-03 : f32
    %35 = vector.broadcast %cst_9 : f32 to vector<16x1xf32>
    %36 = arith.mulf %31, %35 : vector<16x1xf32>
    %cst_10 = arith.constant 7.812500e-03 : f32
    %37 = vector.broadcast %cst_10 : f32 to vector<16x1xf32>
    %38 = arith.mulf %34, %37 : vector<16x1xf32>
    %39 = arith.mulf %36, %36 : vector<16x1xf32>
    %40 = arith.subf %38, %39 : vector<16x1xf32>
    %cst_11 = arith.constant 0.000000e+00 : f32
    %41 = vector.broadcast %cst_11 : f32 to vector<16x1xf32>
    %42 = arith.maximumf %40, %41 : vector<16x1xf32>
    %cst_12 = arith.constant 9.99999974E-6 : f32
    %43 = vector.broadcast %cst_12 : f32 to vector<16x1xf32>
    %44 = arith.addf %42, %43 : vector<16x1xf32>
    %45 = math.rsqrt %44 : vector<16x1xf32>
    %46 = arith.mulf %4, %45 : vector<16x1xf32>
    %47 = arith.mulf %36, %46 : vector<16x1xf32>
    %48 = arith.subf %5, %47 : vector<16x1xf32>
    %49 = arith.mulf %46, %6 : vector<16x1xf32>
    %50 = arith.mulf %48, %6 : vector<16x1xf32>
    %cst_13 = arith.constant dense<0.000000e+00> : vector<1xf32>
    %51 = vector.multi_reduction <add>, %50, %cst_13 [0] : vector<16x1xf32> to vector<1xf32>
    %52 = vector.shape_cast %51 : vector<1xf32> to vector<1x1xf32>
    %53 = arith.addf %52, %7 : vector<1x1xf32>
    %54 = vector.broadcast %49 : vector<16x1xf32> to vector<16x128xf32>
    %55 = arith.mulf %29, %54 : vector<16x128xf32>
    %cst_14 = arith.constant dense<0.000000e+00> : vector<128xf32>
    %56 = vector.multi_reduction <add>, %55, %cst_14 [0] : vector<16x128xf32> to vector<128xf32>
    %57 = vector.shape_cast %56 : vector<128xf32> to vector<1x128xf32>
    %58 = vector.broadcast %53 : vector<1x1xf32> to vector<1x128xf32>
    %59 = arith.addf %57, %58 : vector<1x128xf32>
    %cst_15 = arith.constant 5.000000e-01 : f32
    %60 = vector.broadcast %cst_15 : f32 to vector<1x128xf32>
    %61 = arith.mulf %60, %59 : vector<1x128xf32>
    %62 = math.tanh %61 : vector<1x128xf32>
    %cst_16 = arith.constant 5.000000e-01 : f32
    %63 = vector.broadcast %cst_16 : f32 to vector<1x128xf32>
    %64 = arith.mulf %63, %62 : vector<1x128xf32>
    %cst_17 = arith.constant 5.000000e-01 : f32
    %65 = vector.broadcast %cst_17 : f32 to vector<1x128xf32>
    %66 = arith.addf %64, %65 : vector<1x128xf32>
    %c0_18 = arith.constant 0 : index
    %c0_19 = arith.constant 0 : index
    %67 = vector.load %arg3[%c0_18, %c0_19] : memref<16x128xf32, #tpu.memory_space<vmem>>, vector<1x128xf32>
    tpu.vector_store %arg3[%c0_18, %c0_19], %66 {strides = array<i32>} : memref<16x128xf32, #tpu.memory_space<vmem>>, vector<1x128xf32>,
    %68 = vector.extract_strided_slice %14 {offsets = [1, 0], sizes = [1, 128], strides = [1, 1]} : vector<16x128xf32> to vector<1x128xf32>
    %69 = vector.broadcast %68 : vector<1x128xf32> to vector<16x128xf32>
    %70 = arith.mulf %9, %69 : vector<16x128xf32>
    %71 = vector.broadcast %66 : vector<1x128xf32> to vector<16x128xf32>
    %72 = arith.mulf %11, %71 : vector<16x128xf32>
    %73 = arith.addf %70, %72 : vector<16x128xf32>
    %74 = arith.addf %73, %13 : vector<16x128xf32>
    %cst_20 = arith.constant 5.000000e-01 : f32
    %75 = vector.broadcast %cst_20 : f32 to vector<16x128xf32>
    %76 = arith.mulf %75, %74 : vector<16x128xf32>
    %77 = math.tanh %76 : vector<16x128xf32>
    %cst_21 = arith.constant 5.000000e-01 : f32
    %78 = vector.broadcast %cst_21 : f32 to vector<16x128xf32>
    %79 = arith.mulf %78, %77 : vector<16x128xf32>
    %cst_22 = arith.constant 5.000000e-01 : f32
    %80 = vector.broadcast %cst_22 : f32 to vector<16x128xf32>
    %81 = arith.addf %79, %80 : vector<16x128xf32>
    %cst_23 = arith.constant dense<0.000000e+00> : vector<16xf32>
    %82 = vector.multi_reduction <add>, %81, %cst_23 [1] : vector<16x128xf32> to vector<16xf32>
    %83 = vector.shape_cast %82 : vector<16xf32> to vector<16x1xf32>
    %84 = arith.mulf %81, %81 : vector<16x128xf32>
    %cst_24 = arith.constant dense<0.000000e+00> : vector<16xf32>
    %85 = vector.multi_reduction <add>, %84, %cst_24 [1] : vector<16x128xf32> to vector<16xf32>
    %86 = vector.shape_cast %85 : vector<16xf32> to vector<16x1xf32>
    %cst_25 = arith.constant 7.812500e-03 : f32
    %87 = vector.broadcast %cst_25 : f32 to vector<16x1xf32>
    %88 = arith.mulf %83, %87 : vector<16x1xf32>
    %cst_26 = arith.constant 7.812500e-03 : f32
    %89 = vector.broadcast %cst_26 : f32 to vector<16x1xf32>
    %90 = arith.mulf %86, %89 : vector<16x1xf32>
    %91 = arith.mulf %88, %88 : vector<16x1xf32>
    %92 = arith.subf %90, %91 : vector<16x1xf32>
    %cst_27 = arith.constant 0.000000e+00 : f32
    %93 = vector.broadcast %cst_27 : f32 to vector<16x1xf32>
    %94 = arith.maximumf %92, %93 : vector<16x1xf32>
    %cst_28 = arith.constant 9.99999974E-6 : f32
    %95 = vector.broadcast %cst_28 : f32 to vector<16x1xf32>
    %96 = arith.addf %94, %95 : vector<16x1xf32>
    %97 = math.rsqrt %96 : vector<16x1xf32>
    %98 = arith.mulf %4, %97 : vector<16x1xf32>
    %99 = arith.mulf %88, %98 : vector<16x1xf32>
    %100 = arith.subf %5, %99 : vector<16x1xf32>
    %101 = arith.mulf %98, %6 : vector<16x1xf32>
    %102 = arith.mulf %100, %6 : vector<16x1xf32>
    %cst_29 = arith.constant dense<0.000000e+00> : vector<1xf32>
    %103 = vector.multi_reduction <add>, %102, %cst_29 [0] : vector<16x1xf32> to vector<1xf32>
    %104 = vector.shape_cast %103 : vector<1xf32> to vector<1x1xf32>
    %105 = arith.addf %104, %7 : vector<1x1xf32>
    %106 = vector.broadcast %101 : vector<16x1xf32> to vector<16x128xf32>
    %107 = arith.mulf %81, %106 : vector<16x128xf32>
    %cst_30 = arith.constant dense<0.000000e+00> : vector<128xf32>
    %108 = vector.multi_reduction <add>, %107, %cst_30 [0] : vector<16x128xf32> to vector<128xf32>
    %109 = vector.shape_cast %108 : vector<128xf32> to vector<1x128xf32>
    %110 = vector.broadcast %105 : vector<1x1xf32> to vector<1x128xf32>
    %111 = arith.addf %109, %110 : vector<1x128xf32>
    %cst_31 = arith.constant 5.000000e-01 : f32
    %112 = vector.broadcast %cst_31 : f32 to vector<1x128xf32>
    %113 = arith.mulf %112, %111 : vector<1x128xf32>
    %114 = math.tanh %113 : vector<1x128xf32>
    %cst_32 = arith.constant 5.000000e-01 : f32
    %115 = vector.broadcast %cst_32 : f32 to vector<1x128xf32>
    %116 = arith.mulf %115, %114 : vector<1x128xf32>
    %cst_33 = arith.constant 5.000000e-01 : f32
    %117 = vector.broadcast %cst_33 : f32 to vector<1x128xf32>
    %118 = arith.addf %116, %117 : vector<1x128xf32>
    %c1 = arith.constant 1 : index
    %c0_34 = arith.constant 0 : index
    %119 = vector.load %arg3[%c1, %c0_34] : memref<16x128xf32, #tpu.memory_space<vmem>>, vector<1x128xf32>
    tpu.vector_store %arg3[%c1, %c0_34], %118 {strides = array<i32>} : memref<16x128xf32, #tpu.memory_space<vmem>>, vector<1x128xf32>,
    %120 = vector.extract_strided_slice %14 {offsets = [2, 0], sizes = [1, 128], strides = [1, 1]} : vector<16x128xf32> to vector<1x128xf32>
    %121 = vector.broadcast %120 : vector<1x128xf32> to vector<16x128xf32>
    %122 = arith.mulf %9, %121 : vector<16x128xf32>
    %123 = vector.broadcast %118 : vector<1x128xf32> to vector<16x128xf32>
    %124 = arith.mulf %11, %123 : vector<16x128xf32>
    %125 = arith.addf %122, %124 : vector<16x128xf32>
    %126 = arith.addf %125, %13 : vector<16x128xf32>
    %cst_35 = arith.constant 5.000000e-01 : f32
    %127 = vector.broadcast %cst_35 : f32 to vector<16x128xf32>
    %128 = arith.mulf %127, %126 : vector<16x128xf32>
    %129 = math.tanh %128 : vector<16x128xf32>
    %cst_36 = arith.constant 5.000000e-01 : f32
    %130 = vector.broadcast %cst_36 : f32 to vector<16x128xf32>
    %131 = arith.mulf %130, %129 : vector<16x128xf32>
    %cst_37 = arith.constant 5.000000e-01 : f32
    %132 = vector.broadcast %cst_37 : f32 to vector<16x128xf32>
    %133 = arith.addf %131, %132 : vector<16x128xf32>
    %cst_38 = arith.constant dense<0.000000e+00> : vector<16xf32>
    %134 = vector.multi_reduction <add>, %133, %cst_38 [1] : vector<16x128xf32> to vector<16xf32>
    %135 = vector.shape_cast %134 : vector<16xf32> to vector<16x1xf32>
    %136 = arith.mulf %133, %133 : vector<16x128xf32>
    %cst_39 = arith.constant dense<0.000000e+00> : vector<16xf32>
    %137 = vector.multi_reduction <add>, %136, %cst_39 [1] : vector<16x128xf32> to vector<16xf32>
    %138 = vector.shape_cast %137 : vector<16xf32> to vector<16x1xf32>
    %cst_40 = arith.constant 7.812500e-03 : f32
    %139 = vector.broadcast %cst_40 : f32 to vector<16x1xf32>
    %140 = arith.mulf %135, %139 : vector<16x1xf32>
    %cst_41 = arith.constant 7.812500e-03 : f32
    %141 = vector.broadcast %cst_41 : f32 to vector<16x1xf32>
    %142 = arith.mulf %138, %141 : vector<16x1xf32>
    %143 = arith.mulf %140, %140 : vector<16x1xf32>
    %144 = arith.subf %142, %143 : vector<16x1xf32>
    %cst_42 = arith.constant 0.000000e+00 : f32
    %145 = vector.broadcast %cst_42 : f32 to vector<16x1xf32>
    %146 = arith.maximumf %144, %145 : vector<16x1xf32>
    %cst_43 = arith.constant 9.99999974E-6 : f32
    %147 = vector.broadcast %cst_43 : f32 to vector<16x1xf32>
    %148 = arith.addf %146, %147 : vector<16x1xf32>
    %149 = math.rsqrt %148 : vector<16x1xf32>
    %150 = arith.mulf %4, %149 : vector<16x1xf32>
    %151 = arith.mulf %140, %150 : vector<16x1xf32>
    %152 = arith.subf %5, %151 : vector<16x1xf32>
    %153 = arith.mulf %150, %6 : vector<16x1xf32>
    %154 = arith.mulf %152, %6 : vector<16x1xf32>
    %cst_44 = arith.constant dense<0.000000e+00> : vector<1xf32>
    %155 = vector.multi_reduction <add>, %154, %cst_44 [0] : vector<16x1xf32> to vector<1xf32>
    %156 = vector.shape_cast %155 : vector<1xf32> to vector<1x1xf32>
    %157 = arith.addf %156, %7 : vector<1x1xf32>
    %158 = vector.broadcast %153 : vector<16x1xf32> to vector<16x128xf32>
    %159 = arith.mulf %133, %158 : vector<16x128xf32>
    %cst_45 = arith.constant dense<0.000000e+00> : vector<128xf32>
    %160 = vector.multi_reduction <add>, %159, %cst_45 [0] : vector<16x128xf32> to vector<128xf32>
    %161 = vector.shape_cast %160 : vector<128xf32> to vector<1x128xf32>
    %162 = vector.broadcast %157 : vector<1x1xf32> to vector<1x128xf32>
    %163 = arith.addf %161, %162 : vector<1x128xf32>
    %cst_46 = arith.constant 5.000000e-01 : f32
    %164 = vector.broadcast %cst_46 : f32 to vector<1x128xf32>
    %165 = arith.mulf %164, %163 : vector<1x128xf32>
    %166 = math.tanh %165 : vector<1x128xf32>
    %cst_47 = arith.constant 5.000000e-01 : f32
    %167 = vector.broadcast %cst_47 : f32 to vector<1x128xf32>
    %168 = arith.mulf %167, %166 : vector<1x128xf32>
    %cst_48 = arith.constant 5.000000e-01 : f32
    %169 = vector.broadcast %cst_48 : f32 to vector<1x128xf32>
    %170 = arith.addf %168, %169 : vector<1x128xf32>
    %c2 = arith.constant 2 : index
    %c0_49 = arith.constant 0 : index
    %171 = vector.load %arg3[%c2, %c0_49] : memref<16x128xf32, #tpu.memory_space<vmem>>, vector<1x128xf32>
    tpu.vector_store %arg3[%c2, %c0_49], %170 {strides = array<i32>} : memref<16x128xf32, #tpu.memory_space<vmem>>, vector<1x128xf32>,
    %172 = vector.extract_strided_slice %14 {offsets = [3, 0], sizes = [1, 128], strides = [1, 1]} : vector<16x128xf32> to vector<1x128xf32>
    %173 = vector.broadcast %172 : vector<1x128xf32> to vector<16x128xf32>
    %174 = arith.mulf %9, %173 : vector<16x128xf32>
    %175 = vector.broadcast %170 : vector<1x128xf32> to vector<16x128xf32>
    %176 = arith.mulf %11, %175 : vector<16x128xf32>
    %177 = arith.addf %174, %176 : vector<16x128xf32>
    %178 = arith.addf %177, %13 : vector<16x128xf32>
    %cst_50 = arith.constant 5.000000e-01 : f32
    %179 = vector.broadcast %cst_50 : f32 to vector<16x128xf32>
    %180 = arith.mulf %179, %178 : vector<16x128xf32>
    %181 = math.tanh %180 : vector<16x128xf32>
    %cst_51 = arith.constant 5.000000e-01 : f32
    %182 = vector.broadcast %cst_51 : f32 to vector<16x128xf32>
    %183 = arith.mulf %182, %181 : vector<16x128xf32>
    %cst_52 = arith.constant 5.000000e-01 : f32
    %184 = vector.broadcast %cst_52 : f32 to vector<16x128xf32>
    %185 = arith.addf %183, %184 : vector<16x128xf32>
    %cst_53 = arith.constant dense<0.000000e+00> : vector<16xf32>
    %186 = vector.multi_reduction <add>, %185, %cst_53 [1] : vector<16x128xf32> to vector<16xf32>
    %187 = vector.shape_cast %186 : vector<16xf32> to vector<16x1xf32>
    %188 = arith.mulf %185, %185 : vector<16x128xf32>
    %cst_54 = arith.constant dense<0.000000e+00> : vector<16xf32>
    %189 = vector.multi_reduction <add>, %188, %cst_54 [1] : vector<16x128xf32> to vector<16xf32>
    %190 = vector.shape_cast %189 : vector<16xf32> to vector<16x1xf32>
    %cst_55 = arith.constant 7.812500e-03 : f32
    %191 = vector.broadcast %cst_55 : f32 to vector<16x1xf32>
    %192 = arith.mulf %187, %191 : vector<16x1xf32>
    %cst_56 = arith.constant 7.812500e-03 : f32
    %193 = vector.broadcast %cst_56 : f32 to vector<16x1xf32>
    %194 = arith.mulf %190, %193 : vector<16x1xf32>
    %195 = arith.mulf %192, %192 : vector<16x1xf32>
    %196 = arith.subf %194, %195 : vector<16x1xf32>
    %cst_57 = arith.constant 0.000000e+00 : f32
    %197 = vector.broadcast %cst_57 : f32 to vector<16x1xf32>
    %198 = arith.maximumf %196, %197 : vector<16x1xf32>
    %cst_58 = arith.constant 9.99999974E-6 : f32
    %199 = vector.broadcast %cst_58 : f32 to vector<16x1xf32>
    %200 = arith.addf %198, %199 : vector<16x1xf32>
    %201 = math.rsqrt %200 : vector<16x1xf32>
    %202 = arith.mulf %4, %201 : vector<16x1xf32>
    %203 = arith.mulf %192, %202 : vector<16x1xf32>
    %204 = arith.subf %5, %203 : vector<16x1xf32>
    %205 = arith.mulf %202, %6 : vector<16x1xf32>
    %206 = arith.mulf %204, %6 : vector<16x1xf32>
    %cst_59 = arith.constant dense<0.000000e+00> : vector<1xf32>
    %207 = vector.multi_reduction <add>, %206, %cst_59 [0] : vector<16x1xf32> to vector<1xf32>
    %208 = vector.shape_cast %207 : vector<1xf32> to vector<1x1xf32>
    %209 = arith.addf %208, %7 : vector<1x1xf32>
    %210 = vector.broadcast %205 : vector<16x1xf32> to vector<16x128xf32>
    %211 = arith.mulf %185, %210 : vector<16x128xf32>
    %cst_60 = arith.constant dense<0.000000e+00> : vector<128xf32>
    %212 = vector.multi_reduction <add>, %211, %cst_60 [0] : vector<16x128xf32> to vector<128xf32>
    %213 = vector.shape_cast %212 : vector<128xf32> to vector<1x128xf32>
    %214 = vector.broadcast %209 : vector<1x1xf32> to vector<1x128xf32>
    %215 = arith.addf %213, %214 : vector<1x128xf32>
    %cst_61 = arith.constant 5.000000e-01 : f32
    %216 = vector.broadcast %cst_61 : f32 to vector<1x128xf32>
    %217 = arith.mulf %216, %215 : vector<1x128xf32>
    %218 = math.tanh %217 : vector<1x128xf32>
    %cst_62 = arith.constant 5.000000e-01 : f32
    %219 = vector.broadcast %cst_62 : f32 to vector<1x128xf32>
    %220 = arith.mulf %219, %218 : vector<1x128xf32>
    %cst_63 = arith.constant 5.000000e-01 : f32
    %221 = vector.broadcast %cst_63 : f32 to vector<1x128xf32>
    %222 = arith.addf %220, %221 : vector<1x128xf32>
    %c3 = arith.constant 3 : index
    %c0_64 = arith.constant 0 : index
    %223 = vector.load %arg3[%c3, %c0_64] : memref<16x128xf32, #tpu.memory_space<vmem>>, vector<1x128xf32>
    tpu.vector_store %arg3[%c3, %c0_64], %222 {strides = array<i32>} : memref<16x128xf32, #tpu.memory_space<vmem>>, vector<1x128xf32>,
    %224 = vector.extract_strided_slice %14 {offsets = [4, 0], sizes = [1, 128], strides = [1, 1]} : vector<16x128xf32> to vector<1x128xf32>
    %225 = vector.broadcast %224 : vector<1x128xf32> to vector<16x128xf32>
    %226 = arith.mulf %9, %225 : vector<16x128xf32>
    %227 = vector.broadcast %222 : vector<1x128xf32> to vector<16x128xf32>
    %228 = arith.mulf %11, %227 : vector<16x128xf32>
    %229 = arith.addf %226, %228 : vector<16x128xf32>
    %230 = arith.addf %229, %13 : vector<16x128xf32>
    %cst_65 = arith.constant 5.000000e-01 : f32
    %231 = vector.broadcast %cst_65 : f32 to vector<16x128xf32>
    %232 = arith.mulf %231, %230 : vector<16x128xf32>
    %233 = math.tanh %232 : vector<16x128xf32>
    %cst_66 = arith.constant 5.000000e-01 : f32
    %234 = vector.broadcast %cst_66 : f32 to vector<16x128xf32>
    %235 = arith.mulf %234, %233 : vector<16x128xf32>
    %cst_67 = arith.constant 5.000000e-01 : f32
    %236 = vector.broadcast %cst_67 : f32 to vector<16x128xf32>
    %237 = arith.addf %235, %236 : vector<16x128xf32>
    %cst_68 = arith.constant dense<0.000000e+00> : vector<16xf32>
    %238 = vector.multi_reduction <add>, %237, %cst_68 [1] : vector<16x128xf32> to vector<16xf32>
    %239 = vector.shape_cast %238 : vector<16xf32> to vector<16x1xf32>
    %240 = arith.mulf %237, %237 : vector<16x128xf32>
    %cst_69 = arith.constant dense<0.000000e+00> : vector<16xf32>
    %241 = vector.multi_reduction <add>, %240, %cst_69 [1] : vector<16x128xf32> to vector<16xf32>
    %242 = vector.shape_cast %241 : vector<16xf32> to vector<16x1xf32>
    %cst_70 = arith.constant 7.812500e-03 : f32
    %243 = vector.broadcast %cst_70 : f32 to vector<16x1xf32>
    %244 = arith.mulf %239, %243 : vector<16x1xf32>
    %cst_71 = arith.constant 7.812500e-03 : f32
    %245 = vector.broadcast %cst_71 : f32 to vector<16x1xf32>
    %246 = arith.mulf %242, %245 : vector<16x1xf32>
    %247 = arith.mulf %244, %244 : vector<16x1xf32>
    %248 = arith.subf %246, %247 : vector<16x1xf32>
    %cst_72 = arith.constant 0.000000e+00 : f32
    %249 = vector.broadcast %cst_72 : f32 to vector<16x1xf32>
    %250 = arith.maximumf %248, %249 : vector<16x1xf32>
    %cst_73 = arith.constant 9.99999974E-6 : f32
    %251 = vector.broadcast %cst_73 : f32 to vector<16x1xf32>
    %252 = arith.addf %250, %251 : vector<16x1xf32>
    %253 = math.rsqrt %252 : vector<16x1xf32>
    %254 = arith.mulf %4, %253 : vector<16x1xf32>
    %255 = arith.mulf %244, %254 : vector<16x1xf32>
    %256 = arith.subf %5, %255 : vector<16x1xf32>
    %257 = arith.mulf %254, %6 : vector<16x1xf32>
    %258 = arith.mulf %256, %6 : vector<16x1xf32>
    %cst_74 = arith.constant dense<0.000000e+00> : vector<1xf32>
    %259 = vector.multi_reduction <add>, %258, %cst_74 [0] : vector<16x1xf32> to vector<1xf32>
    %260 = vector.shape_cast %259 : vector<1xf32> to vector<1x1xf32>
    %261 = arith.addf %260, %7 : vector<1x1xf32>
    %262 = vector.broadcast %257 : vector<16x1xf32> to vector<16x128xf32>
    %263 = arith.mulf %237, %262 : vector<16x128xf32>
    %cst_75 = arith.constant dense<0.000000e+00> : vector<128xf32>
    %264 = vector.multi_reduction <add>, %263, %cst_75 [0] : vector<16x128xf32> to vector<128xf32>
    %265 = vector.shape_cast %264 : vector<128xf32> to vector<1x128xf32>
    %266 = vector.broadcast %261 : vector<1x1xf32> to vector<1x128xf32>
    %267 = arith.addf %265, %266 : vector<1x128xf32>
    %cst_76 = arith.constant 5.000000e-01 : f32
    %268 = vector.broadcast %cst_76 : f32 to vector<1x128xf32>
    %269 = arith.mulf %268, %267 : vector<1x128xf32>
    %270 = math.tanh %269 : vector<1x128xf32>
    %cst_77 = arith.constant 5.000000e-01 : f32
    %271 = vector.broadcast %cst_77 : f32 to vector<1x128xf32>
    %272 = arith.mulf %271, %270 : vector<1x128xf32>
    %cst_78 = arith.constant 5.000000e-01 : f32
    %273 = vector.broadcast %cst_78 : f32 to vector<1x128xf32>
    %274 = arith.addf %272, %273 : vector<1x128xf32>
    %c4 = arith.constant 4 : index
    %c0_79 = arith.constant 0 : index
    %275 = vector.load %arg3[%c4, %c0_79] : memref<16x128xf32, #tpu.memory_space<vmem>>, vector<1x128xf32>
    tpu.vector_store %arg3[%c4, %c0_79], %274 {strides = array<i32>} : memref<16x128xf32, #tpu.memory_space<vmem>>, vector<1x128xf32>,
    %276 = vector.extract_strided_slice %14 {offsets = [5, 0], sizes = [1, 128], strides = [1, 1]} : vector<16x128xf32> to vector<1x128xf32>
    %277 = vector.broadcast %276 : vector<1x128xf32> to vector<16x128xf32>
    %278 = arith.mulf %9, %277 : vector<16x128xf32>
    %279 = vector.broadcast %274 : vector<1x128xf32> to vector<16x128xf32>
    %280 = arith.mulf %11, %279 : vector<16x128xf32>
    %281 = arith.addf %278, %280 : vector<16x128xf32>
    %282 = arith.addf %281, %13 : vector<16x128xf32>
    %cst_80 = arith.constant 5.000000e-01 : f32
    %283 = vector.broadcast %cst_80 : f32 to vector<16x128xf32>
    %284 = arith.mulf %283, %282 : vector<16x128xf32>
    %285 = math.tanh %284 : vector<16x128xf32>
    %cst_81 = arith.constant 5.000000e-01 : f32
    %286 = vector.broadcast %cst_81 : f32 to vector<16x128xf32>
    %287 = arith.mulf %286, %285 : vector<16x128xf32>
    %cst_82 = arith.constant 5.000000e-01 : f32
    %288 = vector.broadcast %cst_82 : f32 to vector<16x128xf32>
    %289 = arith.addf %287, %288 : vector<16x128xf32>
    %cst_83 = arith.constant dense<0.000000e+00> : vector<16xf32>
    %290 = vector.multi_reduction <add>, %289, %cst_83 [1] : vector<16x128xf32> to vector<16xf32>
    %291 = vector.shape_cast %290 : vector<16xf32> to vector<16x1xf32>
    %292 = arith.mulf %289, %289 : vector<16x128xf32>
    %cst_84 = arith.constant dense<0.000000e+00> : vector<16xf32>
    %293 = vector.multi_reduction <add>, %292, %cst_84 [1] : vector<16x128xf32> to vector<16xf32>
    %294 = vector.shape_cast %293 : vector<16xf32> to vector<16x1xf32>
    %cst_85 = arith.constant 7.812500e-03 : f32
    %295 = vector.broadcast %cst_85 : f32 to vector<16x1xf32>
    %296 = arith.mulf %291, %295 : vector<16x1xf32>
    %cst_86 = arith.constant 7.812500e-03 : f32
    %297 = vector.broadcast %cst_86 : f32 to vector<16x1xf32>
    %298 = arith.mulf %294, %297 : vector<16x1xf32>
    %299 = arith.mulf %296, %296 : vector<16x1xf32>
    %300 = arith.subf %298, %299 : vector<16x1xf32>
    %cst_87 = arith.constant 0.000000e+00 : f32
    %301 = vector.broadcast %cst_87 : f32 to vector<16x1xf32>
    %302 = arith.maximumf %300, %301 : vector<16x1xf32>
    %cst_88 = arith.constant 9.99999974E-6 : f32
    %303 = vector.broadcast %cst_88 : f32 to vector<16x1xf32>
    %304 = arith.addf %302, %303 : vector<16x1xf32>
    %305 = math.rsqrt %304 : vector<16x1xf32>
    %306 = arith.mulf %4, %305 : vector<16x1xf32>
    %307 = arith.mulf %296, %306 : vector<16x1xf32>
    %308 = arith.subf %5, %307 : vector<16x1xf32>
    %309 = arith.mulf %306, %6 : vector<16x1xf32>
    %310 = arith.mulf %308, %6 : vector<16x1xf32>
    %cst_89 = arith.constant dense<0.000000e+00> : vector<1xf32>
    %311 = vector.multi_reduction <add>, %310, %cst_89 [0] : vector<16x1xf32> to vector<1xf32>
    %312 = vector.shape_cast %311 : vector<1xf32> to vector<1x1xf32>
    %313 = arith.addf %312, %7 : vector<1x1xf32>
    %314 = vector.broadcast %309 : vector<16x1xf32> to vector<16x128xf32>
    %315 = arith.mulf %289, %314 : vector<16x128xf32>
    %cst_90 = arith.constant dense<0.000000e+00> : vector<128xf32>
    %316 = vector.multi_reduction <add>, %315, %cst_90 [0] : vector<16x128xf32> to vector<128xf32>
    %317 = vector.shape_cast %316 : vector<128xf32> to vector<1x128xf32>
    %318 = vector.broadcast %313 : vector<1x1xf32> to vector<1x128xf32>
    %319 = arith.addf %317, %318 : vector<1x128xf32>
    %cst_91 = arith.constant 5.000000e-01 : f32
    %320 = vector.broadcast %cst_91 : f32 to vector<1x128xf32>
    %321 = arith.mulf %320, %319 : vector<1x128xf32>
    %322 = math.tanh %321 : vector<1x128xf32>
    %cst_92 = arith.constant 5.000000e-01 : f32
    %323 = vector.broadcast %cst_92 : f32 to vector<1x128xf32>
    %324 = arith.mulf %323, %322 : vector<1x128xf32>
    %cst_93 = arith.constant 5.000000e-01 : f32
    %325 = vector.broadcast %cst_93 : f32 to vector<1x128xf32>
    %326 = arith.addf %324, %325 : vector<1x128xf32>
    %c5 = arith.constant 5 : index
    %c0_94 = arith.constant 0 : index
    %327 = vector.load %arg3[%c5, %c0_94] : memref<16x128xf32, #tpu.memory_space<vmem>>, vector<1x128xf32>
    tpu.vector_store %arg3[%c5, %c0_94], %326 {strides = array<i32>} : memref<16x128xf32, #tpu.memory_space<vmem>>, vector<1x128xf32>,
    %328 = vector.extract_strided_slice %14 {offsets = [6, 0], sizes = [1, 128], strides = [1, 1]} : vector<16x128xf32> to vector<1x128xf32>
    %329 = vector.broadcast %328 : vector<1x128xf32> to vector<16x128xf32>
    %330 = arith.mulf %9, %329 : vector<16x128xf32>
    %331 = vector.broadcast %326 : vector<1x128xf32> to vector<16x128xf32>
    %332 = arith.mulf %11, %331 : vector<16x128xf32>
    %333 = arith.addf %330, %332 : vector<16x128xf32>
    %334 = arith.addf %333, %13 : vector<16x128xf32>
    %cst_95 = arith.constant 5.000000e-01 : f32
    %335 = vector.broadcast %cst_95 : f32 to vector<16x128xf32>
    %336 = arith.mulf %335, %334 : vector<16x128xf32>
    %337 = math.tanh %336 : vector<16x128xf32>
    %cst_96 = arith.constant 5.000000e-01 : f32
    %338 = vector.broadcast %cst_96 : f32 to vector<16x128xf32>
    %339 = arith.mulf %338, %337 : vector<16x128xf32>
    %cst_97 = arith.constant 5.000000e-01 : f32
    %340 = vector.broadcast %cst_97 : f32 to vector<16x128xf32>
    %341 = arith.addf %339, %340 : vector<16x128xf32>
    %cst_98 = arith.constant dense<0.000000e+00> : vector<16xf32>
    %342 = vector.multi_reduction <add>, %341, %cst_98 [1] : vector<16x128xf32> to vector<16xf32>
    %343 = vector.shape_cast %342 : vector<16xf32> to vector<16x1xf32>
    %344 = arith.mulf %341, %341 : vector<16x128xf32>
    %cst_99 = arith.constant dense<0.000000e+00> : vector<16xf32>
    %345 = vector.multi_reduction <add>, %344, %cst_99 [1] : vector<16x128xf32> to vector<16xf32>
    %346 = vector.shape_cast %345 : vector<16xf32> to vector<16x1xf32>
    %cst_100 = arith.constant 7.812500e-03 : f32
    %347 = vector.broadcast %cst_100 : f32 to vector<16x1xf32>
    %348 = arith.mulf %343, %347 : vector<16x1xf32>
    %cst_101 = arith.constant 7.812500e-03 : f32
    %349 = vector.broadcast %cst_101 : f32 to vector<16x1xf32>
    %350 = arith.mulf %346, %349 : vector<16x1xf32>
    %351 = arith.mulf %348, %348 : vector<16x1xf32>
    %352 = arith.subf %350, %351 : vector<16x1xf32>
    %cst_102 = arith.constant 0.000000e+00 : f32
    %353 = vector.broadcast %cst_102 : f32 to vector<16x1xf32>
    %354 = arith.maximumf %352, %353 : vector<16x1xf32>
    %cst_103 = arith.constant 9.99999974E-6 : f32
    %355 = vector.broadcast %cst_103 : f32 to vector<16x1xf32>
    %356 = arith.addf %354, %355 : vector<16x1xf32>
    %357 = math.rsqrt %356 : vector<16x1xf32>
    %358 = arith.mulf %4, %357 : vector<16x1xf32>
    %359 = arith.mulf %348, %358 : vector<16x1xf32>
    %360 = arith.subf %5, %359 : vector<16x1xf32>
    %361 = arith.mulf %358, %6 : vector<16x1xf32>
    %362 = arith.mulf %360, %6 : vector<16x1xf32>
    %cst_104 = arith.constant dense<0.000000e+00> : vector<1xf32>
    %363 = vector.multi_reduction <add>, %362, %cst_104 [0] : vector<16x1xf32> to vector<1xf32>
    %364 = vector.shape_cast %363 : vector<1xf32> to vector<1x1xf32>
    %365 = arith.addf %364, %7 : vector<1x1xf32>
    %366 = vector.broadcast %361 : vector<16x1xf32> to vector<16x128xf32>
    %367 = arith.mulf %341, %366 : vector<16x128xf32>
    %cst_105 = arith.constant dense<0.000000e+00> : vector<128xf32>
    %368 = vector.multi_reduction <add>, %367, %cst_105 [0] : vector<16x128xf32> to vector<128xf32>
    %369 = vector.shape_cast %368 : vector<128xf32> to vector<1x128xf32>
    %370 = vector.broadcast %365 : vector<1x1xf32> to vector<1x128xf32>
    %371 = arith.addf %369, %370 : vector<1x128xf32>
    %cst_106 = arith.constant 5.000000e-01 : f32
    %372 = vector.broadcast %cst_106 : f32 to vector<1x128xf32>
    %373 = arith.mulf %372, %371 : vector<1x128xf32>
    %374 = math.tanh %373 : vector<1x128xf32>
    %cst_107 = arith.constant 5.000000e-01 : f32
    %375 = vector.broadcast %cst_107 : f32 to vector<1x128xf32>
    %376 = arith.mulf %375, %374 : vector<1x128xf32>
    %cst_108 = arith.constant 5.000000e-01 : f32
    %377 = vector.broadcast %cst_108 : f32 to vector<1x128xf32>
    %378 = arith.addf %376, %377 : vector<1x128xf32>
    %c6 = arith.constant 6 : index
    %c0_109 = arith.constant 0 : index
    %379 = vector.load %arg3[%c6, %c0_109] : memref<16x128xf32, #tpu.memory_space<vmem>>, vector<1x128xf32>
    tpu.vector_store %arg3[%c6, %c0_109], %378 {strides = array<i32>} : memref<16x128xf32, #tpu.memory_space<vmem>>, vector<1x128xf32>,
    %380 = vector.extract_strided_slice %14 {offsets = [7, 0], sizes = [1, 128], strides = [1, 1]} : vector<16x128xf32> to vector<1x128xf32>
    %381 = vector.broadcast %380 : vector<1x128xf32> to vector<16x128xf32>
    %382 = arith.mulf %9, %381 : vector<16x128xf32>
    %383 = vector.broadcast %378 : vector<1x128xf32> to vector<16x128xf32>
    %384 = arith.mulf %11, %383 : vector<16x128xf32>
    %385 = arith.addf %382, %384 : vector<16x128xf32>
    %386 = arith.addf %385, %13 : vector<16x128xf32>
    %cst_110 = arith.constant 5.000000e-01 : f32
    %387 = vector.broadcast %cst_110 : f32 to vector<16x128xf32>
    %388 = arith.mulf %387, %386 : vector<16x128xf32>
    %389 = math.tanh %388 : vector<16x128xf32>
    %cst_111 = arith.constant 5.000000e-01 : f32
    %390 = vector.broadcast %cst_111 : f32 to vector<16x128xf32>
    %391 = arith.mulf %390, %389 : vector<16x128xf32>
    %cst_112 = arith.constant 5.000000e-01 : f32
    %392 = vector.broadcast %cst_112 : f32 to vector<16x128xf32>
    %393 = arith.addf %391, %392 : vector<16x128xf32>
    %cst_113 = arith.constant dense<0.000000e+00> : vector<16xf32>
    %394 = vector.multi_reduction <add>, %393, %cst_113 [1] : vector<16x128xf32> to vector<16xf32>
    %395 = vector.shape_cast %394 : vector<16xf32> to vector<16x1xf32>
    %396 = arith.mulf %393, %393 : vector<16x128xf32>
    %cst_114 = arith.constant dense<0.000000e+00> : vector<16xf32>
    %397 = vector.multi_reduction <add>, %396, %cst_114 [1] : vector<16x128xf32> to vector<16xf32>
    %398 = vector.shape_cast %397 : vector<16xf32> to vector<16x1xf32>
    %cst_115 = arith.constant 7.812500e-03 : f32
    %399 = vector.broadcast %cst_115 : f32 to vector<16x1xf32>
    %400 = arith.mulf %395, %399 : vector<16x1xf32>
    %cst_116 = arith.constant 7.812500e-03 : f32
    %401 = vector.broadcast %cst_116 : f32 to vector<16x1xf32>
    %402 = arith.mulf %398, %401 : vector<16x1xf32>
    %403 = arith.mulf %400, %400 : vector<16x1xf32>
    %404 = arith.subf %402, %403 : vector<16x1xf32>
    %cst_117 = arith.constant 0.000000e+00 : f32
    %405 = vector.broadcast %cst_117 : f32 to vector<16x1xf32>
    %406 = arith.maximumf %404, %405 : vector<16x1xf32>
    %cst_118 = arith.constant 9.99999974E-6 : f32
    %407 = vector.broadcast %cst_118 : f32 to vector<16x1xf32>
    %408 = arith.addf %406, %407 : vector<16x1xf32>
    %409 = math.rsqrt %408 : vector<16x1xf32>
    %410 = arith.mulf %4, %409 : vector<16x1xf32>
    %411 = arith.mulf %400, %410 : vector<16x1xf32>
    %412 = arith.subf %5, %411 : vector<16x1xf32>
    %413 = arith.mulf %410, %6 : vector<16x1xf32>
    %414 = arith.mulf %412, %6 : vector<16x1xf32>
    %cst_119 = arith.constant dense<0.000000e+00> : vector<1xf32>
    %415 = vector.multi_reduction <add>, %414, %cst_119 [0] : vector<16x1xf32> to vector<1xf32>
    %416 = vector.shape_cast %415 : vector<1xf32> to vector<1x1xf32>
    %417 = arith.addf %416, %7 : vector<1x1xf32>
    %418 = vector.broadcast %413 : vector<16x1xf32> to vector<16x128xf32>
    %419 = arith.mulf %393, %418 : vector<16x128xf32>
    %cst_120 = arith.constant dense<0.000000e+00> : vector<128xf32>
    %420 = vector.multi_reduction <add>, %419, %cst_120 [0] : vector<16x128xf32> to vector<128xf32>
    %421 = vector.shape_cast %420 : vector<128xf32> to vector<1x128xf32>
    %422 = vector.broadcast %417 : vector<1x1xf32> to vector<1x128xf32>
    %423 = arith.addf %421, %422 : vector<1x128xf32>
    %cst_121 = arith.constant 5.000000e-01 : f32
    %424 = vector.broadcast %cst_121 : f32 to vector<1x128xf32>
    %425 = arith.mulf %424, %423 : vector<1x128xf32>
    %426 = math.tanh %425 : vector<1x128xf32>
    %cst_122 = arith.constant 5.000000e-01 : f32
    %427 = vector.broadcast %cst_122 : f32 to vector<1x128xf32>
    %428 = arith.mulf %427, %426 : vector<1x128xf32>
    %cst_123 = arith.constant 5.000000e-01 : f32
    %429 = vector.broadcast %cst_123 : f32 to vector<1x128xf32>
    %430 = arith.addf %428, %429 : vector<1x128xf32>
    %c7 = arith.constant 7 : index
    %c0_124 = arith.constant 0 : index
    %431 = vector.load %arg3[%c7, %c0_124] : memref<16x128xf32, #tpu.memory_space<vmem>>, vector<1x128xf32>
    tpu.vector_store %arg3[%c7, %c0_124], %430 {strides = array<i32>} : memref<16x128xf32, #tpu.memory_space<vmem>>, vector<1x128xf32>,
    %432 = vector.extract_strided_slice %14 {offsets = [8, 0], sizes = [1, 128], strides = [1, 1]} : vector<16x128xf32> to vector<1x128xf32>
    %433 = vector.broadcast %432 : vector<1x128xf32> to vector<16x128xf32>
    %434 = arith.mulf %9, %433 : vector<16x128xf32>
    %435 = vector.broadcast %430 : vector<1x128xf32> to vector<16x128xf32>
    %436 = arith.mulf %11, %435 : vector<16x128xf32>
    %437 = arith.addf %434, %436 : vector<16x128xf32>
    %438 = arith.addf %437, %13 : vector<16x128xf32>
    %cst_125 = arith.constant 5.000000e-01 : f32
    %439 = vector.broadcast %cst_125 : f32 to vector<16x128xf32>
    %440 = arith.mulf %439, %438 : vector<16x128xf32>
    %441 = math.tanh %440 : vector<16x128xf32>
    %cst_126 = arith.constant 5.000000e-01 : f32
    %442 = vector.broadcast %cst_126 : f32 to vector<16x128xf32>
    %443 = arith.mulf %442, %441 : vector<16x128xf32>
    %cst_127 = arith.constant 5.000000e-01 : f32
    %444 = vector.broadcast %cst_127 : f32 to vector<16x128xf32>
    %445 = arith.addf %443, %444 : vector<16x128xf32>
    %cst_128 = arith.constant dense<0.000000e+00> : vector<16xf32>
    %446 = vector.multi_reduction <add>, %445, %cst_128 [1] : vector<16x128xf32> to vector<16xf32>
    %447 = vector.shape_cast %446 : vector<16xf32> to vector<16x1xf32>
    %448 = arith.mulf %445, %445 : vector<16x128xf32>
    %cst_129 = arith.constant dense<0.000000e+00> : vector<16xf32>
    %449 = vector.multi_reduction <add>, %448, %cst_129 [1] : vector<16x128xf32> to vector<16xf32>
    %450 = vector.shape_cast %449 : vector<16xf32> to vector<16x1xf32>
    %cst_130 = arith.constant 7.812500e-03 : f32
    %451 = vector.broadcast %cst_130 : f32 to vector<16x1xf32>
    %452 = arith.mulf %447, %451 : vector<16x1xf32>
    %cst_131 = arith.constant 7.812500e-03 : f32
    %453 = vector.broadcast %cst_131 : f32 to vector<16x1xf32>
    %454 = arith.mulf %450, %453 : vector<16x1xf32>
    %455 = arith.mulf %452, %452 : vector<16x1xf32>
    %456 = arith.subf %454, %455 : vector<16x1xf32>
    %cst_132 = arith.constant 0.000000e+00 : f32
    %457 = vector.broadcast %cst_132 : f32 to vector<16x1xf32>
    %458 = arith.maximumf %456, %457 : vector<16x1xf32>
    %cst_133 = arith.constant 9.99999974E-6 : f32
    %459 = vector.broadcast %cst_133 : f32 to vector<16x1xf32>
    %460 = arith.addf %458, %459 : vector<16x1xf32>
    %461 = math.rsqrt %460 : vector<16x1xf32>
    %462 = arith.mulf %4, %461 : vector<16x1xf32>
    %463 = arith.mulf %452, %462 : vector<16x1xf32>
    %464 = arith.subf %5, %463 : vector<16x1xf32>
    %465 = arith.mulf %462, %6 : vector<16x1xf32>
    %466 = arith.mulf %464, %6 : vector<16x1xf32>
    %cst_134 = arith.constant dense<0.000000e+00> : vector<1xf32>
    %467 = vector.multi_reduction <add>, %466, %cst_134 [0] : vector<16x1xf32> to vector<1xf32>
    %468 = vector.shape_cast %467 : vector<1xf32> to vector<1x1xf32>
    %469 = arith.addf %468, %7 : vector<1x1xf32>
    %470 = vector.broadcast %465 : vector<16x1xf32> to vector<16x128xf32>
    %471 = arith.mulf %445, %470 : vector<16x128xf32>
    %cst_135 = arith.constant dense<0.000000e+00> : vector<128xf32>
    %472 = vector.multi_reduction <add>, %471, %cst_135 [0] : vector<16x128xf32> to vector<128xf32>
    %473 = vector.shape_cast %472 : vector<128xf32> to vector<1x128xf32>
    %474 = vector.broadcast %469 : vector<1x1xf32> to vector<1x128xf32>
    %475 = arith.addf %473, %474 : vector<1x128xf32>
    %cst_136 = arith.constant 5.000000e-01 : f32
    %476 = vector.broadcast %cst_136 : f32 to vector<1x128xf32>
    %477 = arith.mulf %476, %475 : vector<1x128xf32>
    %478 = math.tanh %477 : vector<1x128xf32>
    %cst_137 = arith.constant 5.000000e-01 : f32
    %479 = vector.broadcast %cst_137 : f32 to vector<1x128xf32>
    %480 = arith.mulf %479, %478 : vector<1x128xf32>
    %cst_138 = arith.constant 5.000000e-01 : f32
    %481 = vector.broadcast %cst_138 : f32 to vector<1x128xf32>
    %482 = arith.addf %480, %481 : vector<1x128xf32>
    %c8 = arith.constant 8 : index
    %c0_139 = arith.constant 0 : index
    %483 = vector.load %arg3[%c8, %c0_139] : memref<16x128xf32, #tpu.memory_space<vmem>>, vector<1x128xf32>
    tpu.vector_store %arg3[%c8, %c0_139], %482 {strides = array<i32>} : memref<16x128xf32, #tpu.memory_space<vmem>>, vector<1x128xf32>,
    %484 = vector.extract_strided_slice %14 {offsets = [9, 0], sizes = [1, 128], strides = [1, 1]} : vector<16x128xf32> to vector<1x128xf32>
    %485 = vector.broadcast %484 : vector<1x128xf32> to vector<16x128xf32>
    %486 = arith.mulf %9, %485 : vector<16x128xf32>
    %487 = vector.broadcast %482 : vector<1x128xf32> to vector<16x128xf32>
    %488 = arith.mulf %11, %487 : vector<16x128xf32>
    %489 = arith.addf %486, %488 : vector<16x128xf32>
    %490 = arith.addf %489, %13 : vector<16x128xf32>
    %cst_140 = arith.constant 5.000000e-01 : f32
    %491 = vector.broadcast %cst_140 : f32 to vector<16x128xf32>
    %492 = arith.mulf %491, %490 : vector<16x128xf32>
    %493 = math.tanh %492 : vector<16x128xf32>
    %cst_141 = arith.constant 5.000000e-01 : f32
    %494 = vector.broadcast %cst_141 : f32 to vector<16x128xf32>
    %495 = arith.mulf %494, %493 : vector<16x128xf32>
    %cst_142 = arith.constant 5.000000e-01 : f32
    %496 = vector.broadcast %cst_142 : f32 to vector<16x128xf32>
    %497 = arith.addf %495, %496 : vector<16x128xf32>
    %cst_143 = arith.constant dense<0.000000e+00> : vector<16xf32>
    %498 = vector.multi_reduction <add>, %497, %cst_143 [1] : vector<16x128xf32> to vector<16xf32>
    %499 = vector.shape_cast %498 : vector<16xf32> to vector<16x1xf32>
    %500 = arith.mulf %497, %497 : vector<16x128xf32>
    %cst_144 = arith.constant dense<0.000000e+00> : vector<16xf32>
    %501 = vector.multi_reduction <add>, %500, %cst_144 [1] : vector<16x128xf32> to vector<16xf32>
    %502 = vector.shape_cast %501 : vector<16xf32> to vector<16x1xf32>
    %cst_145 = arith.constant 7.812500e-03 : f32
    %503 = vector.broadcast %cst_145 : f32 to vector<16x1xf32>
    %504 = arith.mulf %499, %503 : vector<16x1xf32>
    %cst_146 = arith.constant 7.812500e-03 : f32
    %505 = vector.broadcast %cst_146 : f32 to vector<16x1xf32>
    %506 = arith.mulf %502, %505 : vector<16x1xf32>
    %507 = arith.mulf %504, %504 : vector<16x1xf32>
    %508 = arith.subf %506, %507 : vector<16x1xf32>
    %cst_147 = arith.constant 0.000000e+00 : f32
    %509 = vector.broadcast %cst_147 : f32 to vector<16x1xf32>
    %510 = arith.maximumf %508, %509 : vector<16x1xf32>
    %cst_148 = arith.constant 9.99999974E-6 : f32
    %511 = vector.broadcast %cst_148 : f32 to vector<16x1xf32>
    %512 = arith.addf %510, %511 : vector<16x1xf32>
    %513 = math.rsqrt %512 : vector<16x1xf32>
    %514 = arith.mulf %4, %513 : vector<16x1xf32>
    %515 = arith.mulf %504, %514 : vector<16x1xf32>
    %516 = arith.subf %5, %515 : vector<16x1xf32>
    %517 = arith.mulf %514, %6 : vector<16x1xf32>
    %518 = arith.mulf %516, %6 : vector<16x1xf32>
    %cst_149 = arith.constant dense<0.000000e+00> : vector<1xf32>
    %519 = vector.multi_reduction <add>, %518, %cst_149 [0] : vector<16x1xf32> to vector<1xf32>
    %520 = vector.shape_cast %519 : vector<1xf32> to vector<1x1xf32>
    %521 = arith.addf %520, %7 : vector<1x1xf32>
    %522 = vector.broadcast %517 : vector<16x1xf32> to vector<16x128xf32>
    %523 = arith.mulf %497, %522 : vector<16x128xf32>
    %cst_150 = arith.constant dense<0.000000e+00> : vector<128xf32>
    %524 = vector.multi_reduction <add>, %523, %cst_150 [0] : vector<16x128xf32> to vector<128xf32>
    %525 = vector.shape_cast %524 : vector<128xf32> to vector<1x128xf32>
    %526 = vector.broadcast %521 : vector<1x1xf32> to vector<1x128xf32>
    %527 = arith.addf %525, %526 : vector<1x128xf32>
    %cst_151 = arith.constant 5.000000e-01 : f32
    %528 = vector.broadcast %cst_151 : f32 to vector<1x128xf32>
    %529 = arith.mulf %528, %527 : vector<1x128xf32>
    %530 = math.tanh %529 : vector<1x128xf32>
    %cst_152 = arith.constant 5.000000e-01 : f32
    %531 = vector.broadcast %cst_152 : f32 to vector<1x128xf32>
    %532 = arith.mulf %531, %530 : vector<1x128xf32>
    %cst_153 = arith.constant 5.000000e-01 : f32
    %533 = vector.broadcast %cst_153 : f32 to vector<1x128xf32>
    %534 = arith.addf %532, %533 : vector<1x128xf32>
    %c9 = arith.constant 9 : index
    %c0_154 = arith.constant 0 : index
    %535 = vector.load %arg3[%c9, %c0_154] : memref<16x128xf32, #tpu.memory_space<vmem>>, vector<1x128xf32>
    tpu.vector_store %arg3[%c9, %c0_154], %534 {strides = array<i32>} : memref<16x128xf32, #tpu.memory_space<vmem>>, vector<1x128xf32>,
    %536 = vector.extract_strided_slice %14 {offsets = [10, 0], sizes = [1, 128], strides = [1, 1]} : vector<16x128xf32> to vector<1x128xf32>
    %537 = vector.broadcast %536 : vector<1x128xf32> to vector<16x128xf32>
    %538 = arith.mulf %9, %537 : vector<16x128xf32>
    %539 = vector.broadcast %534 : vector<1x128xf32> to vector<16x128xf32>
    %540 = arith.mulf %11, %539 : vector<16x128xf32>
    %541 = arith.addf %538, %540 : vector<16x128xf32>
    %542 = arith.addf %541, %13 : vector<16x128xf32>
    %cst_155 = arith.constant 5.000000e-01 : f32
    %543 = vector.broadcast %cst_155 : f32 to vector<16x128xf32>
    %544 = arith.mulf %543, %542 : vector<16x128xf32>
    %545 = math.tanh %544 : vector<16x128xf32>
    %cst_156 = arith.constant 5.000000e-01 : f32
    %546 = vector.broadcast %cst_156 : f32 to vector<16x128xf32>
    %547 = arith.mulf %546, %545 : vector<16x128xf32>
    %cst_157 = arith.constant 5.000000e-01 : f32
    %548 = vector.broadcast %cst_157 : f32 to vector<16x128xf32>
    %549 = arith.addf %547, %548 : vector<16x128xf32>
    %cst_158 = arith.constant dense<0.000000e+00> : vector<16xf32>
    %550 = vector.multi_reduction <add>, %549, %cst_158 [1] : vector<16x128xf32> to vector<16xf32>
    %551 = vector.shape_cast %550 : vector<16xf32> to vector<16x1xf32>
    %552 = arith.mulf %549, %549 : vector<16x128xf32>
    %cst_159 = arith.constant dense<0.000000e+00> : vector<16xf32>
    %553 = vector.multi_reduction <add>, %552, %cst_159 [1] : vector<16x128xf32> to vector<16xf32>
    %554 = vector.shape_cast %553 : vector<16xf32> to vector<16x1xf32>
    %cst_160 = arith.constant 7.812500e-03 : f32
    %555 = vector.broadcast %cst_160 : f32 to vector<16x1xf32>
    %556 = arith.mulf %551, %555 : vector<16x1xf32>
    %cst_161 = arith.constant 7.812500e-03 : f32
    %557 = vector.broadcast %cst_161 : f32 to vector<16x1xf32>
    %558 = arith.mulf %554, %557 : vector<16x1xf32>
    %559 = arith.mulf %556, %556 : vector<16x1xf32>
    %560 = arith.subf %558, %559 : vector<16x1xf32>
    %cst_162 = arith.constant 0.000000e+00 : f32
    %561 = vector.broadcast %cst_162 : f32 to vector<16x1xf32>
    %562 = arith.maximumf %560, %561 : vector<16x1xf32>
    %cst_163 = arith.constant 9.99999974E-6 : f32
    %563 = vector.broadcast %cst_163 : f32 to vector<16x1xf32>
    %564 = arith.addf %562, %563 : vector<16x1xf32>
    %565 = math.rsqrt %564 : vector<16x1xf32>
    %566 = arith.mulf %4, %565 : vector<16x1xf32>
    %567 = arith.mulf %556, %566 : vector<16x1xf32>
    %568 = arith.subf %5, %567 : vector<16x1xf32>
    %569 = arith.mulf %566, %6 : vector<16x1xf32>
    %570 = arith.mulf %568, %6 : vector<16x1xf32>
    %cst_164 = arith.constant dense<0.000000e+00> : vector<1xf32>
    %571 = vector.multi_reduction <add>, %570, %cst_164 [0] : vector<16x1xf32> to vector<1xf32>
    %572 = vector.shape_cast %571 : vector<1xf32> to vector<1x1xf32>
    %573 = arith.addf %572, %7 : vector<1x1xf32>
    %574 = vector.broadcast %569 : vector<16x1xf32> to vector<16x128xf32>
    %575 = arith.mulf %549, %574 : vector<16x128xf32>
    %cst_165 = arith.constant dense<0.000000e+00> : vector<128xf32>
    %576 = vector.multi_reduction <add>, %575, %cst_165 [0] : vector<16x128xf32> to vector<128xf32>
    %577 = vector.shape_cast %576 : vector<128xf32> to vector<1x128xf32>
    %578 = vector.broadcast %573 : vector<1x1xf32> to vector<1x128xf32>
    %579 = arith.addf %577, %578 : vector<1x128xf32>
    %cst_166 = arith.constant 5.000000e-01 : f32
    %580 = vector.broadcast %cst_166 : f32 to vector<1x128xf32>
    %581 = arith.mulf %580, %579 : vector<1x128xf32>
    %582 = math.tanh %581 : vector<1x128xf32>
    %cst_167 = arith.constant 5.000000e-01 : f32
    %583 = vector.broadcast %cst_167 : f32 to vector<1x128xf32>
    %584 = arith.mulf %583, %582 : vector<1x128xf32>
    %cst_168 = arith.constant 5.000000e-01 : f32
    %585 = vector.broadcast %cst_168 : f32 to vector<1x128xf32>
    %586 = arith.addf %584, %585 : vector<1x128xf32>
    %c10 = arith.constant 10 : index
    %c0_169 = arith.constant 0 : index
    %587 = vector.load %arg3[%c10, %c0_169] : memref<16x128xf32, #tpu.memory_space<vmem>>, vector<1x128xf32>
    tpu.vector_store %arg3[%c10, %c0_169], %586 {strides = array<i32>} : memref<16x128xf32, #tpu.memory_space<vmem>>, vector<1x128xf32>,
    %588 = vector.extract_strided_slice %14 {offsets = [11, 0], sizes = [1, 128], strides = [1, 1]} : vector<16x128xf32> to vector<1x128xf32>
    %589 = vector.broadcast %588 : vector<1x128xf32> to vector<16x128xf32>
    %590 = arith.mulf %9, %589 : vector<16x128xf32>
    %591 = vector.broadcast %586 : vector<1x128xf32> to vector<16x128xf32>
    %592 = arith.mulf %11, %591 : vector<16x128xf32>
    %593 = arith.addf %590, %592 : vector<16x128xf32>
    %594 = arith.addf %593, %13 : vector<16x128xf32>
    %cst_170 = arith.constant 5.000000e-01 : f32
    %595 = vector.broadcast %cst_170 : f32 to vector<16x128xf32>
    %596 = arith.mulf %595, %594 : vector<16x128xf32>
    %597 = math.tanh %596 : vector<16x128xf32>
    %cst_171 = arith.constant 5.000000e-01 : f32
    %598 = vector.broadcast %cst_171 : f32 to vector<16x128xf32>
    %599 = arith.mulf %598, %597 : vector<16x128xf32>
    %cst_172 = arith.constant 5.000000e-01 : f32
    %600 = vector.broadcast %cst_172 : f32 to vector<16x128xf32>
    %601 = arith.addf %599, %600 : vector<16x128xf32>
    %cst_173 = arith.constant dense<0.000000e+00> : vector<16xf32>
    %602 = vector.multi_reduction <add>, %601, %cst_173 [1] : vector<16x128xf32> to vector<16xf32>
    %603 = vector.shape_cast %602 : vector<16xf32> to vector<16x1xf32>
    %604 = arith.mulf %601, %601 : vector<16x128xf32>
    %cst_174 = arith.constant dense<0.000000e+00> : vector<16xf32>
    %605 = vector.multi_reduction <add>, %604, %cst_174 [1] : vector<16x128xf32> to vector<16xf32>
    %606 = vector.shape_cast %605 : vector<16xf32> to vector<16x1xf32>
    %cst_175 = arith.constant 7.812500e-03 : f32
    %607 = vector.broadcast %cst_175 : f32 to vector<16x1xf32>
    %608 = arith.mulf %603, %607 : vector<16x1xf32>
    %cst_176 = arith.constant 7.812500e-03 : f32
    %609 = vector.broadcast %cst_176 : f32 to vector<16x1xf32>
    %610 = arith.mulf %606, %609 : vector<16x1xf32>
    %611 = arith.mulf %608, %608 : vector<16x1xf32>
    %612 = arith.subf %610, %611 : vector<16x1xf32>
    %cst_177 = arith.constant 0.000000e+00 : f32
    %613 = vector.broadcast %cst_177 : f32 to vector<16x1xf32>
    %614 = arith.maximumf %612, %613 : vector<16x1xf32>
    %cst_178 = arith.constant 9.99999974E-6 : f32
    %615 = vector.broadcast %cst_178 : f32 to vector<16x1xf32>
    %616 = arith.addf %614, %615 : vector<16x1xf32>
    %617 = math.rsqrt %616 : vector<16x1xf32>
    %618 = arith.mulf %4, %617 : vector<16x1xf32>
    %619 = arith.mulf %608, %618 : vector<16x1xf32>
    %620 = arith.subf %5, %619 : vector<16x1xf32>
    %621 = arith.mulf %618, %6 : vector<16x1xf32>
    %622 = arith.mulf %620, %6 : vector<16x1xf32>
    %cst_179 = arith.constant dense<0.000000e+00> : vector<1xf32>
    %623 = vector.multi_reduction <add>, %622, %cst_179 [0] : vector<16x1xf32> to vector<1xf32>
    %624 = vector.shape_cast %623 : vector<1xf32> to vector<1x1xf32>
    %625 = arith.addf %624, %7 : vector<1x1xf32>
    %626 = vector.broadcast %621 : vector<16x1xf32> to vector<16x128xf32>
    %627 = arith.mulf %601, %626 : vector<16x128xf32>
    %cst_180 = arith.constant dense<0.000000e+00> : vector<128xf32>
    %628 = vector.multi_reduction <add>, %627, %cst_180 [0] : vector<16x128xf32> to vector<128xf32>
    %629 = vector.shape_cast %628 : vector<128xf32> to vector<1x128xf32>
    %630 = vector.broadcast %625 : vector<1x1xf32> to vector<1x128xf32>
    %631 = arith.addf %629, %630 : vector<1x128xf32>
    %cst_181 = arith.constant 5.000000e-01 : f32
    %632 = vector.broadcast %cst_181 : f32 to vector<1x128xf32>
    %633 = arith.mulf %632, %631 : vector<1x128xf32>
    %634 = math.tanh %633 : vector<1x128xf32>
    %cst_182 = arith.constant 5.000000e-01 : f32
    %635 = vector.broadcast %cst_182 : f32 to vector<1x128xf32>
    %636 = arith.mulf %635, %634 : vector<1x128xf32>
    %cst_183 = arith.constant 5.000000e-01 : f32
    %637 = vector.broadcast %cst_183 : f32 to vector<1x128xf32>
    %638 = arith.addf %636, %637 : vector<1x128xf32>
    %c11 = arith.constant 11 : index
    %c0_184 = arith.constant 0 : index
    %639 = vector.load %arg3[%c11, %c0_184] : memref<16x128xf32, #tpu.memory_space<vmem>>, vector<1x128xf32>
    tpu.vector_store %arg3[%c11, %c0_184], %638 {strides = array<i32>} : memref<16x128xf32, #tpu.memory_space<vmem>>, vector<1x128xf32>,
    %640 = vector.extract_strided_slice %14 {offsets = [12, 0], sizes = [1, 128], strides = [1, 1]} : vector<16x128xf32> to vector<1x128xf32>
    %641 = vector.broadcast %640 : vector<1x128xf32> to vector<16x128xf32>
    %642 = arith.mulf %9, %641 : vector<16x128xf32>
    %643 = vector.broadcast %638 : vector<1x128xf32> to vector<16x128xf32>
    %644 = arith.mulf %11, %643 : vector<16x128xf32>
    %645 = arith.addf %642, %644 : vector<16x128xf32>
    %646 = arith.addf %645, %13 : vector<16x128xf32>
    %cst_185 = arith.constant 5.000000e-01 : f32
    %647 = vector.broadcast %cst_185 : f32 to vector<16x128xf32>
    %648 = arith.mulf %647, %646 : vector<16x128xf32>
    %649 = math.tanh %648 : vector<16x128xf32>
    %cst_186 = arith.constant 5.000000e-01 : f32
    %650 = vector.broadcast %cst_186 : f32 to vector<16x128xf32>
    %651 = arith.mulf %650, %649 : vector<16x128xf32>
    %cst_187 = arith.constant 5.000000e-01 : f32
    %652 = vector.broadcast %cst_187 : f32 to vector<16x128xf32>
    %653 = arith.addf %651, %652 : vector<16x128xf32>
    %cst_188 = arith.constant dense<0.000000e+00> : vector<16xf32>
    %654 = vector.multi_reduction <add>, %653, %cst_188 [1] : vector<16x128xf32> to vector<16xf32>
    %655 = vector.shape_cast %654 : vector<16xf32> to vector<16x1xf32>
    %656 = arith.mulf %653, %653 : vector<16x128xf32>
    %cst_189 = arith.constant dense<0.000000e+00> : vector<16xf32>
    %657 = vector.multi_reduction <add>, %656, %cst_189 [1] : vector<16x128xf32> to vector<16xf32>
    %658 = vector.shape_cast %657 : vector<16xf32> to vector<16x1xf32>
    %cst_190 = arith.constant 7.812500e-03 : f32
    %659 = vector.broadcast %cst_190 : f32 to vector<16x1xf32>
    %660 = arith.mulf %655, %659 : vector<16x1xf32>
    %cst_191 = arith.constant 7.812500e-03 : f32
    %661 = vector.broadcast %cst_191 : f32 to vector<16x1xf32>
    %662 = arith.mulf %658, %661 : vector<16x1xf32>
    %663 = arith.mulf %660, %660 : vector<16x1xf32>
    %664 = arith.subf %662, %663 : vector<16x1xf32>
    %cst_192 = arith.constant 0.000000e+00 : f32
    %665 = vector.broadcast %cst_192 : f32 to vector<16x1xf32>
    %666 = arith.maximumf %664, %665 : vector<16x1xf32>
    %cst_193 = arith.constant 9.99999974E-6 : f32
    %667 = vector.broadcast %cst_193 : f32 to vector<16x1xf32>
    %668 = arith.addf %666, %667 : vector<16x1xf32>
    %669 = math.rsqrt %668 : vector<16x1xf32>
    %670 = arith.mulf %4, %669 : vector<16x1xf32>
    %671 = arith.mulf %660, %670 : vector<16x1xf32>
    %672 = arith.subf %5, %671 : vector<16x1xf32>
    %673 = arith.mulf %670, %6 : vector<16x1xf32>
    %674 = arith.mulf %672, %6 : vector<16x1xf32>
    %cst_194 = arith.constant dense<0.000000e+00> : vector<1xf32>
    %675 = vector.multi_reduction <add>, %674, %cst_194 [0] : vector<16x1xf32> to vector<1xf32>
    %676 = vector.shape_cast %675 : vector<1xf32> to vector<1x1xf32>
    %677 = arith.addf %676, %7 : vector<1x1xf32>
    %678 = vector.broadcast %673 : vector<16x1xf32> to vector<16x128xf32>
    %679 = arith.mulf %653, %678 : vector<16x128xf32>
    %cst_195 = arith.constant dense<0.000000e+00> : vector<128xf32>
    %680 = vector.multi_reduction <add>, %679, %cst_195 [0] : vector<16x128xf32> to vector<128xf32>
    %681 = vector.shape_cast %680 : vector<128xf32> to vector<1x128xf32>
    %682 = vector.broadcast %677 : vector<1x1xf32> to vector<1x128xf32>
    %683 = arith.addf %681, %682 : vector<1x128xf32>
    %cst_196 = arith.constant 5.000000e-01 : f32
    %684 = vector.broadcast %cst_196 : f32 to vector<1x128xf32>
    %685 = arith.mulf %684, %683 : vector<1x128xf32>
    %686 = math.tanh %685 : vector<1x128xf32>
    %cst_197 = arith.constant 5.000000e-01 : f32
    %687 = vector.broadcast %cst_197 : f32 to vector<1x128xf32>
    %688 = arith.mulf %687, %686 : vector<1x128xf32>
    %cst_198 = arith.constant 5.000000e-01 : f32
    %689 = vector.broadcast %cst_198 : f32 to vector<1x128xf32>
    %690 = arith.addf %688, %689 : vector<1x128xf32>
    %c12 = arith.constant 12 : index
    %c0_199 = arith.constant 0 : index
    %691 = vector.load %arg3[%c12, %c0_199] : memref<16x128xf32, #tpu.memory_space<vmem>>, vector<1x128xf32>
    tpu.vector_store %arg3[%c12, %c0_199], %690 {strides = array<i32>} : memref<16x128xf32, #tpu.memory_space<vmem>>, vector<1x128xf32>,
    %692 = vector.extract_strided_slice %14 {offsets = [13, 0], sizes = [1, 128], strides = [1, 1]} : vector<16x128xf32> to vector<1x128xf32>
    %693 = vector.broadcast %692 : vector<1x128xf32> to vector<16x128xf32>
    %694 = arith.mulf %9, %693 : vector<16x128xf32>
    %695 = vector.broadcast %690 : vector<1x128xf32> to vector<16x128xf32>
    %696 = arith.mulf %11, %695 : vector<16x128xf32>
    %697 = arith.addf %694, %696 : vector<16x128xf32>
    %698 = arith.addf %697, %13 : vector<16x128xf32>
    %cst_200 = arith.constant 5.000000e-01 : f32
    %699 = vector.broadcast %cst_200 : f32 to vector<16x128xf32>
    %700 = arith.mulf %699, %698 : vector<16x128xf32>
    %701 = math.tanh %700 : vector<16x128xf32>
    %cst_201 = arith.constant 5.000000e-01 : f32
    %702 = vector.broadcast %cst_201 : f32 to vector<16x128xf32>
    %703 = arith.mulf %702, %701 : vector<16x128xf32>
    %cst_202 = arith.constant 5.000000e-01 : f32
    %704 = vector.broadcast %cst_202 : f32 to vector<16x128xf32>
    %705 = arith.addf %703, %704 : vector<16x128xf32>
    %cst_203 = arith.constant dense<0.000000e+00> : vector<16xf32>
    %706 = vector.multi_reduction <add>, %705, %cst_203 [1] : vector<16x128xf32> to vector<16xf32>
    %707 = vector.shape_cast %706 : vector<16xf32> to vector<16x1xf32>
    %708 = arith.mulf %705, %705 : vector<16x128xf32>
    %cst_204 = arith.constant dense<0.000000e+00> : vector<16xf32>
    %709 = vector.multi_reduction <add>, %708, %cst_204 [1] : vector<16x128xf32> to vector<16xf32>
    %710 = vector.shape_cast %709 : vector<16xf32> to vector<16x1xf32>
    %cst_205 = arith.constant 7.812500e-03 : f32
    %711 = vector.broadcast %cst_205 : f32 to vector<16x1xf32>
    %712 = arith.mulf %707, %711 : vector<16x1xf32>
    %cst_206 = arith.constant 7.812500e-03 : f32
    %713 = vector.broadcast %cst_206 : f32 to vector<16x1xf32>
    %714 = arith.mulf %710, %713 : vector<16x1xf32>
    %715 = arith.mulf %712, %712 : vector<16x1xf32>
    %716 = arith.subf %714, %715 : vector<16x1xf32>
    %cst_207 = arith.constant 0.000000e+00 : f32
    %717 = vector.broadcast %cst_207 : f32 to vector<16x1xf32>
    %718 = arith.maximumf %716, %717 : vector<16x1xf32>
    %cst_208 = arith.constant 9.99999974E-6 : f32
    %719 = vector.broadcast %cst_208 : f32 to vector<16x1xf32>
    %720 = arith.addf %718, %719 : vector<16x1xf32>
    %721 = math.rsqrt %720 : vector<16x1xf32>
    %722 = arith.mulf %4, %721 : vector<16x1xf32>
    %723 = arith.mulf %712, %722 : vector<16x1xf32>
    %724 = arith.subf %5, %723 : vector<16x1xf32>
    %725 = arith.mulf %722, %6 : vector<16x1xf32>
    %726 = arith.mulf %724, %6 : vector<16x1xf32>
    %cst_209 = arith.constant dense<0.000000e+00> : vector<1xf32>
    %727 = vector.multi_reduction <add>, %726, %cst_209 [0] : vector<16x1xf32> to vector<1xf32>
    %728 = vector.shape_cast %727 : vector<1xf32> to vector<1x1xf32>
    %729 = arith.addf %728, %7 : vector<1x1xf32>
    %730 = vector.broadcast %725 : vector<16x1xf32> to vector<16x128xf32>
    %731 = arith.mulf %705, %730 : vector<16x128xf32>
    %cst_210 = arith.constant dense<0.000000e+00> : vector<128xf32>
    %732 = vector.multi_reduction <add>, %731, %cst_210 [0] : vector<16x128xf32> to vector<128xf32>
    %733 = vector.shape_cast %732 : vector<128xf32> to vector<1x128xf32>
    %734 = vector.broadcast %729 : vector<1x1xf32> to vector<1x128xf32>
    %735 = arith.addf %733, %734 : vector<1x128xf32>
    %cst_211 = arith.constant 5.000000e-01 : f32
    %736 = vector.broadcast %cst_211 : f32 to vector<1x128xf32>
    %737 = arith.mulf %736, %735 : vector<1x128xf32>
    %738 = math.tanh %737 : vector<1x128xf32>
    %cst_212 = arith.constant 5.000000e-01 : f32
    %739 = vector.broadcast %cst_212 : f32 to vector<1x128xf32>
    %740 = arith.mulf %739, %738 : vector<1x128xf32>
    %cst_213 = arith.constant 5.000000e-01 : f32
    %741 = vector.broadcast %cst_213 : f32 to vector<1x128xf32>
    %742 = arith.addf %740, %741 : vector<1x128xf32>
    %c13 = arith.constant 13 : index
    %c0_214 = arith.constant 0 : index
    %743 = vector.load %arg3[%c13, %c0_214] : memref<16x128xf32, #tpu.memory_space<vmem>>, vector<1x128xf32>
    tpu.vector_store %arg3[%c13, %c0_214], %742 {strides = array<i32>} : memref<16x128xf32, #tpu.memory_space<vmem>>, vector<1x128xf32>,
    %744 = vector.extract_strided_slice %14 {offsets = [14, 0], sizes = [1, 128], strides = [1, 1]} : vector<16x128xf32> to vector<1x128xf32>
    %745 = vector.broadcast %744 : vector<1x128xf32> to vector<16x128xf32>
    %746 = arith.mulf %9, %745 : vector<16x128xf32>
    %747 = vector.broadcast %742 : vector<1x128xf32> to vector<16x128xf32>
    %748 = arith.mulf %11, %747 : vector<16x128xf32>
    %749 = arith.addf %746, %748 : vector<16x128xf32>
    %750 = arith.addf %749, %13 : vector<16x128xf32>
    %cst_215 = arith.constant 5.000000e-01 : f32
    %751 = vector.broadcast %cst_215 : f32 to vector<16x128xf32>
    %752 = arith.mulf %751, %750 : vector<16x128xf32>
    %753 = math.tanh %752 : vector<16x128xf32>
    %cst_216 = arith.constant 5.000000e-01 : f32
    %754 = vector.broadcast %cst_216 : f32 to vector<16x128xf32>
    %755 = arith.mulf %754, %753 : vector<16x128xf32>
    %cst_217 = arith.constant 5.000000e-01 : f32
    %756 = vector.broadcast %cst_217 : f32 to vector<16x128xf32>
    %757 = arith.addf %755, %756 : vector<16x128xf32>
    %cst_218 = arith.constant dense<0.000000e+00> : vector<16xf32>
    %758 = vector.multi_reduction <add>, %757, %cst_218 [1] : vector<16x128xf32> to vector<16xf32>
    %759 = vector.shape_cast %758 : vector<16xf32> to vector<16x1xf32>
    %760 = arith.mulf %757, %757 : vector<16x128xf32>
    %cst_219 = arith.constant dense<0.000000e+00> : vector<16xf32>
    %761 = vector.multi_reduction <add>, %760, %cst_219 [1] : vector<16x128xf32> to vector<16xf32>
    %762 = vector.shape_cast %761 : vector<16xf32> to vector<16x1xf32>
    %cst_220 = arith.constant 7.812500e-03 : f32
    %763 = vector.broadcast %cst_220 : f32 to vector<16x1xf32>
    %764 = arith.mulf %759, %763 : vector<16x1xf32>
    %cst_221 = arith.constant 7.812500e-03 : f32
    %765 = vector.broadcast %cst_221 : f32 to vector<16x1xf32>
    %766 = arith.mulf %762, %765 : vector<16x1xf32>
    %767 = arith.mulf %764, %764 : vector<16x1xf32>
    %768 = arith.subf %766, %767 : vector<16x1xf32>
    %cst_222 = arith.constant 0.000000e+00 : f32
    %769 = vector.broadcast %cst_222 : f32 to vector<16x1xf32>
    %770 = arith.maximumf %768, %769 : vector<16x1xf32>
    %cst_223 = arith.constant 9.99999974E-6 : f32
    %771 = vector.broadcast %cst_223 : f32 to vector<16x1xf32>
    %772 = arith.addf %770, %771 : vector<16x1xf32>
    %773 = math.rsqrt %772 : vector<16x1xf32>
    %774 = arith.mulf %4, %773 : vector<16x1xf32>
    %775 = arith.mulf %764, %774 : vector<16x1xf32>
    %776 = arith.subf %5, %775 : vector<16x1xf32>
    %777 = arith.mulf %774, %6 : vector<16x1xf32>
    %778 = arith.mulf %776, %6 : vector<16x1xf32>
    %cst_224 = arith.constant dense<0.000000e+00> : vector<1xf32>
    %779 = vector.multi_reduction <add>, %778, %cst_224 [0] : vector<16x1xf32> to vector<1xf32>
    %780 = vector.shape_cast %779 : vector<1xf32> to vector<1x1xf32>
    %781 = arith.addf %780, %7 : vector<1x1xf32>
    %782 = vector.broadcast %777 : vector<16x1xf32> to vector<16x128xf32>
    %783 = arith.mulf %757, %782 : vector<16x128xf32>
    %cst_225 = arith.constant dense<0.000000e+00> : vector<128xf32>
    %784 = vector.multi_reduction <add>, %783, %cst_225 [0] : vector<16x128xf32> to vector<128xf32>
    %785 = vector.shape_cast %784 : vector<128xf32> to vector<1x128xf32>
    %786 = vector.broadcast %781 : vector<1x1xf32> to vector<1x128xf32>
    %787 = arith.addf %785, %786 : vector<1x128xf32>
    %cst_226 = arith.constant 5.000000e-01 : f32
    %788 = vector.broadcast %cst_226 : f32 to vector<1x128xf32>
    %789 = arith.mulf %788, %787 : vector<1x128xf32>
    %790 = math.tanh %789 : vector<1x128xf32>
    %cst_227 = arith.constant 5.000000e-01 : f32
    %791 = vector.broadcast %cst_227 : f32 to vector<1x128xf32>
    %792 = arith.mulf %791, %790 : vector<1x128xf32>
    %cst_228 = arith.constant 5.000000e-01 : f32
    %793 = vector.broadcast %cst_228 : f32 to vector<1x128xf32>
    %794 = arith.addf %792, %793 : vector<1x128xf32>
    %c14 = arith.constant 14 : index
    %c0_229 = arith.constant 0 : index
    %795 = vector.load %arg3[%c14, %c0_229] : memref<16x128xf32, #tpu.memory_space<vmem>>, vector<1x128xf32>
    tpu.vector_store %arg3[%c14, %c0_229], %794 {strides = array<i32>} : memref<16x128xf32, #tpu.memory_space<vmem>>, vector<1x128xf32>,
    %796 = vector.extract_strided_slice %14 {offsets = [15, 0], sizes = [1, 128], strides = [1, 1]} : vector<16x128xf32> to vector<1x128xf32>
    %797 = vector.broadcast %796 : vector<1x128xf32> to vector<16x128xf32>
    %798 = arith.mulf %9, %797 : vector<16x128xf32>
    %799 = vector.broadcast %794 : vector<1x128xf32> to vector<16x128xf32>
    %800 = arith.mulf %11, %799 : vector<16x128xf32>
    %801 = arith.addf %798, %800 : vector<16x128xf32>
    %802 = arith.addf %801, %13 : vector<16x128xf32>
    %cst_230 = arith.constant 5.000000e-01 : f32
    %803 = vector.broadcast %cst_230 : f32 to vector<16x128xf32>
    %804 = arith.mulf %803, %802 : vector<16x128xf32>
    %805 = math.tanh %804 : vector<16x128xf32>
    %cst_231 = arith.constant 5.000000e-01 : f32
    %806 = vector.broadcast %cst_231 : f32 to vector<16x128xf32>
    %807 = arith.mulf %806, %805 : vector<16x128xf32>
    %cst_232 = arith.constant 5.000000e-01 : f32
    %808 = vector.broadcast %cst_232 : f32 to vector<16x128xf32>
    %809 = arith.addf %807, %808 : vector<16x128xf32>
    %cst_233 = arith.constant dense<0.000000e+00> : vector<16xf32>
    %810 = vector.multi_reduction <add>, %809, %cst_233 [1] : vector<16x128xf32> to vector<16xf32>
    %811 = vector.shape_cast %810 : vector<16xf32> to vector<16x1xf32>
    %812 = arith.mulf %809, %809 : vector<16x128xf32>
    %cst_234 = arith.constant dense<0.000000e+00> : vector<16xf32>
    %813 = vector.multi_reduction <add>, %812, %cst_234 [1] : vector<16x128xf32> to vector<16xf32>
    %814 = vector.shape_cast %813 : vector<16xf32> to vector<16x1xf32>
    %cst_235 = arith.constant 7.812500e-03 : f32
    %815 = vector.broadcast %cst_235 : f32 to vector<16x1xf32>
    %816 = arith.mulf %811, %815 : vector<16x1xf32>
    %cst_236 = arith.constant 7.812500e-03 : f32
    %817 = vector.broadcast %cst_236 : f32 to vector<16x1xf32>
    %818 = arith.mulf %814, %817 : vector<16x1xf32>
    %819 = arith.mulf %816, %816 : vector<16x1xf32>
    %820 = arith.subf %818, %819 : vector<16x1xf32>
    %cst_237 = arith.constant 0.000000e+00 : f32
    %821 = vector.broadcast %cst_237 : f32 to vector<16x1xf32>
    %822 = arith.maximumf %820, %821 : vector<16x1xf32>
    %cst_238 = arith.constant 9.99999974E-6 : f32
    %823 = vector.broadcast %cst_238 : f32 to vector<16x1xf32>
    %824 = arith.addf %822, %823 : vector<16x1xf32>
    %825 = math.rsqrt %824 : vector<16x1xf32>
    %826 = arith.mulf %4, %825 : vector<16x1xf32>
    %827 = arith.mulf %816, %826 : vector<16x1xf32>
    %828 = arith.subf %5, %827 : vector<16x1xf32>
    %829 = arith.mulf %826, %6 : vector<16x1xf32>
    %830 = arith.mulf %828, %6 : vector<16x1xf32>
    %cst_239 = arith.constant dense<0.000000e+00> : vector<1xf32>
    %831 = vector.multi_reduction <add>, %830, %cst_239 [0] : vector<16x1xf32> to vector<1xf32>
    %832 = vector.shape_cast %831 : vector<1xf32> to vector<1x1xf32>
    %833 = arith.addf %832, %7 : vector<1x1xf32>
    %834 = vector.broadcast %829 : vector<16x1xf32> to vector<16x128xf32>
    %835 = arith.mulf %809, %834 : vector<16x128xf32>
    %cst_240 = arith.constant dense<0.000000e+00> : vector<128xf32>
    %836 = vector.multi_reduction <add>, %835, %cst_240 [0] : vector<16x128xf32> to vector<128xf32>
    %837 = vector.shape_cast %836 : vector<128xf32> to vector<1x128xf32>
    %838 = vector.broadcast %833 : vector<1x1xf32> to vector<1x128xf32>
    %839 = arith.addf %837, %838 : vector<1x128xf32>
    %cst_241 = arith.constant 5.000000e-01 : f32
    %840 = vector.broadcast %cst_241 : f32 to vector<1x128xf32>
    %841 = arith.mulf %840, %839 : vector<1x128xf32>
    %842 = math.tanh %841 : vector<1x128xf32>
    %cst_242 = arith.constant 5.000000e-01 : f32
    %843 = vector.broadcast %cst_242 : f32 to vector<1x128xf32>
    %844 = arith.mulf %843, %842 : vector<1x128xf32>
    %cst_243 = arith.constant 5.000000e-01 : f32
    %845 = vector.broadcast %cst_243 : f32 to vector<1x128xf32>
    %846 = arith.addf %844, %845 : vector<1x128xf32>
    %c15 = arith.constant 15 : index
    %c0_244 = arith.constant 0 : index
    %847 = vector.load %arg3[%c15, %c0_244] : memref<16x128xf32, #tpu.memory_space<vmem>>, vector<1x128xf32>
    tpu.vector_store %arg3[%c15, %c0_244], %846 {strides = array<i32>} : memref<16x128xf32, #tpu.memory_space<vmem>>, vector<1x128xf32>,
    return
  }
}

</mosaic_0001>

<bundles_post_ra>
// kernel: net_forward.1
= control target key start
LH: loop header
LB: loop body
LE: loop exit
PB: predicated region body
PF: predicated region fallthrough
CT: control target
= control target key end

     0   :  { %v2201_v1 = vmov 1   ;;  %v2202_v2 = vmov 0   ;;  %s2956_s0 = inlined_call_operand.vmem [shape: f32[16,128], index: 0, kind: input, shape index: {}]   ;;  %s2957_s1 = inlined_call_operand.vmem [shape: f32[1,128], index: 1, kind: input, shape index: {}]   ;;  %s2958_s2 = inlined_call_operand.vmem [shape: f32[16,8], index: 2, kind: input, shape index: {}]   ;;  %s2959_s3 = inlined_call_operand.hbm [shape: f32[16,128], index: 3, kind: output, shape index: {}]  }
   0x1   :  { %v2235_v0 = vld [vmem:[%s2958_s2] sm:$0xff]  ;;  %1979 = vset.pattern.permute.xlu1 %v2201_v1  ;;  %1978 = vset.pattern.permute.xlu0 %v2202_v2 }
   0x2   :  { %8 = vsyncpa [#allocation3], 0  ;;  %28 = vperm.xlu1 %1979, %v2235_v0   ;;  %19 = vperm.xlu0 %1978, %v2235_v0   ;;  %v2203_v3 = vmov 2   ;;  %v2243_v4 = vld [vmem:[%s2958_s2 + $0x8] sm:$0xff]  ;;  %v2251_v5 = vld [vmem:[%s2956_s0] sm:$0xff]  ;;  %s2205_s22 = smov 1  }
   0x3   :  { %1980 = vset.pattern.permute.xlu2 %v2203_v3  ;;  %v2256_v6 = vld [vmem:[%s2956_s0 + $0x8] sm:$0xff]  ;;  %v46_v7 = vperm.slane %v2251_v5, 0  ;;  %v2007_v8 = vld [vmem:[%s2957_s1] ss:$0 sm:$0xff]  ;;  %v179_v9 = vperm.slane %v2251_v5, 1  ;;  %v297_v10 = vperm.slane %v2251_v5, 2 }
   0x4   :  { %36 = vperm.xlu2 %1980, %v2235_v0   ;;  %v415_v11 = vperm.slane %v2251_v5, 3  ;;  %v533_v12 = vperm.slane %v2251_v5, 4  ;;  %v651_v13 = vperm.slane %v2251_v5, 5  ;;  %v769_v14 = vperm.slane %v2251_v5, 6  ;;  %s2204_s1 = smov 127   ;;  %s2206_s23 = smov 126  }
   0x5   :  { %v887_v15 = vperm.slane %v2251_v5, 7  ;;  %v1123_v16 = vperm.slane %v2256_v6, 1  ;;  %v1241_v17 = vperm.slane %v2256_v6, 2  ;;  %v1359_v18 = vperm.slane %v2256_v6, 3  ;;  %s1955_s13 = sshll.u32 %s2959_s3, 4  ;;  %s2210_s14 = smov 128   ;;  %s1956_s13 = int_to_ptr.hbm [resolvable:$true] %s1955_s13 }
   0x6   :  { %v1477_v21 = vperm.slane %v2256_v6, 4  ;;  %v1595_v22 = vperm.slane %v2256_v6, 5  ;;  %v1713_v23 = vperm.slane %v2256_v6, 6  ;;  %v2960_v24 = vperm.slane %v2256_v6, 7  ;;  %s2211_s15 = smov 8  }
   0x7   :  { %vm138_vm6 = vcmask 39968  }
   0xa   :  { %32 = vperm.xlu1 %1979, %v2243_v4   ;;  %24 = vperm.xlu0 %1978, %v2243_v4  }
   0xc   :  { %40 = vperm.xlu2 %1980, %v2243_v4  }
  0x5e   :  { %v2292_v29 = vpop.permute.xlu2 %36 }
  0x66   :  { %v2361_v50 = vpop.permute.xlu2 %40 }
  0x74   :  { %v2272_v19 = vpop.permute.xlu1 %28  ;;  %v2274_v20 = vpop.permute.xlu0 %19 }
  0x75   :  { %v47_v25 = vmul.f32 %v46_v7, %v2274_v20  ;;  %v52_v26 = vmul.f32 %v2007_v8, %v2272_v19  ;;  %v2285_v27 = vmul.f32 %v179_v9, %v2274_v20  ;;  %v2290_v28 = vmul.f32 %v297_v10, %v2274_v20 }
  0x76   :  { %v2297_v30 = vmul.f32 %v415_v11, %v2274_v20  ;;  %v2302_v31 = vmul.f32 %v533_v12, %v2274_v20  ;;  %v2307_v32 = vmul.f32 %v651_v13, %v2274_v20  ;;  %v2312_v33 = vmul.f32 %v769_v14, %v2274_v20 }
  0x77   :  { %v54_v34 = vadd.f32 %v52_v26, %v47_v25  ;;  %v2317_v35 = vmul.f32 %v887_v15, %v2274_v20  ;;  %v2322_v36 = vmul.f32 %v1123_v16, %v2274_v20  ;;  %v2327_v37 = vmul.f32 %v1241_v17, %v2274_v20 }
  0x78   :  { %v2332_v38 = vmul.f32 %v1359_v18, %v2274_v20  ;;  %v2337_v39 = vmul.f32 %v1477_v21, %v2274_v20  ;;  %v2342_v40 = vmul.f32 %v1595_v22, %v2274_v20  ;;  %v2348_v42 = vmul.f32 %v1713_v23, %v2274_v20 }
  0x79   :  { %v56_v41 = vadd.f32 %v54_v34, %v2292_v29  ;;  %v2353_v43 = vmul.f32 %v2960_v24, %v2274_v20 }
  0x7b   :  { %v58_v44 = vmul.f32 0.5, %v56_v41 }
  0x7c   :  { %v2355_v45 = vpop.permute.xlu1 %32  ;;  %v2357_v46 = vpop.permute.xlu0 %24 }
  0x7d   :  { %2008 = vtanh.f32 %v58_v44  ;;  %v48_v47 = vmul.f32 %v46_v7, %v2357_v46  ;;  %v53_v48 = vmul.f32 %v2007_v8, %v2355_v45 }
  0x7f   :  { %v55_v49 = vadd.f32 %v53_v48, %v48_v47 }
  0x81   :  { %v57_v51 = vadd.f32 %v55_v49, %v2361_v50 }
  0x83   :  { %v2009_v52 = vpop.eup %2008  ;;  %v59_v53 = vmul.f32 0.5, %v57_v51 }
  0x84   :  { %v62_v54 = vmul.f32 0.5, %v2009_v52 }
  0x85   :  { %2010 = vtanh.f32 %v59_v53 }
  0x86   :  { %v2364_v55 = vadd.f32 0.5, %v62_v54 }
  0x88   :  { %66 = vadd.xlane.f32.xlu0 %v2364_v55  ;;  %v70_v56 = vmul.f32 %v2364_v55, %v2364_v55 }
  0x8a   :  { %72 = vadd.xlane.f32.xlu2 %v70_v56 }
  0x8b   :  { %v2011_v57 = vpop.eup %2010 }
  0x8c   :  { %v63_v58 = vmul.f32 0.5, %v2011_v57 }
  0x8e   :  { %v2369_v59 = vadd.f32 0.5, %v63_v58 }
  0x90   :  { %68 = vadd.xlane.f32.xlu1 %v2369_v59  ;;  %v71_v60 = vmul.f32 %v2369_v59, %v2369_v59 }
  0x92   :  { %74 = vadd.xlane.f32.xlu2 %v71_v60 }
  0x9c   :  { %132 = vrot.lane.b32.xlu0 %v2243_v4, %s2204_s1 }
  0xaa   :  { %130 = vrot.lane.b32.xlu2 %v2235_v0, %s2204_s1 }
  0xfb   :  { %v67_v61 = vpop.xlane.xlu0 %66 }
  0xfc   :  { %v76_v62 = vmul.f32 0.0078125, %v67_v61 }
  0xfd   :  { %v73_v63 = vpop.xlane.xlu2 %72 }
  0xfe   :  { %v80_v1 = vmul.f32 %v76_v62, %v76_v62  ;;  %v78_v2 = vmul.f32 0.0078125, %v73_v63 }
 0x100   :  { %v82_v3 = vsub.f32 %v78_v2, %v80_v1 }
 0x102   :  { %v84_v7 = vmax.f32 %v82_v3, 0.0 }
 0x103   :  { %v69_v8 = vpop.xlane.xlu1 %68 }
 0x104   :  { %v86_v25 = vadd.f32 1e-05, %v84_v7  ;;  %v77_v26 = vmul.f32 0.0078125, %v69_v8 }
 0x105   :  { %v75_v34 = vpop.xlane.xlu2 %74 }
 0x106   :  { %2012 = vrsqrt.f32 %v86_v25  ;;  %v81_v41 = vmul.f32 %v77_v26, %v77_v26  ;;  %v79_v44 = vmul.f32 0.0078125, %v75_v34  ;;  %vm94_vm1 = vweird.f32 %v86_v25 }
 0x108   :  { %v83_v47 = vsub.f32 %v79_v44, %v81_v41  ;;  %v2208_v44 = vmov 4  }
 0x109   :  { %1983 = vset.pattern.permute.xlu0 %v2208_v44 }
 0x10a   :  { %v85_v48 = vmax.f32 %v83_v47, 0.0 }
 0x10c   :  { %v2013_v49 = vpop.eup %2012  ;;  %v87_v51 = vadd.f32 1e-05, %v85_v48 }
 0x10d   :  { %v89_v52 = vmul.f32 %v2013_v49, %v86_v25  ;;  %vm95_vm0 = vweird.f32 %v2013_v49 }
 0x10e   :  { %2014 = vrsqrt.f32 %v87_v51  ;;  %vm96_vm2 = vmor %vm94_vm1, %vm95_vm0  ;;  %vm104_vm4 = vweird.f32 %v87_v51  ;;  %v2385_v47 = vpop.permute.xlu0 %132 }
 0x10f   :  { %v90_v53 = vmul.f32 %v2013_v49, %v89_v52 }
 0x111   :  { %v91_v54 = vmul.f32 0.5, %v90_v53 }
 0x113   :  { %v92_v56 = vsub.f32 1.5, %v91_v54 }
 0x114   :  { %v2015_v57 = vpop.eup %2014 }
 0x115   :  { %v99_v58 = vmul.f32 %v2015_v57, %v87_v51  ;;  %v93_v60 = vmul.f32 %v2013_v49, %v92_v56  ;;  %vm105_vm3 = vweird.f32 %v2015_v57 }
 0x116   :  { %vm106_vm5 = vmor %vm104_vm4, %vm105_vm3 }
 0x117   :  { %v100_v61 = vmul.f32 %v2015_v57, %v99_v58  ;;  %v97_v63 = vsel %vm96_vm2, %v2013_v49, %v93_v60  ;;  %v2388_v49 = vpop.permute.xlu2 %130 }
 0x118   :  { %v108_v1 = vmul.f32 %v97_v63, %v2235_v0 }
 0x119   :  { %v101_v2 = vmul.f32 0.5, %v100_v61 }
 0x11a   :  { %v110_v3 = vmul.f32 %v108_v1, %v76_v62  ;;  %v2207_v62 = vmov 3  }
 0x11b   :  { %v102_v7 = vsub.f32 1.5, %v101_v2  ;;  %1982 = vset.pattern.permute.xlu1 %v2207_v62  ;;  %1981 = vset.pattern.permute.xlu2 %v2207_v62 }
 0x11c   :  { %114 = vrot.lane.b32.xlu0 %v110_v3, %s2205_s22 }
 0x11d   :  { %v103_v8 = vmul.f32 %v2015_v57, %v102_v7 }
 0x11f   :  { %v107_v34 = vsel %vm106_vm5, %v2015_v57, %v103_v8 }
 0x120   :  { %v109_v25 = vmul.f32 %v107_v34, %v2243_v4 }
 0x122   :  { %v111_v41 = vmul.f32 %v109_v25, %v77_v26 }
 0x124   :  { %116 = vrot.lane.b32.xlu1 %v111_v41, %s2205_s22  ;;  %124 = vrot.lane.b32.xlu0 %v2243_v4, %s2206_s23 }
 0x12c   :  { %122 = vrot.lane.b32.xlu1 %v2235_v0, %s2206_s23 }
 0x18e   :  { %v115_v48 = vpop.permute.xlu0 %114 }
 0x18f   :  { %v120_v26 = vsub.f32 %v2235_v0, %v115_v48 }
 0x191   :  { %v136_v54 = vmul.f32 %v2388_v49, %v120_v26 }
 0x193   :  { %v139_v58 = vsel %vm138_vm6, %v136_v54, 0.0 }
 0x196   :  { %v117_v51 = vpop.permute.xlu1 %116  ;;  %v2390_v52 = vpop.permute.xlu0 %124 }
 0x197   :  { %v121_v53 = vsub.f32 %v2243_v4, %v117_v51  ;;  %v129_v56 = vmul.f32 %v2390_v52, %v109_v25 }
 0x199   :  { %v137_v57 = vmul.f32 %v2385_v47, %v121_v53  ;;  %156 = vperm.xlu1 %1982, %v129_v56  }
 0x19b   :  { %v140_v60 = vsel %vm138_vm6, %v137_v57, 0.0 }
 0x19c   :  { %v141_v61 = vadd.f32 %v140_v60, %v139_v58 }
 0x19e   :  { %v142_v63 = vrot.slane %v141_v61, 4  ;;  %v2398_v2 = vpop.permute.xlu1 %122 }
 0x19f   :  { %v128_v3 = vmul.f32 %v2398_v2, %v108_v1 }
 0x1a0   :  { %v143_v7 = vadd.f32 %v142_v63, %v141_v61 }
 0x1a1   :  { %151 = vperm.xlu2 %1981, %v128_v3  }
 0x1a2   :  { %v144_v8 = vrot.slane %v143_v7, 2 }
 0x1a4   :  { %v145_v34 = vadd.f32 %v144_v8, %v143_v7 }
 0x1a6   :  { %v146_v41 = vrot.slane %v145_v34, 1 }
 0x1a8   :  { %v147_v25 = vadd.f32 %v146_v41, %v145_v34 }
 0x1a9   :  { %1985 = vset.pattern.permute.xlu2 %v2208_v44 }
 0x1aa   :  { %v148_v48 = vadd.f32 %v147_v25, %v2398_v2 }
 0x1ac   :  { %170 = vperm.xlu0 %1983, %v148_v48  }
 0x1b4   :  { %1984 = vset.pattern.permute.xlu0 %v2207_v62 }
 0x1fb   :  { %v152_v26 = vpop.permute.xlu2 %151 }
 0x1fc   :  { %v159_v53 = vmul.f32 %v152_v26, %v2364_v55  ;;  %v181_v26 = vmul.f32 %v179_v9, %v2357_v46 }
 0x20b   :  { %v157_v51 = vpop.permute.xlu1 %156 }
 0x20c   :  { %v160_v54 = vmul.f32 %v157_v51, %v2369_v59 }
 0x20e   :  { %v161_v1 = vadd.f32 %v160_v54, %v159_v53 }
 0x210   :  { %v162_v56 = vrot.slane %v161_v1, 4 }
 0x212   :  { %v163_v57 = vadd.f32 %v162_v56, %v161_v1 }
 0x214   :  { %v164_v58 = vrot.slane %v163_v57, 2 }
 0x216   :  { %v165_v60 = vadd.f32 %v164_v58, %v163_v57 }
 0x218   :  { %v166_v61 = vrot.slane %v165_v60, 1 }
 0x21a   :  { %v167_v63 = vadd.f32 %v166_v61, %v165_v60 }
 0x21e   :  { %v171_v3 = vpop.permute.xlu0 %170 }
 0x21f   :  { %v173_v7 = vadd.f32 %v171_v3, %v167_v63 }
 0x221   :  { %v174_v8 = vmul.f32 0.5, %v173_v7 }
 0x223   :  { %2016 = vtanh.f32 %v174_v8 }
 0x229   :  { %v2017_v34 = vpop.eup %2016 }
 0x22a   :  { %v176_v41 = vmul.f32 0.5, %v2017_v34 }
 0x22c   :  { %v177_v25 = vadd.f32 0.5, %v176_v41 }
 0x22e   :  { %178 = vst [vmem:[#allocation2] sm:$0x1] %v177_v25  ;;  %v182_v48 = vperm.slane %v177_v25, 0 }
 0x230   :  { %v183_v55 = vmul.f32 %v182_v48, %v2272_v19  ;;  %v184_v59 = vmul.f32 %v182_v48, %v2355_v45 }
 0x232   :  { %v186_v51 = vadd.f32 %v184_v59, %v181_v26  ;;  %v185_v53 = vadd.f32 %v183_v55, %v2285_v27 }
 0x234   :  { %v188_v54 = vadd.f32 %v186_v51, %v2361_v50  ;;  %v187_v1 = vadd.f32 %v185_v53, %v2292_v29 }
 0x236   :  { %v190_v56 = vmul.f32 0.5, %v188_v54  ;;  %v189_v57 = vmul.f32 0.5, %v187_v1 }
 0x238   :  { %2018 = vtanh.f32 %v190_v56 }
 0x239   :  { %2020 = vtanh.f32 %v189_v57 }
 0x23e   :  { %v2019_v58 = vpop.eup %2018 }
 0x23f   :  { %v2021_v60 = vpop.eup %2020  ;;  %v194_v61 = vmul.f32 0.5, %v2019_v58 }
 0x240   :  { %v193_v63 = vmul.f32 0.5, %v2021_v60 }
 0x241   :  { %v2414_v3 = vadd.f32 0.5, %v194_v61 }
 0x242   :  { %v2416_v7 = vadd.f32 0.5, %v193_v63 }
 0x243   :  { %199 = vadd.xlane.f32.xlu1 %v2414_v3  ;;  %v202_v27 = vmul.f32 %v2414_v3, %v2414_v3 }
 0x244   :  { %197 = vadd.xlane.f32.xlu2 %v2416_v7  ;;  %v201_v9 = vmul.f32 %v2416_v7, %v2416_v7 }
 0x246   :  { %203 = vadd.xlane.f32.xlu0 %v201_v9 }
 0x24c   :  { %205 = vadd.xlane.f32.xlu2 %v202_v27 }
 0x2b6   :  { %v200_v41 = vpop.xlane.xlu1 %199 }
 0x2b7   :  { %v198_v8 = vpop.xlane.xlu2 %197  ;;  %v208_v59 = vmul.f32 0.0078125, %v200_v41 }
 0x2b8   :  { %v207_v34 = vmul.f32 0.0078125, %v198_v8 }
 0x2b9   :  { %v204_v25 = vpop.xlane.xlu0 %203  ;;  %v212_v54 = vmul.f32 %v208_v59, %v208_v59 }
 0x2ba   :  { %v211_v48 = vmul.f32 %v207_v34, %v207_v34  ;;  %v209_v55 = vmul.f32 0.0078125, %v204_v25 }
 0x2bc   :  { %v213_v26 = vsub.f32 %v209_v55, %v211_v48 }
 0x2be   :  { %v215_v51 = vmax.f32 %v213_v26, 0.0 }
 0x2bf   :  { %v206_v53 = vpop.xlane.xlu2 %205 }
 0x2c0   :  { %v217_v1 = vadd.f32 1e-05, %v215_v51  ;;  %v210_v56 = vmul.f32 0.0078125, %v206_v53 }
 0x2c2   :  { %2022 = vrsqrt.f32 %v217_v1  ;;  %v214_v57 = vsub.f32 %v210_v56, %v212_v54  ;;  %vm225_vm8 = vweird.f32 %v217_v1 }
 0x2c4   :  { %v216_v58 = vmax.f32 %v214_v57, 0.0 }
 0x2c6   :  { %v218_v60 = vadd.f32 1e-05, %v216_v58 }
 0x2c8   :  { %v2023_v61 = vpop.eup %2022  ;;  %2024 = vrsqrt.f32 %v218_v60  ;;  %vm235_vm11 = vweird.f32 %v218_v60 }
 0x2c9   :  { %v220_v63 = vmul.f32 %v2023_v61, %v217_v1  ;;  %vm226_vm7 = vweird.f32 %v2023_v61 }
 0x2ca   :  { %vm227_vm9 = vmor %vm225_vm8, %vm226_vm7 }
 0x2cb   :  { %v221_v9 = vmul.f32 %v2023_v61, %v220_v63 }
 0x2cd   :  { %v222_v27 = vmul.f32 0.5, %v221_v9 }
 0x2ce   :  { %v2025_v8 = vpop.eup %2024 }
 0x2cf   :  { %v223_v24 = vsub.f32 1.5, %v222_v27  ;;  %v230_v25 = vmul.f32 %v2025_v8, %v218_v60  ;;  %vm236_vm10 = vweird.f32 %v2025_v8 }
 0x2d0   :  { %vm237_vm12 = vmor %vm235_vm11, %vm236_vm10 }
 0x2d1   :  { %v231_v41 = vmul.f32 %v2025_v8, %v230_v25  ;;  %v224_v48 = vmul.f32 %v2023_v61, %v223_v24 }
 0x2d3   :  { %v232_v55 = vmul.f32 0.5, %v231_v41  ;;  %v228_v26 = vsel %vm227_vm9, %v2023_v61, %v224_v48 }
 0x2d4   :  { %v239_v51 = vmul.f32 %v228_v26, %v2235_v0 }
 0x2d5   :  { %v233_v53 = vsub.f32 1.5, %v232_v55 }
 0x2d6   :  { %v253_v54 = vmul.f32 %v239_v51, %v2398_v2  ;;  %v241_v56 = vmul.f32 %v239_v51, %v207_v34 }
 0x2d7   :  { %v234_v57 = vmul.f32 %v2025_v8, %v233_v53 }
 0x2d8   :  { %269 = vperm.xlu0 %1984, %v253_v54   ;;  %245 = vrot.lane.b32.xlu1 %v241_v56, %s2205_s22 }
 0x2d9   :  { %v238_v58 = vsel %vm237_vm12, %v2025_v8, %v234_v57 }
 0x2da   :  { %v240_v1 = vmul.f32 %v238_v58, %v2243_v4 }
 0x2dc   :  { %v242_v24 = vmul.f32 %v240_v1, %v208_v59  ;;  %v254_v61 = vmul.f32 %v240_v1, %v2390_v52 }
 0x2de   :  { %247 = vrot.lane.b32.xlu2 %v242_v24, %s2205_s22 }
 0x2e0   :  { %274 = vperm.xlu1 %1982, %v254_v61  }
 0x2e8   :  { %1987 = vset.pattern.permute.xlu1 %v2208_v44 }
 0x338   :  { %v248_v63 = vpop.permute.xlu2 %247 }
 0x339   :  { %v252_v34 = vsub.f32 %v2243_v4, %v248_v63 }
 0x33b   :  { %v256_v9 = vmul.f32 %v252_v34, %v2385_v47 }
 0x33d   :  { %v258_v25 = vsel %vm138_vm6, %v256_v9, 0.0 }
 0x34a   :  { %v246_v60 = vpop.permute.xlu1 %245  ;;  %v270_v58 = vpop.permute.xlu0 %269 }
 0x34b   :  { %v251_v27 = vsub.f32 %v2235_v0, %v246_v60  ;;  %v277_v24 = vmul.f32 %v270_v58, %v2416_v7 }
 0x34d   :  { %v255_v8 = vmul.f32 %v251_v27, %v2388_v49 }
 0x34f   :  { %v257_v59 = vsel %vm138_vm6, %v255_v8, 0.0 }
 0x350   :  { %v259_v41 = vadd.f32 %v258_v25, %v257_v59 }
 0x352   :  { %v260_v48 = vrot.slane %v259_v41, 4  ;;  %v275_v57 = vpop.permute.xlu1 %274 }
 0x353   :  { %v278_v1 = vmul.f32 %v275_v57, %v2414_v3 }
 0x354   :  { %v261_v55 = vadd.f32 %v260_v48, %v259_v41 }
 0x355   :  { %v279_v61 = vadd.f32 %v278_v1, %v277_v24 }
 0x356   :  { %v262_v26 = vrot.slane %v261_v55, 2 }
 0x357   :  { %v280_v63 = vrot.slane %v279_v61, 4 }
 0x358   :  { %v263_v51 = vadd.f32 %v262_v26, %v261_v55 }
 0x359   :  { %v281_v34 = vadd.f32 %v280_v63, %v279_v61 }
 0x35a   :  { %v264_v53 = vrot.slane %v263_v51, 1 }
 0x35b   :  { %v282_v60 = vrot.slane %v281_v34, 2 }
 0x35c   :  { %v265_v54 = vadd.f32 %v264_v53, %v263_v51  ;;  %v299_v53 = vmul.f32 %v297_v10, %v2357_v46 }
 0x35d   :  { %v283_v9 = vadd.f32 %v282_v60, %v281_v34 }
 0x35e   :  { %v266_v56 = vadd.f32 %v265_v54, %v2398_v2 }
 0x35f   :  { %v284_v27 = vrot.slane %v283_v9, 1 }
 0x360   :  { %288 = vperm.xlu2 %1985, %v266_v56  }
 0x361   :  { %v285_v8 = vadd.f32 %v284_v27, %v283_v9 }
 0x368   :  { %1986 = vset.pattern.permute.xlu2 %v2207_v62 }
 0x3ba   :  { %v289_v25 = vpop.permute.xlu2 %288 }
 0x3bb   :  { %v291_v59 = vadd.f32 %v289_v25, %v285_v8 }
 0x3bd   :  { %v292_v41 = vmul.f32 0.5, %v291_v59 }
 0x3bf   :  { %2026 = vtanh.f32 %v292_v41 }
 0x3c5   :  { %v2027_v48 = vpop.eup %2026 }
 0x3c6   :  { %v294_v55 = vmul.f32 0.5, %v2027_v48 }
 0x3c8   :  { %v295_v26 = vadd.f32 0.5, %v294_v55 }
 0x3ca   :  { %296 = vst [vmem:[#allocation2 + $0x1] sm:$0x1] %v295_v26  ;;  %v300_v51 = vperm.slane %v295_v26, 0 }
 0x3cc   :  { %v301_v3 = vmul.f32 %v300_v51, %v2272_v19  ;;  %v302_v7 = vmul.f32 %v300_v51, %v2355_v45 }
 0x3ce   :  { %v304_v54 = vadd.f32 %v302_v7, %v299_v53  ;;  %v303_v56 = vadd.f32 %v301_v3, %v2290_v28 }
 0x3d0   :  { %v306_v57 = vadd.f32 %v304_v54, %v2361_v50  ;;  %v305_v58 = vadd.f32 %v303_v56, %v2292_v29 }
 0x3d2   :  { %v308_v1 = vmul.f32 0.5, %v306_v57  ;;  %v307_v24 = vmul.f32 0.5, %v305_v58 }
 0x3d4   :  { %2028 = vtanh.f32 %v308_v1 }
 0x3d5   :  { %2030 = vtanh.f32 %v307_v24 }
 0x3da   :  { %v2029_v61 = vpop.eup %2028 }
 0x3db   :  { %v2031_v63 = vpop.eup %2030  ;;  %v312_v34 = vmul.f32 0.5, %v2029_v61 }
 0x3dc   :  { %v311_v60 = vmul.f32 0.5, %v2031_v63 }
 0x3dd   :  { %v2449_v9 = vadd.f32 0.5, %v312_v34 }
 0x3de   :  { %v2451_v27 = vadd.f32 0.5, %v311_v60 }
 0x3df   :  { %317 = vadd.xlane.f32.xlu2 %v2449_v9  ;;  %v320_v28 = vmul.f32 %v2449_v9, %v2449_v9 }
 0x3e0   :  { %315 = vadd.xlane.f32.xlu1 %v2451_v27  ;;  %v319_v10 = vmul.f32 %v2451_v27, %v2451_v27 }
 0x3e2   :  { %321 = vadd.xlane.f32.xlu0 %v319_v10 }
 0x3e8   :  { %323 = vadd.xlane.f32.xlu1 %v320_v28 }
 0x452   :  { %v318_v59 = vpop.xlane.xlu2 %317 }
 0x453   :  { %v316_v8 = vpop.xlane.xlu1 %315  ;;  %v326_v26 = vmul.f32 0.0078125, %v318_v59 }
 0x454   :  { %v325_v25 = vmul.f32 0.0078125, %v316_v8 }
 0x455   :  { %v322_v41 = vpop.xlane.xlu0 %321  ;;  %v330_v53 = vmul.f32 %v326_v26, %v326_v26 }
 0x456   :  { %v329_v48 = vmul.f32 %v325_v25, %v325_v25  ;;  %v327_v55 = vmul.f32 0.0078125, %v322_v41 }
 0x458   :  { %v331_v51 = vsub.f32 %v327_v55, %v329_v48 }
 0x45a   :  { %v333_v3 = vmax.f32 %v331_v51, 0.0 }
 0x45b   :  { %v324_v7 = vpop.xlane.xlu1 %323 }
 0x45c   :  { %v335_v54 = vadd.f32 1e-05, %v333_v3  ;;  %v328_v56 = vmul.f32 0.0078125, %v324_v7 }
 0x45e   :  { %2032 = vrsqrt.f32 %v335_v54  ;;  %v332_v57 = vsub.f32 %v328_v56, %v330_v53  ;;  %vm343_vm14 = vweird.f32 %v335_v54 }
 0x460   :  { %v334_v58 = vmax.f32 %v332_v57, 0.0 }
 0x462   :  { %v336_v1 = vadd.f32 1e-05, %v334_v58 }
 0x464   :  { %v2033_v24 = vpop.eup %2032  ;;  %2034 = vrsqrt.f32 %v336_v1  ;;  %vm353_vm1 = vweird.f32 %v336_v1 }
 0x465   :  { %v338_v61 = vmul.f32 %v2033_v24, %v335_v54  ;;  %vm344_vm13 = vweird.f32 %v2033_v24 }
 0x466   :  { %vm345_vm15 = vmor %vm343_vm14, %vm344_vm13 }
 0x467   :  { %v339_v63 = vmul.f32 %v2033_v24, %v338_v61 }
 0x469   :  { %v340_v34 = vmul.f32 0.5, %v339_v63 }
 0x46a   :  { %v2035_v60 = vpop.eup %2034 }
 0x46b   :  { %v341_v10 = vsub.f32 1.5, %v340_v34  ;;  %v348_v28 = vmul.f32 %v2035_v60, %v336_v1  ;;  %vm354_vm0 = vweird.f32 %v2035_v60 }
 0x46c   :  { %vm355_vm2 = vmor %vm353_vm1, %vm354_vm0 }
 0x46d   :  { %v349_v8 = vmul.f32 %v2035_v60, %v348_v28  ;;  %v342_v59 = vmul.f32 %v2033_v24, %v341_v10 }
 0x46f   :  { %v350_v41 = vmul.f32 0.5, %v349_v8  ;;  %v346_v48 = vsel %vm345_vm15, %v2033_v24, %v342_v59 }
 0x470   :  { %v357_v55 = vmul.f32 %v346_v48, %v2235_v0 }
 0x471   :  { %v351_v51 = vsub.f32 1.5, %v350_v41 }
 0x472   :  { %v371_v3 = vmul.f32 %v357_v55, %v2398_v2  ;;  %v359_v7 = vmul.f32 %v357_v55, %v325_v25 }
 0x473   :  { %v352_v53 = vmul.f32 %v2035_v60, %v351_v51 }
 0x474   :  { %387 = vperm.xlu0 %1984, %v371_v3   ;;  %363 = vrot.lane.b32.xlu2 %v359_v7, %s2205_s22 }
 0x475   :  { %v356_v56 = vsel %vm355_vm2, %v2035_v60, %v352_v53 }
 0x476   :  { %v358_v54 = vmul.f32 %v356_v56, %v2243_v4 }
 0x478   :  { %v360_v57 = vmul.f32 %v358_v54, %v326_v26  ;;  %v372_v58 = vmul.f32 %v358_v54, %v2390_v52 }
 0x47a   :  { %365 = vrot.lane.b32.xlu1 %v360_v57, %s2205_s22 }
 0x47c   :  { %392 = vperm.xlu2 %1986, %v372_v58  }
 0x4ce   :  { %v364_v24 = vpop.permute.xlu2 %363 }
 0x4cf   :  { %v369_v61 = vsub.f32 %v2235_v0, %v364_v24 }
 0x4d1   :  { %v373_v25 = vmul.f32 %v369_v61, %v2388_v49 }
 0x4d3   :  { %v375_v60 = vsel %vm138_vm6, %v373_v25, 0.0 }
 0x4d6   :  { %v393_v7 = vpop.permute.xlu2 %392 }
 0x4d7   :  { %v396_v56 = vmul.f32 %v393_v7, %v2449_v9 }
 0x4e6   :  { %v388_v3 = vpop.permute.xlu0 %387 }
 0x4e7   :  { %v395_v53 = vmul.f32 %v388_v3, %v2451_v27 }
 0x4e9   :  { %v397_v54 = vadd.f32 %v396_v56, %v395_v53 }
 0x4eb   :  { %v398_v57 = vrot.slane %v397_v54, 4 }
 0x4ec   :  { %v366_v63 = vpop.permute.xlu1 %365 }
 0x4ed   :  { %v370_v1 = vsub.f32 %v2243_v4, %v366_v63  ;;  %v399_v58 = vadd.f32 %v398_v57, %v397_v54 }
 0x4ef   :  { %v374_v34 = vmul.f32 %v370_v1, %v2385_v47  ;;  %v400_v24 = vrot.slane %v399_v58, 2 }
 0x4f1   :  { %v376_v10 = vsel %vm138_vm6, %v374_v34, 0.0  ;;  %v401_v61 = vadd.f32 %v400_v24, %v399_v58 }
 0x4f2   :  { %v377_v26 = vadd.f32 %v376_v10, %v375_v60 }
 0x4f3   :  { %v402_v63 = vrot.slane %v401_v61, 1 }
 0x4f4   :  { %v378_v28 = vrot.slane %v377_v26, 4 }
 0x4f5   :  { %v403_v25 = vadd.f32 %v402_v63, %v401_v61 }
 0x4f6   :  { %v379_v8 = vadd.f32 %v378_v28, %v377_v26 }
 0x4f8   :  { %v380_v59 = vrot.slane %v379_v8, 2 }
 0x4fa   :  { %v381_v41 = vadd.f32 %v380_v59, %v379_v8  ;;  %v417_v59 = vmul.f32 %v415_v11, %v2357_v46 }
 0x4fc   :  { %v382_v48 = vrot.slane %v381_v41, 1 }
 0x4fe   :  { %v383_v55 = vadd.f32 %v382_v48, %v381_v41 }
 0x500   :  { %v384_v51 = vadd.f32 %v383_v55, %v2398_v2 }
 0x502   :  { %406 = vperm.xlu1 %1987, %v384_v51  }
 0x50a   :  { %1990 = vset.pattern.permute.xlu1 %v2207_v62 }
 0x574   :  { %v407_v1 = vpop.permute.xlu1 %406 }
 0x575   :  { %v409_v34 = vadd.f32 %v407_v1, %v403_v25 }
 0x577   :  { %v410_v60 = vmul.f32 0.5, %v409_v34 }
 0x579   :  { %2036 = vtanh.f32 %v410_v60 }
 0x57f   :  { %v2037_v10 = vpop.eup %2036 }
 0x580   :  { %v412_v26 = vmul.f32 0.5, %v2037_v10 }
 0x582   :  { %v413_v28 = vadd.f32 0.5, %v412_v26 }
 0x584   :  { %414 = vst [vmem:[#allocation2 + $0x2] sm:$0x1] %v413_v28  ;;  %v418_v8 = vperm.slane %v413_v28, 0 }
 0x586   :  { %v419_v27 = vmul.f32 %v418_v8, %v2272_v19  ;;  %v420_v9 = vmul.f32 %v418_v8, %v2355_v45 }
 0x588   :  { %v422_v41 = vadd.f32 %v420_v9, %v417_v59  ;;  %v421_v48 = vadd.f32 %v419_v27, %v2297_v30 }
 0x58a   :  { %v424_v55 = vadd.f32 %v422_v41, %v2361_v50  ;;  %v423_v51 = vadd.f32 %v421_v48, %v2292_v29 }
 0x58c   :  { %v426_v3 = vmul.f32 0.5, %v424_v55  ;;  %v425_v7 = vmul.f32 0.5, %v423_v51 }
 0x58e   :  { %2038 = vtanh.f32 %v426_v3 }
 0x58f   :  { %2040 = vtanh.f32 %v425_v7 }
 0x594   :  { %v2039_v53 = vpop.eup %2038 }
 0x595   :  { %v2041_v56 = vpop.eup %2040  ;;  %v430_v54 = vmul.f32 0.5, %v2039_v53 }
 0x596   :  { %v429_v57 = vmul.f32 0.5, %v2041_v56 }
 0x597   :  { %v2483_v58 = vadd.f32 0.5, %v430_v54 }
 0x598   :  { %v2485_v24 = vadd.f32 0.5, %v429_v57 }
 0x599   :  { %435 = vadd.xlane.f32.xlu0 %v2483_v58  ;;  %v438_v30 = vmul.f32 %v2483_v58, %v2483_v58 }
 0x59a   :  { %433 = vadd.xlane.f32.xlu2 %v2485_v24  ;;  %v437_v11 = vmul.f32 %v2485_v24, %v2485_v24 }
 0x59c   :  { %439 = vadd.xlane.f32.xlu1 %v437_v11 }
 0x5a2   :  { %441 = vadd.xlane.f32.xlu2 %v438_v30 }
 0x60c   :  { %v436_v25 = vpop.xlane.xlu0 %435 }
 0x60d   :  { %v434_v61 = vpop.xlane.xlu2 %433  ;;  %v444_v10 = vmul.f32 0.0078125, %v436_v25 }
 0x60e   :  { %v443_v63 = vmul.f32 0.0078125, %v434_v61 }
 0x60f   :  { %v440_v1 = vpop.xlane.xlu1 %439  ;;  %v448_v27 = vmul.f32 %v444_v10, %v444_v10 }
 0x610   :  { %v447_v34 = vmul.f32 %v443_v63, %v443_v63  ;;  %v445_v60 = vmul.f32 0.0078125, %v440_v1 }
 0x612   :  { %v449_v26 = vsub.f32 %v445_v60, %v447_v34 }
 0x614   :  { %v451_v28 = vmax.f32 %v449_v26, 0.0 }
 0x615   :  { %v442_v8 = vpop.xlane.xlu2 %441 }
 0x616   :  { %v453_v9 = vadd.f32 1e-05, %v451_v28  ;;  %v446_v59 = vmul.f32 0.0078125, %v442_v8 }
 0x618   :  { %2042 = vrsqrt.f32 %v453_v9  ;;  %v450_v41 = vsub.f32 %v446_v59, %v448_v27  ;;  %vm461_vm4 = vweird.f32 %v453_v9 }
 0x61a   :  { %v452_v48 = vmax.f32 %v450_v41, 0.0 }
 0x61c   :  { %v454_v55 = vadd.f32 1e-05, %v452_v48 }
 0x61e   :  { %v2043_v51 = vpop.eup %2042  ;;  %2044 = vrsqrt.f32 %v454_v55  ;;  %vm471_vm8 = vweird.f32 %v454_v55 }
 0x61f   :  { %v456_v3 = vmul.f32 %v2043_v51, %v453_v9  ;;  %vm462_vm3 = vweird.f32 %v2043_v51 }
 0x620   :  { %vm463_vm5 = vmor %vm461_vm4, %vm462_vm3 }
 0x621   :  { %v457_v7 = vmul.f32 %v2043_v51, %v456_v3 }
 0x623   :  { %v458_v53 = vmul.f32 0.5, %v457_v7 }
 0x624   :  { %v2045_v56 = vpop.eup %2044 }
 0x625   :  { %v459_v54 = vsub.f32 1.5, %v458_v53  ;;  %v466_v57 = vmul.f32 %v2045_v56, %v454_v55  ;;  %vm472_vm7 = vweird.f32 %v2045_v56 }
 0x626   :  { %vm473_vm9 = vmor %vm471_vm8, %vm472_vm7 }
 0x627   :  { %v467_v11 = vmul.f32 %v2045_v56, %v466_v57  ;;  %v460_v30 = vmul.f32 %v2043_v51, %v459_v54 }
 0x629   :  { %v468_v61 = vmul.f32 0.5, %v467_v11  ;;  %v464_v25 = vsel %vm463_vm5, %v2043_v51, %v460_v30 }
 0x62a   :  { %v475_v1 = vmul.f32 %v464_v25, %v2235_v0 }
 0x62b   :  { %v469_v34 = vsub.f32 1.5, %v468_v61 }
 0x62c   :  { %v489_v60 = vmul.f32 %v475_v1, %v2398_v2  ;;  %v477_v26 = vmul.f32 %v475_v1, %v443_v63 }
 0x62d   :  { %v470_v28 = vmul.f32 %v2045_v56, %v469_v34 }
 0x62e   :  { %505 = vperm.xlu2 %1986, %v489_v60   ;;  %481 = vrot.lane.b32.xlu0 %v477_v26, %s2205_s22 }
 0x62f   :  { %v474_v8 = vsel %vm473_vm9, %v2045_v56, %v470_v28 }
 0x630   :  { %v476_v27 = vmul.f32 %v474_v8, %v2243_v4 }
 0x632   :  { %v478_v9 = vmul.f32 %v476_v27, %v444_v10  ;;  %v490_v59 = vmul.f32 %v476_v27, %v2390_v52 }
 0x634   :  { %483 = vrot.lane.b32.xlu1 %v478_v9, %s2205_s22 }
 0x636   :  { %510 = vperm.xlu0 %1984, %v490_v59   ;;  %1991 = vset.pattern.permute.xlu2 %v2208_v44 }
 0x63e   :  { %1988 = vset.pattern.permute.xlu0 %v2208_v44 }
 0x6a0   :  { %v482_v63 = vpop.permute.xlu0 %481 }
 0x6a1   :  { %v487_v41 = vsub.f32 %v2235_v0, %v482_v63 }
 0x6a3   :  { %v491_v55 = vmul.f32 %v487_v41, %v2388_v49 }
 0x6a5   :  { %v493_v10 = vsel %vm138_vm6, %v491_v55, 0.0 }
 0x6a6   :  { %v484_v48 = vpop.permute.xlu1 %483 }
 0x6a7   :  { %v488_v51 = vsub.f32 %v2243_v4, %v484_v48  ;;  %v506_v4 = vpop.permute.xlu2 %505 }
 0x6a8   :  { %v511_v25 = vpop.permute.xlu0 %510  ;;  %v513_v34 = vmul.f32 %v506_v4, %v2485_v24 }
 0x6a9   :  { %v492_v3 = vmul.f32 %v488_v51, %v2385_v47  ;;  %v514_v1 = vmul.f32 %v511_v25, %v2483_v58 }
 0x6ab   :  { %v494_v7 = vsel %vm138_vm6, %v492_v3, 0.0  ;;  %v515_v60 = vadd.f32 %v514_v1, %v513_v34 }
 0x6ac   :  { %v495_v53 = vadd.f32 %v494_v7, %v493_v10  ;;  %v535_v7 = vmul.f32 %v533_v12, %v2357_v46 }
 0x6ad   :  { %v516_v26 = vrot.slane %v515_v60, 4 }
 0x6ae   :  { %v496_v56 = vrot.slane %v495_v53, 4 }
 0x6af   :  { %v517_v28 = vadd.f32 %v516_v26, %v515_v60 }
 0x6b0   :  { %v497_v54 = vadd.f32 %v496_v56, %v495_v53 }
 0x6b1   :  { %v518_v8 = vrot.slane %v517_v28, 2 }
 0x6b2   :  { %v498_v57 = vrot.slane %v497_v54, 2 }
 0x6b3   :  { %v519_v27 = vadd.f32 %v518_v8, %v517_v28 }
 0x6b4   :  { %v499_v11 = vadd.f32 %v498_v57, %v497_v54 }
 0x6b5   :  { %v520_v9 = vrot.slane %v519_v27, 1 }
 0x6b6   :  { %v500_v30 = vrot.slane %v499_v11, 1 }
 0x6b7   :  { %v521_v59 = vadd.f32 %v520_v9, %v519_v27 }
 0x6b8   :  { %v501_v61 = vadd.f32 %v500_v30, %v499_v11 }
 0x6ba   :  { %v502_v0 = vadd.f32 %v501_v61, %v2398_v2 }
 0x6bc   :  { %524 = vperm.xlu0 %1988, %v502_v0  }
 0x6c4   :  { %1989 = vset.pattern.permute.xlu0 %v2207_v62 }
 0x72e   :  { %v525_v63 = vpop.permute.xlu0 %524 }
 0x72f   :  { %v527_v41 = vadd.f32 %v525_v63, %v521_v59 }
 0x731   :  { %v528_v48 = vmul.f32 0.5, %v527_v41 }
 0x733   :  { %2046 = vtanh.f32 %v528_v48 }
 0x739   :  { %v2047_v55 = vpop.eup %2046 }
 0x73a   :  { %v530_v51 = vmul.f32 0.5, %v2047_v55 }
 0x73c   :  { %v531_v3 = vadd.f32 0.5, %v530_v51 }
 0x73e   :  { %532 = vst [vmem:[#allocation2 + $0x3] sm:$0x1] %v531_v3  ;;  %v536_v10 = vperm.slane %v531_v3, 0 }
 0x740   :  { %v537_v58 = vmul.f32 %v536_v10, %v2272_v19  ;;  %v538_v24 = vmul.f32 %v536_v10, %v2355_v45 }
 0x742   :  { %v540_v53 = vadd.f32 %v538_v24, %v535_v7  ;;  %v539_v56 = vadd.f32 %v537_v58, %v2302_v31 }
 0x744   :  { %v542_v54 = vadd.f32 %v540_v53, %v2361_v50  ;;  %v541_v57 = vadd.f32 %v539_v56, %v2292_v29 }
 0x746   :  { %v544_v11 = vmul.f32 0.5, %v542_v54  ;;  %v543_v30 = vmul.f32 0.5, %v541_v57 }
 0x748   :  { %2048 = vtanh.f32 %v544_v11 }
 0x749   :  { %2050 = vtanh.f32 %v543_v30 }
 0x74e   :  { %v2049_v61 = vpop.eup %2048 }
 0x74f   :  { %v2051_v0 = vpop.eup %2050  ;;  %v548_v25 = vmul.f32 0.5, %v2049_v61 }
 0x750   :  { %v547_v4 = vmul.f32 0.5, %v2051_v0 }
 0x751   :  { %v2519_v1 = vadd.f32 0.5, %v548_v25 }
 0x752   :  { %v2521_v34 = vadd.f32 0.5, %v547_v4 }
 0x753   :  { %553 = vadd.xlane.f32.xlu2 %v2519_v1  ;;  %v556_v31 = vmul.f32 %v2519_v1, %v2519_v1 }
 0x754   :  { %551 = vadd.xlane.f32.xlu1 %v2521_v34  ;;  %v555_v12 = vmul.f32 %v2521_v34, %v2521_v34 }
 0x756   :  { %557 = vadd.xlane.f32.xlu0 %v555_v12 }
 0x75b   :  { %559 = vadd.xlane.f32.xlu2 %v556_v31  ;;  %v2532_v31 = vld [vmem:[%s2958_s2] sm:$0xff] }
 0x7c6   :  { %v554_v60 = vpop.xlane.xlu2 %553 }
 0x7c7   :  { %v552_v26 = vpop.xlane.xlu1 %551  ;;  %v562_v59 = vmul.f32 0.0078125, %v554_v60 }
 0x7c8   :  { %v561_v28 = vmul.f32 0.0078125, %v552_v26 }
 0x7c9   :  { %v558_v8 = vpop.xlane.xlu0 %557  ;;  %v566_v55 = vmul.f32 %v562_v59, %v562_v59 }
 0x7ca   :  { %v565_v27 = vmul.f32 %v561_v28, %v561_v28  ;;  %v563_v9 = vmul.f32 0.0078125, %v558_v8 }
 0x7cc   :  { %v567_v63 = vsub.f32 %v563_v9, %v565_v27 }
 0x7ce   :  { %v569_v41 = vmax.f32 %v567_v63, 0.0  ;;  %v560_v48 = vpop.xlane.xlu2 %559  ;;  %v2540_v63 = vld [vmem:[%s2958_s2 + $0x8] sm:$0xff] }
 0x7cf   :  { %v564_v51 = vmul.f32 0.0078125, %v560_v48 }
 0x7d0   :  { %v571_v3 = vadd.f32 1e-05, %v569_v41 }
 0x7d1   :  { %v568_v10 = vsub.f32 %v564_v51, %v566_v55 }
 0x7d2   :  { %2052 = vrsqrt.f32 %v571_v3  ;;  %vm579_vm11 = vweird.f32 %v571_v3 }
 0x7d3   :  { %v570_v58 = vmax.f32 %v568_v10, 0.0 }
 0x7d5   :  { %v572_v24 = vadd.f32 1e-05, %v570_v58 }
 0x7d7   :  { %2054 = vrsqrt.f32 %v572_v24  ;;  %vm589_vm14 = vweird.f32 %v572_v24 }
 0x7d8   :  { %v2053_v7 = vpop.eup %2052 }
 0x7d9   :  { %v574_v53 = vmul.f32 %v2053_v7, %v571_v3  ;;  %vm580_vm10 = vweird.f32 %v2053_v7 }
 0x7da   :  { %vm581_vm12 = vmor %vm579_vm11, %vm580_vm10 }
 0x7db   :  { %v575_v56 = vmul.f32 %v2053_v7, %v574_v53 }
 0x7dd   :  { %v2055_v54 = vpop.eup %2054  ;;  %v576_v57 = vmul.f32 0.5, %v575_v56 }
 0x7de   :  { %v584_v11 = vmul.f32 %v2055_v54, %v572_v24  ;;  %vm590_vm13 = vweird.f32 %v2055_v54 }
 0x7df   :  { %v577_v30 = vsub.f32 1.5, %v576_v57  ;;  %vm591_vm15 = vmor %vm589_vm14, %vm590_vm13 }
 0x7e0   :  { %v585_v61 = vmul.f32 %v2055_v54, %v584_v11 }
 0x7e1   :  { %v578_v0 = vmul.f32 %v2053_v7, %v577_v30 }
 0x7e2   :  { %v586_v25 = vmul.f32 0.5, %v585_v61 }
 0x7e3   :  { %v582_v4 = vsel %vm581_vm12, %v2053_v7, %v578_v0 }
 0x7e4   :  { %v587_v12 = vsub.f32 1.5, %v586_v25  ;;  %v593_v60 = vmul.f32 %v2532_v31, %v582_v4 }
 0x7e6   :  { %v607_v26 = vmul.f32 %v593_v60, %v2398_v2  ;;  %v595_v8 = vmul.f32 %v593_v60, %v561_v28  ;;  %v588_v27 = vmul.f32 %v2055_v54, %v587_v12 }
 0x7e8   :  { %623 = vperm.xlu0 %1989, %v607_v26   ;;  %599 = vrot.lane.b32.xlu1 %v595_v8, %s2205_s22  ;;  %v592_v9 = vsel %vm591_vm15, %v2055_v54, %v588_v27 }
 0x7e9   :  { %v594_v41 = vmul.f32 %v2540_v63, %v592_v9 }
 0x7eb   :  { %v596_v48 = vmul.f32 %v594_v41, %v562_v59  ;;  %v608_v55 = vmul.f32 %v594_v41, %v2390_v52 }
 0x7ed   :  { %601 = vrot.lane.b32.xlu2 %v596_v48, %s2205_s22 }
 0x7f0   :  { %628 = vperm.xlu1 %1990, %v608_v55  }
 0x7f8   :  { %1993 = vset.pattern.permute.xlu1 %v2208_v44 }
 0x847   :  { %v602_v28 = vpop.permute.xlu2 %601 }
 0x848   :  { %v606_v51 = vsub.f32 %v2540_v63, %v602_v28 }
 0x84a   :  { %v610_v10 = vmul.f32 %v606_v51, %v2385_v47 }
 0x84c   :  { %v612_v7 = vsel %vm138_vm6, %v610_v10, 0.0 }
 0x85a   :  { %v600_v3 = vpop.permute.xlu1 %599  ;;  %v624_v4 = vpop.permute.xlu0 %623 }
 0x85b   :  { %v605_v58 = vsub.f32 %v2532_v31, %v600_v3  ;;  %v631_v60 = vmul.f32 %v624_v4, %v2521_v34 }
 0x85d   :  { %v609_v24 = vmul.f32 %v605_v58, %v2388_v49 }
 0x85f   :  { %v611_v59 = vsel %vm138_vm6, %v609_v24, 0.0 }
 0x860   :  { %v613_v53 = vadd.f32 %v612_v7, %v611_v59  ;;  %v653_v59 = vmul.f32 %v651_v13, %v2357_v46 }
 0x862   :  { %v614_v56 = vrot.slane %v613_v53, 4  ;;  %v629_v25 = vpop.permute.xlu1 %628 }
 0x863   :  { %v632_v12 = vmul.f32 %v629_v25, %v2519_v1 }
 0x864   :  { %v615_v54 = vadd.f32 %v614_v56, %v613_v53 }
 0x865   :  { %v633_v26 = vadd.f32 %v632_v12, %v631_v60 }
 0x866   :  { %v616_v57 = vrot.slane %v615_v54, 2 }
 0x867   :  { %v634_v8 = vrot.slane %v633_v26, 4 }
 0x868   :  { %v617_v11 = vadd.f32 %v616_v57, %v615_v54 }
 0x869   :  { %v635_v27 = vadd.f32 %v634_v8, %v633_v26 }
 0x86a   :  { %v618_v30 = vrot.slane %v617_v11, 1 }
 0x86b   :  { %v636_v9 = vrot.slane %v635_v27, 2 }
 0x86c   :  { %v619_v61 = vadd.f32 %v618_v30, %v617_v11 }
 0x86d   :  { %v637_v41 = vadd.f32 %v636_v9, %v635_v27 }
 0x86e   :  { %v620_v0 = vadd.f32 %v619_v61, %v2398_v2 }
 0x86f   :  { %v638_v48 = vrot.slane %v637_v41, 1 }
 0x870   :  { %642 = vperm.xlu2 %1991, %v620_v0  }
 0x871   :  { %v639_v55 = vadd.f32 %v638_v48, %v637_v41 }
 0x878   :  { %1992 = vset.pattern.permute.xlu2 %v2207_v62 }
 0x8ca   :  { %v643_v28 = vpop.permute.xlu2 %642 }
 0x8cb   :  { %v645_v51 = vadd.f32 %v643_v28, %v639_v55 }
 0x8cd   :  { %v646_v3 = vmul.f32 0.5, %v645_v51 }
 0x8cf   :  { %2056 = vtanh.f32 %v646_v3 }
 0x8d5   :  { %v2057_v10 = vpop.eup %2056 }
 0x8d6   :  { %v648_v58 = vmul.f32 0.5, %v2057_v10 }
 0x8d8   :  { %v649_v24 = vadd.f32 0.5, %v648_v58 }
 0x8da   :  { %650 = vst [vmem:[#allocation2 + $0x4] sm:$0x1] %v649_v24  ;;  %v654_v7 = vperm.slane %v649_v24, 0 }
 0x8dc   :  { %v655_v1 = vmul.f32 %v654_v7, %v2272_v19  ;;  %v656_v34 = vmul.f32 %v654_v7, %v2355_v45 }
 0x8de   :  { %v658_v53 = vadd.f32 %v656_v34, %v653_v59  ;;  %v657_v56 = vadd.f32 %v655_v1, %v2307_v32 }
 0x8e0   :  { %v660_v54 = vadd.f32 %v658_v53, %v2361_v50  ;;  %v659_v57 = vadd.f32 %v657_v56, %v2292_v29 }
 0x8e2   :  { %v662_v11 = vmul.f32 0.5, %v660_v54  ;;  %v661_v30 = vmul.f32 0.5, %v659_v57 }
 0x8e4   :  { %2058 = vtanh.f32 %v662_v11 }
 0x8e5   :  { %2060 = vtanh.f32 %v661_v30 }
 0x8ea   :  { %v2059_v61 = vpop.eup %2058 }
 0x8eb   :  { %v2061_v0 = vpop.eup %2060  ;;  %v666_v25 = vmul.f32 0.5, %v2059_v61 }
 0x8ec   :  { %v665_v4 = vmul.f32 0.5, %v2061_v0 }
 0x8ed   :  { %v2564_v12 = vadd.f32 0.5, %v666_v25 }
 0x8ee   :  { %v2566_v60 = vadd.f32 0.5, %v665_v4 }
 0x8ef   :  { %671 = vadd.xlane.f32.xlu2 %v2564_v12  ;;  %v674_v32 = vmul.f32 %v2564_v12, %v2564_v12 }
 0x8f0   :  { %669 = vadd.xlane.f32.xlu1 %v2566_v60  ;;  %v673_v13 = vmul.f32 %v2566_v60, %v2566_v60 }
 0x8f2   :  { %675 = vadd.xlane.f32.xlu0 %v673_v13 }
 0x8f8   :  { %677 = vadd.xlane.f32.xlu1 %v674_v32 }
 0x962   :  { %v672_v27 = vpop.xlane.xlu2 %671 }
 0x963   :  { %v670_v26 = vpop.xlane.xlu1 %669  ;;  %v680_v55 = vmul.f32 0.0078125, %v672_v27 }
 0x964   :  { %v679_v8 = vmul.f32 0.0078125, %v670_v26 }
 0x965   :  { %v676_v9 = vpop.xlane.xlu0 %675  ;;  %v684_v10 = vmul.f32 %v680_v55, %v680_v55 }
 0x966   :  { %v683_v41 = vmul.f32 %v679_v8, %v679_v8  ;;  %v681_v48 = vmul.f32 0.0078125, %v676_v9 }
 0x968   :  { %v685_v28 = vsub.f32 %v681_v48, %v683_v41 }
 0x96a   :  { %v687_v51 = vmax.f32 %v685_v28, 0.0 }
 0x96b   :  { %v678_v3 = vpop.xlane.xlu1 %677 }
 0x96c   :  { %v689_v58 = vadd.f32 1e-05, %v687_v51  ;;  %v682_v24 = vmul.f32 0.0078125, %v678_v3 }
 0x96e   :  { %2062 = vrsqrt.f32 %v689_v58  ;;  %v686_v7 = vsub.f32 %v682_v24, %v684_v10  ;;  %vm697_vm1 = vweird.f32 %v689_v58 }
 0x970   :  { %v688_v1 = vmax.f32 %v686_v7, 0.0 }
 0x972   :  { %v690_v34 = vadd.f32 1e-05, %v688_v1 }
 0x974   :  { %v2063_v59 = vpop.eup %2062  ;;  %2064 = vrsqrt.f32 %v690_v34  ;;  %vm707_vm4 = vweird.f32 %v690_v34 }
 0x975   :  { %v692_v53 = vmul.f32 %v2063_v59, %v689_v58  ;;  %vm698_vm0 = vweird.f32 %v2063_v59 }
 0x976   :  { %vm699_vm2 = vmor %vm697_vm1, %vm698_vm0 }
 0x977   :  { %v693_v56 = vmul.f32 %v2063_v59, %v692_v53 }
 0x979   :  { %v694_v54 = vmul.f32 0.5, %v693_v56 }
 0x97a   :  { %v2065_v57 = vpop.eup %2064 }
 0x97b   :  { %v695_v11 = vsub.f32 1.5, %v694_v54  ;;  %v702_v30 = vmul.f32 %v2065_v57, %v690_v34  ;;  %vm708_vm3 = vweird.f32 %v2065_v57 }
 0x97c   :  { %vm709_vm5 = vmor %vm707_vm4, %vm708_vm3 }
 0x97d   :  { %v703_v61 = vmul.f32 %v2065_v57, %v702_v30  ;;  %v696_v0 = vmul.f32 %v2063_v59, %v695_v11 }
 0x97f   :  { %v704_v25 = vmul.f32 0.5, %v703_v61  ;;  %v700_v4 = vsel %vm699_vm2, %v2063_v59, %v696_v0 }
 0x980   :  { %v711_v13 = vmul.f32 %v2532_v31, %v700_v4 }
 0x981   :  { %v705_v32 = vsub.f32 1.5, %v704_v25 }
 0x982   :  { %v725_v26 = vmul.f32 %v711_v13, %v2398_v2  ;;  %v713_v27 = vmul.f32 %v711_v13, %v679_v8 }
 0x983   :  { %v706_v9 = vmul.f32 %v2065_v57, %v705_v32 }
 0x984   :  { %741 = vperm.xlu0 %1989, %v725_v26   ;;  %717 = vrot.lane.b32.xlu2 %v713_v27, %s2205_s22 }
 0x985   :  { %v710_v41 = vsel %vm709_vm5, %v2065_v57, %v706_v9 }
 0x986   :  { %v712_v48 = vmul.f32 %v2540_v63, %v710_v41 }
 0x988   :  { %v714_v28 = vmul.f32 %v712_v48, %v680_v55  ;;  %v726_v51 = vmul.f32 %v712_v48, %v2390_v52 }
 0x98a   :  { %719 = vrot.lane.b32.xlu1 %v714_v28, %s2205_s22 }
 0x98c   :  { %746 = vperm.xlu2 %1992, %v726_v51  }
 0x9de   :  { %v718_v3 = vpop.permute.xlu2 %717 }
 0x9df   :  { %v723_v10 = vsub.f32 %v2532_v31, %v718_v3 }
 0x9e1   :  { %v727_v8 = vmul.f32 %v723_v10, %v2388_v49 }
 0x9e3   :  { %v729_v1 = vsel %vm138_vm6, %v727_v8, 0.0 }
 0x9e6   :  { %v747_v0 = vpop.permute.xlu2 %746 }
 0x9e7   :  { %v750_v4 = vmul.f32 %v747_v0, %v2564_v12 }
 0x9f6   :  { %v742_v61 = vpop.permute.xlu0 %741 }
 0x9f7   :  { %v749_v25 = vmul.f32 %v742_v61, %v2566_v60 }
 0x9f9   :  { %v751_v13 = vadd.f32 %v750_v4, %v749_v25 }
 0x9fb   :  { %v752_v32 = vrot.slane %v751_v13, 4 }
 0x9fc   :  { %v720_v58 = vpop.permute.xlu1 %719 }
 0x9fd   :  { %v724_v24 = vsub.f32 %v2540_v63, %v720_v58  ;;  %v753_v26 = vadd.f32 %v752_v32, %v751_v13 }
 0x9ff   :  { %v728_v7 = vmul.f32 %v724_v24, %v2385_v47  ;;  %v754_v27 = vrot.slane %v753_v26, 2 }
 0xa01   :  { %v730_v34 = vsel %vm138_vm6, %v728_v7, 0.0  ;;  %v755_v9 = vadd.f32 %v754_v27, %v753_v26  ;;  %v771_v7 = vmul.f32 %v769_v14, %v2357_v46 }
 0xa02   :  { %v731_v55 = vadd.f32 %v730_v34, %v729_v1 }
 0xa03   :  { %v756_v41 = vrot.slane %v755_v9, 1 }
 0xa04   :  { %v732_v59 = vrot.slane %v731_v55, 4 }
 0xa05   :  { %v757_v48 = vadd.f32 %v756_v41, %v755_v9 }
 0xa06   :  { %v733_v53 = vadd.f32 %v732_v59, %v731_v55 }
 0xa08   :  { %v734_v56 = vrot.slane %v733_v53, 2 }
 0xa0a   :  { %v735_v54 = vadd.f32 %v734_v56, %v733_v53 }
 0xa0c   :  { %v736_v57 = vrot.slane %v735_v54, 1 }
 0xa0e   :  { %v737_v11 = vadd.f32 %v736_v57, %v735_v54 }
 0xa10   :  { %v738_v30 = vadd.f32 %v737_v11, %v2398_v2 }
 0xa12   :  { %760 = vperm.xlu1 %1993, %v738_v30  }
 0xa84   :  { %v761_v28 = vpop.permute.xlu1 %760 }
 0xa85   :  { %v763_v51 = vadd.f32 %v761_v28, %v757_v48 }
 0xa87   :  { %v764_v3 = vmul.f32 0.5, %v763_v51 }
 0xa89   :  { %2066 = vtanh.f32 %v764_v3 }
 0xa8f   :  { %v2067_v10 = vpop.eup %2066 }
 0xa90   :  { %v766_v58 = vmul.f32 0.5, %v2067_v10 }
 0xa92   :  { %v767_v8 = vadd.f32 0.5, %v766_v58 }
 0xa94   :  { %768 = vst [vmem:[#allocation2 + $0x5] sm:$0x1] %v767_v8  ;;  %v772_v24 = vperm.slane %v767_v8, 0 }
 0xa96   :  { %v773_v60 = vmul.f32 %v772_v24, %v2272_v19  ;;  %v774_v12 = vmul.f32 %v772_v24, %v2355_v45 }
 0xa98   :  { %v776_v1 = vadd.f32 %v774_v12, %v771_v7  ;;  %v775_v34 = vadd.f32 %v773_v60, %v2312_v33 }
 0xa9a   :  { %v778_v55 = vadd.f32 %v776_v1, %v2361_v50  ;;  %v777_v59 = vadd.f32 %v775_v34, %v2292_v29 }
 0xa9c   :  { %v780_v53 = vmul.f32 0.5, %v778_v55  ;;  %v779_v56 = vmul.f32 0.5, %v777_v59 }
 0xa9e   :  { %2068 = vtanh.f32 %v780_v53 }
 0xa9f   :  { %2070 = vtanh.f32 %v779_v56 }
 0xaa4   :  { %v2069_v54 = vpop.eup %2068 }
 0xaa5   :  { %v2071_v57 = vpop.eup %2070  ;;  %v784_v11 = vmul.f32 0.5, %v2069_v54 }
 0xaa6   :  { %v783_v30 = vmul.f32 0.5, %v2071_v57 }
 0xaa7   :  { %v2597_v61 = vadd.f32 0.5, %v784_v11 }
 0xaa8   :  { %v2599_v0 = vadd.f32 0.5, %v783_v30 }
 0xaa9   :  { %789 = vadd.xlane.f32.xlu1 %v2597_v61  ;;  %v792_v33 = vmul.f32 %v2597_v61, %v2597_v61 }
 0xaaa   :  { %787 = vadd.xlane.f32.xlu2 %v2599_v0  ;;  %v791_v14 = vmul.f32 %v2599_v0, %v2599_v0 }
 0xaac   :  { %793 = vadd.xlane.f32.xlu0 %v791_v14 }
 0xab2   :  { %795 = vadd.xlane.f32.xlu2 %v792_v33 }
 0xb1c   :  { %v790_v13 = vpop.xlane.xlu1 %789 }
 0xb1d   :  { %v788_v25 = vpop.xlane.xlu2 %787  ;;  %v798_v9 = vmul.f32 0.0078125, %v790_v13 }
 0xb1e   :  { %v797_v4 = vmul.f32 0.0078125, %v788_v25 }
 0xb1f   :  { %v794_v32 = vpop.xlane.xlu0 %793  ;;  %v802_v51 = vmul.f32 %v798_v9, %v798_v9 }
 0xb20   :  { %v801_v26 = vmul.f32 %v797_v4, %v797_v4  ;;  %v799_v27 = vmul.f32 0.0078125, %v794_v32 }
 0xb22   :  { %v803_v41 = vsub.f32 %v799_v27, %v801_v26 }
 0xb24   :  { %v805_v48 = vmax.f32 %v803_v41, 0.0 }
 0xb25   :  { %v796_v28 = vpop.xlane.xlu2 %795 }
 0xb26   :  { %v807_v3 = vadd.f32 1e-05, %v805_v48  ;;  %v800_v10 = vmul.f32 0.0078125, %v796_v28 }
 0xb28   :  { %2072 = vrsqrt.f32 %v807_v3  ;;  %v804_v58 = vsub.f32 %v800_v10, %v802_v51  ;;  %vm815_vm8 = vweird.f32 %v807_v3 }
 0xb2a   :  { %v806_v8 = vmax.f32 %v804_v58, 0.0 }
 0xb2c   :  { %v808_v24 = vadd.f32 1e-05, %v806_v8 }
 0xb2e   :  { %v2073_v60 = vpop.eup %2072  ;;  %2074 = vrsqrt.f32 %v808_v24  ;;  %vm825_vm11 = vweird.f32 %v808_v24 }
 0xb2f   :  { %v810_v12 = vmul.f32 %v2073_v60, %v807_v3  ;;  %vm816_vm7 = vweird.f32 %v2073_v60 }
 0xb30   :  { %vm817_vm9 = vmor %vm815_vm8, %vm816_vm7 }
 0xb31   :  { %v811_v7 = vmul.f32 %v2073_v60, %v810_v12 }
 0xb33   :  { %v812_v1 = vmul.f32 0.5, %v811_v7 }
 0xb34   :  { %v2075_v34 = vpop.eup %2074 }
 0xb35   :  { %v813_v55 = vsub.f32 1.5, %v812_v1  ;;  %v820_v59 = vmul.f32 %v2075_v34, %v808_v24  ;;  %vm826_vm10 = vweird.f32 %v2075_v34 }
 0xb36   :  { %vm827_vm12 = vmor %vm825_vm11, %vm826_vm10 }
 0xb37   :  { %v821_v53 = vmul.f32 %v2075_v34, %v820_v59  ;;  %v814_v56 = vmul.f32 %v2073_v60, %v813_v55 }
 0xb39   :  { %v822_v54 = vmul.f32 0.5, %v821_v53  ;;  %v818_v57 = vsel %vm817_vm9, %v2073_v60, %v814_v56 }
 0xb3a   :  { %v829_v11 = vmul.f32 %v2532_v31, %v818_v57 }
 0xb3b   :  { %v823_v30 = vsub.f32 1.5, %v822_v54 }
 0xb3c   :  { %v843_v14 = vmul.f32 %v829_v11, %v2398_v2  ;;  %v831_v33 = vmul.f32 %v829_v11, %v797_v4 }
 0xb3d   :  { %v824_v25 = vmul.f32 %v2075_v34, %v823_v30 }
 0xb3e   :  { %859 = vperm.xlu2 %1992, %v843_v14   ;;  %835 = vrot.lane.b32.xlu1 %v831_v33, %s2205_s22 }
 0xb3f   :  { %v828_v13 = vsel %vm827_vm12, %v2075_v34, %v824_v25 }
 0xb40   :  { %v830_v32 = vmul.f32 %v2540_v63, %v828_v13 }
 0xb42   :  { %v832_v26 = vmul.f32 %v830_v32, %v798_v9  ;;  %v844_v27 = vmul.f32 %v830_v32, %v2390_v52 }
 0xb44   :  { %837 = vrot.lane.b32.xlu0 %v832_v26, %s2205_s22 }
 0xb4c   :  { %864 = vperm.xlu0 %1989, %v844_v27  }
 0xb98   :  { %v860_v59 = vpop.permute.xlu2 %859 }
 0xb99   :  { %v867_v56 = vmul.f32 %v860_v59, %v2599_v0 }
 0xbb0   :  { %v836_v41 = vpop.permute.xlu1 %835 }
 0xbb1   :  { %v841_v48 = vsub.f32 %v2532_v31, %v836_v41 }
 0xbb3   :  { %v845_v4 = vmul.f32 %v841_v48, %v2388_v49 }
 0xbb5   :  { %v847_v10 = vsel %vm138_vm6, %v845_v4, 0.0  ;;  %v889_v4 = vmul.f32 %v887_v15, %v2357_v46 }
 0xbb6   :  { %v838_v28 = vpop.permute.xlu0 %837 }
 0xbb7   :  { %v842_v51 = vsub.f32 %v2540_v63, %v838_v28 }
 0xbb9   :  { %v846_v3 = vmul.f32 %v842_v51, %v2385_v47 }
 0xbbb   :  { %v848_v58 = vsel %vm138_vm6, %v846_v3, 0.0 }
 0xbbc   :  { %v849_v9 = vadd.f32 %v848_v58, %v847_v10 }
 0xbbe   :  { %v850_v8 = vrot.slane %v849_v9, 4  ;;  %v865_v55 = vpop.permute.xlu0 %864 }
 0xbbf   :  { %v868_v53 = vmul.f32 %v865_v55, %v2597_v61 }
 0xbc0   :  { %v851_v24 = vadd.f32 %v850_v8, %v849_v9 }
 0xbc1   :  { %v869_v54 = vadd.f32 %v868_v53, %v867_v56 }
 0xbc2   :  { %v852_v60 = vrot.slane %v851_v24, 2 }
 0xbc3   :  { %v870_v57 = vrot.slane %v869_v54, 4 }
 0xbc4   :  { %v853_v12 = vadd.f32 %v852_v60, %v851_v24 }
 0xbc5   :  { %v871_v11 = vadd.f32 %v870_v57, %v869_v54 }
 0xbc6   :  { %v854_v7 = vrot.slane %v853_v12, 1 }
 0xbc7   :  { %v872_v30 = vrot.slane %v871_v11, 2 }
 0xbc8   :  { %v855_v1 = vadd.f32 %v854_v7, %v853_v12 }
 0xbc9   :  { %v873_v14 = vadd.f32 %v872_v30, %v871_v11 }
 0xbca   :  { %v856_v34 = vadd.f32 %v855_v1, %v2398_v2 }
 0xbcb   :  { %v874_v33 = vrot.slane %v873_v14, 1 }
 0xbcc   :  { %878 = vperm.xlu1 %1993, %v856_v34  }
 0xbcd   :  { %v875_v25 = vadd.f32 %v874_v33, %v873_v14 }
 0xbd4   :  { %1996 = vset.pattern.permute.xlu1 %v2207_v62 }
 0xc3e   :  { %v879_v13 = vpop.permute.xlu1 %878 }
 0xc3f   :  { %v881_v32 = vadd.f32 %v879_v13, %v875_v25 }
 0xc41   :  { %v882_v26 = vmul.f32 0.5, %v881_v32 }
 0xc43   :  { %2076 = vtanh.f32 %v882_v26 }
 0xc49   :  { %v2077_v27 = vpop.eup %2076 }
 0xc4a   :  { %v884_v41 = vmul.f32 0.5, %v2077_v27 }
 0xc4c   :  { %v885_v48 = vadd.f32 0.5, %v884_v41 }
 0xc4e   :  { %886 = vst [vmem:[#allocation2 + $0x6] sm:$0x1] %v885_v48  ;;  %v890_v28 = vperm.slane %v885_v48, 0 }
 0xc50   :  { %v891_v61 = vmul.f32 %v890_v28, %v2272_v19  ;;  %v892_v0 = vmul.f32 %v890_v28, %v2355_v45 }
 0xc52   :  { %v894_v51 = vadd.f32 %v892_v0, %v889_v4  ;;  %v893_v3 = vadd.f32 %v891_v61, %v2317_v35 }
 0xc54   :  { %v896_v10 = vadd.f32 %v894_v51, %v2361_v50  ;;  %v895_v58 = vadd.f32 %v893_v3, %v2292_v29 }
 0xc56   :  { %v898_v9 = vmul.f32 0.5, %v896_v10  ;;  %v897_v8 = vmul.f32 0.5, %v895_v58 }
 0xc58   :  { %2078 = vtanh.f32 %v898_v9 }
 0xc59   :  { %2080 = vtanh.f32 %v897_v8 }
 0xc5e   :  { %v2079_v24 = vpop.eup %2078 }
 0xc5f   :  { %v2081_v60 = vpop.eup %2080  ;;  %v902_v12 = vmul.f32 0.5, %v2079_v24 }
 0xc60   :  { %v901_v7 = vmul.f32 0.5, %v2081_v60 }
 0xc61   :  { %v2631_v1 = vadd.f32 0.5, %v902_v12 }
 0xc62   :  { %v2633_v34 = vadd.f32 0.5, %v901_v7 }
 0xc63   :  { %907 = vadd.xlane.f32.xlu0 %v2631_v1  ;;  %v910_v15 = vmul.f32 %v2631_v1, %v2631_v1 }
 0xc64   :  { %905 = vadd.xlane.f32.xlu2 %v2633_v34  ;;  %v909_v5 = vmul.f32 %v2633_v34, %v2633_v34 }
 0xc66   :  { %911 = vadd.xlane.f32.xlu1 %v909_v5 }
 0xc6c   :  { %913 = vadd.xlane.f32.xlu2 %v910_v15 }
 0xcd6   :  { %v908_v59 = vpop.xlane.xlu0 %907 }
 0xcd7   :  { %v906_v35 = vpop.xlane.xlu2 %905  ;;  %v916_v57 = vmul.f32 0.0078125, %v908_v59 }
 0xcd8   :  { %v915_v55 = vmul.f32 0.0078125, %v906_v35 }
 0xcd9   :  { %v912_v53 = vpop.xlane.xlu1 %911  ;;  %v920_v33 = vmul.f32 %v916_v57, %v916_v57 }
 0xcda   :  { %v919_v56 = vmul.f32 %v915_v55, %v915_v55  ;;  %v917_v54 = vmul.f32 0.0078125, %v912_v53 }
 0xcdc   :  { %v921_v11 = vsub.f32 %v917_v54, %v919_v56 }
 0xcde   :  { %v923_v30 = vmax.f32 %v921_v11, 0.0 }
 0xcdf   :  { %v914_v14 = vpop.xlane.xlu2 %913 }
 0xce0   :  { %v925_v25 = vadd.f32 1e-05, %v923_v30  ;;  %v918_v13 = vmul.f32 0.0078125, %v914_v14 }
 0xce2   :  { %2082 = vrsqrt.f32 %v925_v25  ;;  %v922_v32 = vsub.f32 %v918_v13, %v920_v33  ;;  %vm933_vm14 = vweird.f32 %v925_v25 }
 0xce4   :  { %v924_v26 = vmax.f32 %v922_v32, 0.0 }
 0xce6   :  { %v926_v27 = vadd.f32 1e-05, %v924_v26 }
 0xce8   :  { %v2083_v41 = vpop.eup %2082  ;;  %2084 = vrsqrt.f32 %v926_v27  ;;  %vm943_vm1 = vweird.f32 %v926_v27 }
 0xce9   :  { %v928_v48 = vmul.f32 %v2083_v41, %v925_v25  ;;  %vm934_vm13 = vweird.f32 %v2083_v41 }
 0xcea   :  { %vm935_vm15 = vmor %vm933_vm14, %vm934_vm13 }
 0xceb   :  { %v929_v28 = vmul.f32 %v2083_v41, %v928_v48 }
 0xced   :  { %v930_v61 = vmul.f32 0.5, %v929_v28 }
 0xcee   :  { %v2085_v0 = vpop.eup %2084 }
 0xcef   :  { %v931_v4 = vsub.f32 1.5, %v930_v61  ;;  %v938_v51 = vmul.f32 %v2085_v0, %v926_v27  ;;  %vm944_vm0 = vweird.f32 %v2085_v0 }
 0xcf0   :  { %vm945_vm2 = vmor %vm943_vm1, %vm944_vm0 }
 0xcf1   :  { %v939_v3 = vmul.f32 %v2085_v0, %v938_v51  ;;  %v932_v10 = vmul.f32 %v2083_v41, %v931_v4 }
 0xcf3   :  { %v940_v58 = vmul.f32 0.5, %v939_v3  ;;  %v936_v9 = vsel %vm935_vm15, %v2083_v41, %v932_v10 }
 0xcf4   :  { %v947_v8 = vmul.f32 %v2532_v31, %v936_v9 }
 0xcf5   :  { %v941_v24 = vsub.f32 1.5, %v940_v58 }
 0xcf6   :  { %v961_v60 = vmul.f32 %v947_v8, %v2398_v2  ;;  %v949_v12 = vmul.f32 %v947_v8, %v915_v55 }
 0xcf7   :  { %v942_v7 = vmul.f32 %v2085_v0, %v941_v24 }
 0xcf8   :  { %977 = vperm.xlu2 %1992, %v961_v60   ;;  %953 = vrot.lane.b32.xlu0 %v949_v12, %s2205_s22 }
 0xcf9   :  { %v946_v5 = vsel %vm945_vm2, %v2085_v0, %v942_v7 }
 0xcfa   :  { %v948_v15 = vmul.f32 %v2540_v63, %v946_v5 }
 0xcfc   :  { %v950_v35 = vmul.f32 %v948_v15, %v916_v57  ;;  %v962_v59 = vmul.f32 %v948_v15, %v2390_v52 }
 0xcfe   :  { %955 = vrot.lane.b32.xlu1 %v950_v35, %s2205_s22 }
 0xd00   :  { %982 = vperm.xlu0 %1989, %v962_v59   ;;  %1997 = vset.pattern.permute.xlu2 %v2208_v44 }
 0xd08   :  { %1994 = vset.pattern.permute.xlu0 %v2208_v44 }
 0xd52   :  { %v978_v61 = vpop.permute.xlu2 %977 }
 0xd53   :  { %v985_v4 = vmul.f32 %v978_v61, %v2633_v34 }
 0xd6a   :  { %v954_v55 = vpop.permute.xlu0 %953 }
 0xd6b   :  { %v959_v53 = vsub.f32 %v2532_v31, %v954_v55 }
 0xd6d   :  { %v963_v54 = vmul.f32 %v959_v53, %v2388_v49 }
 0xd6f   :  { %v965_v57 = vsel %vm138_vm6, %v963_v54, 0.0 }
 0xd70   :  { %v956_v56 = vpop.permute.xlu1 %955 }
 0xd71   :  { %v960_v11 = vsub.f32 %v2540_v63, %v956_v56 }
 0xd72   :  { %v983_v28 = vpop.permute.xlu0 %982 }
 0xd73   :  { %v964_v30 = vmul.f32 %v960_v11, %v2385_v47  ;;  %v986_v0 = vmul.f32 %v983_v28, %v2631_v1  ;;  %v2170_v1 = vld [vmem:[%s2956_s0 + $0x8] sm:$0xff] }
 0xd74   :  { %v1005_v59 = vperm.slane %v2170_v1, 0 }
 0xd75   :  { %v966_v14 = vsel %vm138_vm6, %v964_v30, 0.0  ;;  %v987_v51 = vadd.f32 %v986_v0, %v985_v4 }
 0xd76   :  { %v967_v33 = vadd.f32 %v966_v14, %v965_v57  ;;  %v1007_v56 = vmul.f32 %v1005_v59, %v2357_v46  ;;  %v1006_v54 = vmul.f32 %v1005_v59, %v2274_v20 }
 0xd77   :  { %v988_v3 = vrot.slane %v987_v51, 4 }
 0xd78   :  { %v968_v25 = vrot.slane %v967_v33, 4 }
 0xd79   :  { %v989_v10 = vadd.f32 %v988_v3, %v987_v51 }
 0xd7a   :  { %v969_v13 = vadd.f32 %v968_v25, %v967_v33 }
 0xd7b   :  { %v990_v58 = vrot.slane %v989_v10, 2 }
 0xd7c   :  { %v970_v32 = vrot.slane %v969_v13, 2 }
 0xd7d   :  { %v991_v9 = vadd.f32 %v990_v58, %v989_v10 }
 0xd7e   :  { %v971_v26 = vadd.f32 %v970_v32, %v969_v13 }
 0xd7f   :  { %v992_v8 = vrot.slane %v991_v9, 1 }
 0xd80   :  { %v972_v27 = vrot.slane %v971_v26, 1 }
 0xd81   :  { %v993_v24 = vadd.f32 %v992_v8, %v991_v9 }
 0xd82   :  { %v973_v41 = vadd.f32 %v972_v27, %v971_v26 }
 0xd84   :  { %v974_v48 = vadd.f32 %v973_v41, %v2398_v2 }
 0xd86   :  { %996 = vperm.xlu0 %1994, %v974_v48  }
 0xd8e   :  { %1995 = vset.pattern.permute.xlu0 %v2207_v62 }
 0xdf8   :  { %v997_v60 = vpop.permute.xlu0 %996 }
 0xdf9   :  { %v999_v12 = vadd.f32 %v997_v60, %v993_v24 }
 0xdfb   :  { %v1000_v7 = vmul.f32 0.5, %v999_v12 }
 0xdfd   :  { %2086 = vtanh.f32 %v1000_v7 }
 0xe03   :  { %v2087_v5 = vpop.eup %2086 }
 0xe04   :  { %v1002_v15 = vmul.f32 0.5, %v2087_v5 }
 0xe06   :  { %v1003_v35 = vadd.f32 0.5, %v1002_v15 }
 0xe08   :  { %1004 = vst [vmem:[#allocation2 + $0x7] sm:$0x1] %v1003_v35  ;;  %v1008_v34 = vperm.slane %v1003_v35, 0 }
 0xe0a   :  { %v1009_v55 = vmul.f32 %v1008_v34, %v2272_v19  ;;  %v1010_v53 = vmul.f32 %v1008_v34, %v2355_v45 }
 0xe0c   :  { %v1012_v11 = vadd.f32 %v1010_v53, %v1007_v56  ;;  %v1011_v30 = vadd.f32 %v1009_v55, %v1006_v54 }
 0xe0e   :  { %v1014_v57 = vadd.f32 %v1012_v11, %v2361_v50  ;;  %v1013_v14 = vadd.f32 %v1011_v30, %v2292_v29 }
 0xe10   :  { %v1016_v33 = vmul.f32 0.5, %v1014_v57  ;;  %v1015_v25 = vmul.f32 0.5, %v1013_v14 }
 0xe12   :  { %2088 = vtanh.f32 %v1016_v33 }
 0xe13   :  { %2090 = vtanh.f32 %v1015_v25 }
 0xe18   :  { %v2089_v13 = vpop.eup %2088 }
 0xe19   :  { %v2091_v32 = vpop.eup %2090  ;;  %v1020_v26 = vmul.f32 0.5, %v2089_v13 }
 0xe1a   :  { %v1019_v27 = vmul.f32 0.5, %v2091_v32 }
 0xe1b   :  { %v2668_v41 = vadd.f32 0.5, %v1020_v26 }
 0xe1c   :  { %v2670_v48 = vadd.f32 0.5, %v1019_v27 }
 0xe1d   :  { %1025 = vadd.xlane.f32.xlu2 %v2668_v41  ;;  %v1028_v28 = vmul.f32 %v2668_v41, %v2668_v41 }
 0xe1e   :  { %1023 = vadd.xlane.f32.xlu1 %v2670_v48  ;;  %v1027_v20 = vmul.f32 %v2670_v48, %v2670_v48 }
 0xe20   :  { %1029 = vadd.xlane.f32.xlu0 %v1027_v20 }
 0xe25   :  { %1031 = vadd.xlane.f32.xlu2 %v1028_v28 }
 0xe90   :  { %v1026_v61 = vpop.xlane.xlu2 %1025 }
 0xe91   :  { %v1024_v0 = vpop.xlane.xlu1 %1023  ;;  %v1034_v58 = vmul.f32 0.0078125, %v1026_v61 }
 0xe92   :  { %v1033_v4 = vmul.f32 0.0078125, %v1024_v0 }
 0xe93   :  { %v1030_v51 = vpop.xlane.xlu0 %1029  ;;  %v1038_v60 = vmul.f32 %v1034_v58, %v1034_v58 }
 0xe94   :  { %v1037_v3 = vmul.f32 %v1033_v4, %v1033_v4  ;;  %v1035_v10 = vmul.f32 0.0078125, %v1030_v51 }
 0xe96   :  { %v1039_v9 = vsub.f32 %v1035_v10, %v1037_v3 }
 0xe98   :  { %v1041_v8 = vmax.f32 %v1039_v9, 0.0  ;;  %v1032_v24 = vpop.xlane.xlu2 %1031 }
 0xe99   :  { %v1036_v12 = vmul.f32 0.0078125, %v1032_v24 }
 0xe9a   :  { %v1043_v7 = vadd.f32 1e-05, %v1041_v8 }
 0xe9b   :  { %v1040_v5 = vsub.f32 %v1036_v12, %v1038_v60 }
 0xe9c   :  { %2092 = vrsqrt.f32 %v1043_v7  ;;  %vm1051_vm4 = vweird.f32 %v1043_v7 }
 0xe9d   :  { %v1042_v15 = vmax.f32 %v1040_v5, 0.0 }
 0xe9f   :  { %v1044_v35 = vadd.f32 1e-05, %v1042_v15 }
 0xea1   :  { %2094 = vrsqrt.f32 %v1044_v35  ;;  %vm1061_vm8 = vweird.f32 %v1044_v35 }
 0xea2   :  { %v2093_v1 = vpop.eup %2092 }
 0xea3   :  { %v1046_v59 = vmul.f32 %v2093_v1, %v1043_v7  ;;  %vm1052_vm3 = vweird.f32 %v2093_v1 }
 0xea4   :  { %vm1053_vm5 = vmor %vm1051_vm4, %vm1052_vm3 }
 0xea5   :  { %v1047_v34 = vmul.f32 %v2093_v1, %v1046_v59 }
 0xea7   :  { %v2095_v55 = vpop.eup %2094  ;;  %v1048_v53 = vmul.f32 0.5, %v1047_v34 }
 0xea8   :  { %v1056_v56 = vmul.f32 %v2095_v55, %v1044_v35  ;;  %vm1062_vm7 = vweird.f32 %v2095_v55 }
 0xea9   :  { %v1049_v54 = vsub.f32 1.5, %v1048_v53  ;;  %vm1063_vm9 = vmor %vm1061_vm8, %vm1062_vm7 }
 0xeaa   :  { %v1057_v11 = vmul.f32 %v2095_v55, %v1056_v56 }
 0xeab   :  { %v1050_v30 = vmul.f32 %v2093_v1, %v1049_v54 }
 0xeac   :  { %v1058_v57 = vmul.f32 0.5, %v1057_v11 }
 0xead   :  { %v1054_v14 = vsel %vm1053_vm5, %v2093_v1, %v1050_v30 }
 0xeae   :  { %v1059_v33 = vsub.f32 1.5, %v1058_v57  ;;  %v1065_v25 = vmul.f32 %v2532_v31, %v1054_v14 }
 0xeb0   :  { %v1079_v13 = vmul.f32 %v1065_v25, %v2398_v2  ;;  %v1067_v32 = vmul.f32 %v1065_v25, %v1033_v4  ;;  %v1060_v26 = vmul.f32 %v2095_v55, %v1059_v33 }
 0xeb2   :  { %1095 = vperm.xlu0 %1995, %v1079_v13   ;;  %1071 = vrot.lane.b32.xlu1 %v1067_v32, %s2205_s22  ;;  %v1064_v27 = vsel %vm1063_vm9, %v2095_v55, %v1060_v26 }
 0xeb3   :  { %v1066_v20 = vmul.f32 %v2540_v63, %v1064_v27 }
 0xeb5   :  { %v1068_v28 = vmul.f32 %v1066_v20, %v1034_v58  ;;  %v1080_v61 = vmul.f32 %v1066_v20, %v2390_v52  ;;  %v1125_v20 = vmul.f32 %v1123_v16, %v2357_v46 }
 0xeb7   :  { %1073 = vrot.lane.b32.xlu2 %v1068_v28, %s2205_s22 }
 0xeba   :  { %1100 = vperm.xlu1 %1996, %v1080_v61  }
 0xec2   :  { %1999 = vset.pattern.permute.xlu1 %v2208_v44 }
 0xf11   :  { %v1074_v0 = vpop.permute.xlu2 %1073 }
 0xf12   :  { %v1078_v51 = vsub.f32 %v2540_v63, %v1074_v0 }
 0xf14   :  { %v1082_v3 = vmul.f32 %v1078_v51, %v2385_v47 }
 0xf16   :  { %v1084_v8 = vsel %vm138_vm6, %v1082_v3, 0.0 }
 0xf24   :  { %v1072_v4 = vpop.permute.xlu1 %1071 }
 0xf25   :  { %v1077_v10 = vsub.f32 %v2532_v31, %v1072_v4  ;;  %v1096_v31 = vpop.permute.xlu0 %1095 }
 0xf26   :  { %v1103_v34 = vmul.f32 %v1096_v31, %v2670_v48 }
 0xf27   :  { %v1081_v9 = vmul.f32 %v1077_v10, %v2388_v49 }
 0xf29   :  { %v1083_v58 = vsel %vm138_vm6, %v1081_v9, 0.0 }
 0xf2a   :  { %v1085_v24 = vadd.f32 %v1084_v8, %v1083_v58 }
 0xf2c   :  { %v1086_v60 = vrot.slane %v1085_v24, 4  ;;  %v1101_v1 = vpop.permute.xlu1 %1100 }
 0xf2d   :  { %v1104_v59 = vmul.f32 %v1101_v1, %v2668_v41 }
 0xf2e   :  { %v1087_v12 = vadd.f32 %v1086_v60, %v1085_v24 }
 0xf2f   :  { %v1105_v55 = vadd.f32 %v1104_v59, %v1103_v34 }
 0xf30   :  { %v1088_v7 = vrot.slane %v1087_v12, 2 }
 0xf31   :  { %v1106_v53 = vrot.slane %v1105_v55, 4 }
 0xf32   :  { %v1089_v5 = vadd.f32 %v1088_v7, %v1087_v12 }
 0xf33   :  { %v1107_v56 = vadd.f32 %v1106_v53, %v1105_v55 }
 0xf34   :  { %v1090_v15 = vrot.slane %v1089_v5, 1 }
 0xf35   :  { %v1108_v54 = vrot.slane %v1107_v56, 2 }
 0xf36   :  { %v1091_v35 = vadd.f32 %v1090_v15, %v1089_v5 }
 0xf37   :  { %v1109_v11 = vadd.f32 %v1108_v54, %v1107_v56 }
 0xf38   :  { %v1092_v63 = vadd.f32 %v1091_v35, %v2398_v2 }
 0xf39   :  { %v1110_v30 = vrot.slane %v1109_v11, 1 }
 0xf3a   :  { %1114 = vperm.xlu2 %1997, %v1092_v63  }
 0xf3b   :  { %v1111_v57 = vadd.f32 %v1110_v30, %v1109_v11 }
 0xf42   :  { %1998 = vset.pattern.permute.xlu2 %v2207_v62 }
 0xf94   :  { %v1115_v14 = vpop.permute.xlu2 %1114 }
 0xf95   :  { %v1117_v33 = vadd.f32 %v1115_v14, %v1111_v57 }
 0xf97   :  { %v1118_v25 = vmul.f32 0.5, %v1117_v33 }
 0xf99   :  { %2096 = vtanh.f32 %v1118_v25 }
 0xf9f   :  { %v2097_v13 = vpop.eup %2096 }
 0xfa0   :  { %v1120_v32 = vmul.f32 0.5, %v2097_v13 }
 0xfa2   :  { %v1121_v26 = vadd.f32 0.5, %v1120_v32 }
 0xfa4   :  { %1122 = vst [vmem:[#allocation2 + $0x8] sm:$0x1] %v1121_v26  ;;  %v1126_v27 = vperm.slane %v1121_v26, 0 }
 0xfa6   :  { %v1127_v41 = vmul.f32 %v1126_v27, %v2272_v19  ;;  %v1128_v48 = vmul.f32 %v1126_v27, %v2355_v45 }
 0xfa8   :  { %v1130_v28 = vadd.f32 %v1128_v48, %v1125_v20  ;;  %v1129_v61 = vadd.f32 %v1127_v41, %v2322_v36 }
 0xfaa   :  { %v1132_v0 = vadd.f32 %v1130_v28, %v2361_v50  ;;  %v1131_v51 = vadd.f32 %v1129_v61, %v2292_v29  ;;  %v2716_v28 = vld [vmem:[%s2958_s2] sm:$0xff] }
 0xfac   :  { %v1134_v4 = vmul.f32 0.5, %v1132_v0  ;;  %v1133_v3 = vmul.f32 0.5, %v1131_v51 }
 0xfae   :  { %2098 = vtanh.f32 %v1134_v4 }
 0xfaf   :  { %2100 = vtanh.f32 %v1133_v3 }
 0xfb4   :  { %v2099_v10 = vpop.eup %2098 }
 0xfb5   :  { %v2101_v9 = vpop.eup %2100  ;;  %v1138_v8 = vmul.f32 0.5, %v2099_v10 }
 0xfb6   :  { %v1137_v58 = vmul.f32 0.5, %v2101_v9  ;;  %v2724_v9 = vld [vmem:[%s2958_s2 + $0x8] sm:$0xff] }
 0xfb7   :  { %v2703_v24 = vadd.f32 0.5, %v1138_v8 }
 0xfb8   :  { %v2705_v60 = vadd.f32 0.5, %v1137_v58 }
 0xfb9   :  { %1143 = vadd.xlane.f32.xlu2 %v2703_v24  ;;  %v1146_v36 = vmul.f32 %v2703_v24, %v2703_v24 }
 0xfba   :  { %1141 = vadd.xlane.f32.xlu1 %v2705_v60  ;;  %v1145_v16 = vmul.f32 %v2705_v60, %v2705_v60 }
 0xfbc   :  { %1147 = vadd.xlane.f32.xlu0 %v1145_v16 }
 0xfc2   :  { %1149 = vadd.xlane.f32.xlu1 %v1146_v36 }
0x102c   :  { %v1144_v5 = vpop.xlane.xlu2 %1143 }
0x102d   :  { %v1142_v12 = vpop.xlane.xlu1 %1141  ;;  %v1152_v1 = vmul.f32 0.0078125, %v1144_v5 }
0x102e   :  { %v1151_v7 = vmul.f32 0.0078125, %v1142_v12 }
0x102f   :  { %v1148_v15 = vpop.xlane.xlu0 %1147  ;;  %v1156_v55 = vmul.f32 %v1152_v1, %v1152_v1 }
0x1030   :  { %v1155_v35 = vmul.f32 %v1151_v7, %v1151_v7  ;;  %v1153_v63 = vmul.f32 0.0078125, %v1148_v15 }
0x1032   :  { %v1157_v31 = vsub.f32 %v1153_v63, %v1155_v35 }
0x1034   :  { %v1159_v59 = vmax.f32 %v1157_v31, 0.0 }
0x1035   :  { %v1150_v34 = vpop.xlane.xlu1 %1149 }
0x1036   :  { %v1161_v53 = vadd.f32 1e-05, %v1159_v59  ;;  %v1154_v56 = vmul.f32 0.0078125, %v1150_v34 }
0x1038   :  { %2102 = vrsqrt.f32 %v1161_v53  ;;  %v1158_v54 = vsub.f32 %v1154_v56, %v1156_v55  ;;  %vm1169_vm11 = vweird.f32 %v1161_v53 }
0x103a   :  { %v1160_v11 = vmax.f32 %v1158_v54, 0.0 }
0x103c   :  { %v1162_v30 = vadd.f32 1e-05, %v1160_v11 }
0x103e   :  { %v2103_v57 = vpop.eup %2102  ;;  %2104 = vrsqrt.f32 %v1162_v30  ;;  %vm1179_vm14 = vweird.f32 %v1162_v30 }
0x103f   :  { %v1164_v14 = vmul.f32 %v2103_v57, %v1161_v53  ;;  %vm1170_vm10 = vweird.f32 %v2103_v57 }
0x1040   :  { %vm1171_vm12 = vmor %vm1169_vm11, %vm1170_vm10 }
0x1041   :  { %v1165_v33 = vmul.f32 %v2103_v57, %v1164_v14 }
0x1043   :  { %v1166_v25 = vmul.f32 0.5, %v1165_v33 }
0x1044   :  { %v2105_v13 = vpop.eup %2104 }
0x1045   :  { %v1167_v32 = vsub.f32 1.5, %v1166_v25  ;;  %v1174_v26 = vmul.f32 %v2105_v13, %v1162_v30  ;;  %vm1180_vm13 = vweird.f32 %v2105_v13 }
0x1046   :  { %vm1181_vm15 = vmor %vm1179_vm14, %vm1180_vm13 }
0x1047   :  { %v1175_v27 = vmul.f32 %v2105_v13, %v1174_v26  ;;  %v1168_v41 = vmul.f32 %v2103_v57, %v1167_v32 }
0x1049   :  { %v1176_v48 = vmul.f32 0.5, %v1175_v27  ;;  %v1172_v20 = vsel %vm1171_vm12, %v2103_v57, %v1168_v41 }
0x104a   :  { %v1183_v61 = vmul.f32 %v2716_v28, %v1172_v20 }
0x104b   :  { %v1177_v0 = vsub.f32 1.5, %v1176_v48 }
0x104c   :  { %v1197_v51 = vmul.f32 %v1183_v61, %v2398_v2  ;;  %v1185_v4 = vmul.f32 %v1183_v61, %v1151_v7 }
0x104d   :  { %v1178_v3 = vmul.f32 %v2105_v13, %v1177_v0 }
0x104e   :  { %1213 = vperm.xlu0 %1995, %v1197_v51   ;;  %1189 = vrot.lane.b32.xlu2 %v1185_v4, %s2205_s22 }
0x104f   :  { %v1182_v10 = vsel %vm1181_vm15, %v2105_v13, %v1178_v3 }
0x1050   :  { %v1184_v8 = vmul.f32 %v2724_v9, %v1182_v10 }
0x1052   :  { %v1186_v58 = vmul.f32 %v1184_v8, %v1152_v1  ;;  %v1198_v16 = vmul.f32 %v1184_v8, %v2390_v52  ;;  %v1243_v8 = vmul.f32 %v1241_v17, %v2357_v46 }
0x1054   :  { %1191 = vrot.lane.b32.xlu1 %v1186_v58, %s2205_s22 }
0x1056   :  { %1218 = vperm.xlu2 %1998, %v1198_v16  }
0x10a8   :  { %v1190_v36 = vpop.permute.xlu2 %1189 }
0x10a9   :  { %v1195_v12 = vsub.f32 %v2716_v28, %v1190_v36 }
0x10ab   :  { %v1199_v5 = vmul.f32 %v1195_v12, %v2388_v49 }
0x10ad   :  { %v1201_v63 = vsel %vm138_vm6, %v1199_v5, 0.0 }
0x10b0   :  { %v1219_v57 = vpop.permute.xlu2 %1218 }
0x10b1   :  { %v1222_v33 = vmul.f32 %v1219_v57, %v2703_v24 }
0x10c0   :  { %v1214_v30 = vpop.permute.xlu0 %1213 }
0x10c1   :  { %v1221_v14 = vmul.f32 %v1214_v30, %v2705_v60 }
0x10c3   :  { %v1223_v25 = vadd.f32 %v1222_v33, %v1221_v14 }
0x10c5   :  { %v1224_v13 = vrot.slane %v1223_v25, 4 }
0x10c6   :  { %v1192_v7 = vpop.permute.xlu1 %1191 }
0x10c7   :  { %v1196_v15 = vsub.f32 %v2724_v9, %v1192_v7  ;;  %v1225_v32 = vadd.f32 %v1224_v13, %v1223_v25 }
0x10c9   :  { %v1200_v35 = vmul.f32 %v1196_v15, %v2385_v47  ;;  %v1226_v26 = vrot.slane %v1225_v32, 2 }
0x10cb   :  { %v1202_v31 = vsel %vm138_vm6, %v1200_v35, 0.0  ;;  %v1227_v27 = vadd.f32 %v1226_v26, %v1225_v32 }
0x10cc   :  { %v1203_v1 = vadd.f32 %v1202_v31, %v1201_v63 }
0x10cd   :  { %v1228_v41 = vrot.slane %v1227_v27, 1 }
0x10ce   :  { %v1204_v59 = vrot.slane %v1203_v1, 4 }
0x10cf   :  { %v1229_v48 = vadd.f32 %v1228_v41, %v1227_v27 }
0x10d0   :  { %v1205_v34 = vadd.f32 %v1204_v59, %v1203_v1 }
0x10d2   :  { %v1206_v55 = vrot.slane %v1205_v34, 2 }
0x10d4   :  { %v1207_v53 = vadd.f32 %v1206_v55, %v1205_v34 }
0x10d6   :  { %v1208_v56 = vrot.slane %v1207_v53, 1 }
0x10d8   :  { %v1209_v54 = vadd.f32 %v1208_v56, %v1207_v53 }
0x10da   :  { %v1210_v11 = vadd.f32 %v1209_v54, %v2398_v2 }
0x10dc   :  { %1232 = vperm.xlu1 %1999, %v1210_v11  }
0x114e   :  { %v1233_v20 = vpop.permute.xlu1 %1232 }
0x114f   :  { %v1235_v61 = vadd.f32 %v1233_v20, %v1229_v48 }
0x1151   :  { %v1236_v0 = vmul.f32 0.5, %v1235_v61 }
0x1153   :  { %2106 = vtanh.f32 %v1236_v0 }
0x1159   :  { %v2107_v51 = vpop.eup %2106 }
0x115a   :  { %v1238_v4 = vmul.f32 0.5, %v2107_v51 }
0x115c   :  { %v1239_v3 = vadd.f32 0.5, %v1238_v4 }
0x115e   :  { %1240 = vst [vmem:[#allocation2 + $0x9] sm:$0x1] %v1239_v3  ;;  %v1244_v10 = vperm.slane %v1239_v3, 0 }
0x1160   :  { %v1245_v60 = vmul.f32 %v1244_v10, %v2272_v19  ;;  %v1246_v24 = vmul.f32 %v1244_v10, %v2355_v45 }
0x1162   :  { %v1248_v58 = vadd.f32 %v1246_v24, %v1243_v8  ;;  %v1247_v16 = vadd.f32 %v1245_v60, %v2327_v37 }
0x1164   :  { %v1250_v36 = vadd.f32 %v1248_v58, %v2361_v50  ;;  %v1249_v12 = vadd.f32 %v1247_v16, %v2292_v29 }
0x1166   :  { %v1252_v7 = vmul.f32 0.5, %v1250_v36  ;;  %v1251_v5 = vmul.f32 0.5, %v1249_v12 }
0x1168   :  { %2108 = vtanh.f32 %v1252_v7 }
0x1169   :  { %2110 = vtanh.f32 %v1251_v5 }
0x116e   :  { %v2109_v15 = vpop.eup %2108 }
0x116f   :  { %v2111_v35 = vpop.eup %2110  ;;  %v1256_v63 = vmul.f32 0.5, %v2109_v15 }
0x1170   :  { %v1255_v31 = vmul.f32 0.5, %v2111_v35 }
0x1171   :  { %v2746_v1 = vadd.f32 0.5, %v1256_v63 }
0x1172   :  { %v2748_v59 = vadd.f32 0.5, %v1255_v31 }
0x1173   :  { %1261 = vadd.xlane.f32.xlu1 %v2746_v1  ;;  %v1264_v37 = vmul.f32 %v2746_v1, %v2746_v1 }
0x1174   :  { %1259 = vadd.xlane.f32.xlu2 %v2748_v59  ;;  %v1263_v17 = vmul.f32 %v2748_v59, %v2748_v59 }
0x1176   :  { %1265 = vadd.xlane.f32.xlu0 %v1263_v17 }
0x117c   :  { %1267 = vadd.xlane.f32.xlu2 %v1264_v37 }
0x11e6   :  { %v1262_v53 = vpop.xlane.xlu1 %1261 }
0x11e7   :  { %v1260_v34 = vpop.xlane.xlu2 %1259  ;;  %v1270_v30 = vmul.f32 0.0078125, %v1262_v53 }
0x11e8   :  { %v1269_v55 = vmul.f32 0.0078125, %v1260_v34 }
0x11e9   :  { %v1266_v56 = vpop.xlane.xlu0 %1265  ;;  %v1274_v25 = vmul.f32 %v1270_v30, %v1270_v30 }
0x11ea   :  { %v1273_v54 = vmul.f32 %v1269_v55, %v1269_v55  ;;  %v1271_v11 = vmul.f32 0.0078125, %v1266_v56 }
0x11ec   :  { %v1275_v57 = vsub.f32 %v1271_v11, %v1273_v54 }
0x11ee   :  { %v1277_v14 = vmax.f32 %v1275_v57, 0.0 }
0x11ef   :  { %v1268_v33 = vpop.xlane.xlu2 %1267 }
0x11f0   :  { %v1279_v13 = vadd.f32 1e-05, %v1277_v14  ;;  %v1272_v32 = vmul.f32 0.0078125, %v1268_v33 }
0x11f2   :  { %2112 = vrsqrt.f32 %v1279_v13  ;;  %v1276_v26 = vsub.f32 %v1272_v32, %v1274_v25  ;;  %vm1287_vm1 = vweird.f32 %v1279_v13 }
0x11f4   :  { %v1278_v27 = vmax.f32 %v1276_v26, 0.0 }
0x11f6   :  { %v1280_v41 = vadd.f32 1e-05, %v1278_v27 }
0x11f8   :  { %v2113_v48 = vpop.eup %2112  ;;  %2114 = vrsqrt.f32 %v1280_v41  ;;  %vm1297_vm4 = vweird.f32 %v1280_v41 }
0x11f9   :  { %v1282_v20 = vmul.f32 %v2113_v48, %v1279_v13  ;;  %vm1288_vm0 = vweird.f32 %v2113_v48 }
0x11fa   :  { %vm1289_vm2 = vmor %vm1287_vm1, %vm1288_vm0 }
0x11fb   :  { %v1283_v61 = vmul.f32 %v2113_v48, %v1282_v20 }
0x11fd   :  { %v1284_v0 = vmul.f32 0.5, %v1283_v61 }
0x11fe   :  { %v2115_v51 = vpop.eup %2114 }
0x11ff   :  { %v1285_v4 = vsub.f32 1.5, %v1284_v0  ;;  %v1292_v3 = vmul.f32 %v2115_v51, %v1280_v41  ;;  %vm1298_vm3 = vweird.f32 %v2115_v51 }
0x1200   :  { %vm1299_vm5 = vmor %vm1297_vm4, %vm1298_vm3 }
0x1201   :  { %v1293_v10 = vmul.f32 %v2115_v51, %v1292_v3  ;;  %v1286_v60 = vmul.f32 %v2113_v48, %v1285_v4 }
0x1203   :  { %v1294_v24 = vmul.f32 0.5, %v1293_v10  ;;  %v1290_v8 = vsel %vm1289_vm2, %v2113_v48, %v1286_v60 }
0x1204   :  { %v1301_v58 = vmul.f32 %v2716_v28, %v1290_v8 }
0x1205   :  { %v1295_v16 = vsub.f32 1.5, %v1294_v24 }
0x1206   :  { %v1315_v36 = vmul.f32 %v1301_v58, %v2398_v2  ;;  %v1303_v12 = vmul.f32 %v1301_v58, %v1269_v55 }
0x1207   :  { %v1296_v7 = vmul.f32 %v2115_v51, %v1295_v16 }
0x1208   :  { %1331 = vperm.xlu2 %1998, %v1315_v36   ;;  %1307 = vrot.lane.b32.xlu1 %v1303_v12, %s2205_s22 }
0x1209   :  { %v1300_v5 = vsel %vm1299_vm5, %v2115_v51, %v1296_v7  ;;  %v1361_v7 = vmul.f32 %v1359_v18, %v2357_v46 }
0x120a   :  { %v1302_v15 = vmul.f32 %v2724_v9, %v1300_v5 }
0x120c   :  { %v1304_v35 = vmul.f32 %v1302_v15, %v1270_v30  ;;  %v1316_v63 = vmul.f32 %v1302_v15, %v2390_v52 }
0x120e   :  { %1309 = vrot.lane.b32.xlu0 %v1304_v35, %s2205_s22 }
0x1216   :  { %1336 = vperm.xlu0 %1995, %v1316_v63  }
0x1262   :  { %v1332_v27 = vpop.permute.xlu2 %1331 }
0x1263   :  { %v1339_v48 = vmul.f32 %v1332_v27, %v2748_v59 }
0x127a   :  { %v1308_v31 = vpop.permute.xlu1 %1307 }
0x127b   :  { %v1313_v17 = vsub.f32 %v2716_v28, %v1308_v31 }
0x127d   :  { %v1317_v34 = vmul.f32 %v1313_v17, %v2388_v49 }
0x127f   :  { %v1319_v56 = vsel %vm138_vm6, %v1317_v34, 0.0 }
0x1280   :  { %v1310_v37 = vpop.permute.xlu0 %1309 }
0x1281   :  { %v1314_v55 = vsub.f32 %v2724_v9, %v1310_v37 }
0x1283   :  { %v1318_v53 = vmul.f32 %v1314_v55, %v2385_v47 }
0x1285   :  { %v1320_v54 = vsel %vm138_vm6, %v1318_v53, 0.0 }
0x1286   :  { %v1321_v11 = vadd.f32 %v1320_v54, %v1319_v56 }
0x1288   :  { %v1322_v30 = vrot.slane %v1321_v11, 4  ;;  %v1337_v26 = vpop.permute.xlu0 %1336 }
0x1289   :  { %v1340_v41 = vmul.f32 %v1337_v26, %v2746_v1 }
0x128a   :  { %v1323_v57 = vadd.f32 %v1322_v30, %v1321_v11 }
0x128b   :  { %v1341_v20 = vadd.f32 %v1340_v41, %v1339_v48 }
0x128c   :  { %v1324_v14 = vrot.slane %v1323_v57, 2 }
0x128d   :  { %v1342_v61 = vrot.slane %v1341_v20, 4 }
0x128e   :  { %v1325_v33 = vadd.f32 %v1324_v14, %v1323_v57 }
0x128f   :  { %v1343_v0 = vadd.f32 %v1342_v61, %v1341_v20 }
0x1290   :  { %v1326_v25 = vrot.slane %v1325_v33, 1 }
0x1291   :  { %v1344_v51 = vrot.slane %v1343_v0, 2 }
0x1292   :  { %v1327_v13 = vadd.f32 %v1326_v25, %v1325_v33 }
0x1293   :  { %v1345_v4 = vadd.f32 %v1344_v51, %v1343_v0 }
0x1294   :  { %v1328_v32 = vadd.f32 %v1327_v13, %v2398_v2 }
0x1295   :  { %v1346_v3 = vrot.slane %v1345_v4, 1 }
0x1296   :  { %1350 = vperm.xlu1 %1999, %v1328_v32  }
0x1297   :  { %v1347_v10 = vadd.f32 %v1346_v3, %v1345_v4 }
0x129e   :  { %2002 = vset.pattern.permute.xlu1 %v2207_v62 }
0x1308   :  { %v1351_v60 = vpop.permute.xlu1 %1350 }
0x1309   :  { %v1353_v24 = vadd.f32 %v1351_v60, %v1347_v10 }
0x130b   :  { %v1354_v8 = vmul.f32 0.5, %v1353_v24 }
0x130d   :  { %2116 = vtanh.f32 %v1354_v8 }
0x1313   :  { %v2117_v58 = vpop.eup %2116 }
0x1314   :  { %v1356_v16 = vmul.f32 0.5, %v2117_v58 }
0x1316   :  { %v1357_v36 = vadd.f32 0.5, %v1356_v16 }
0x1318   :  { %1358 = vst [vmem:[#allocation2 + $0xa] sm:$0x1] %v1357_v36  ;;  %v1362_v12 = vperm.slane %v1357_v36, 0 }
0x131a   :  { %v1363_v1 = vmul.f32 %v1362_v12, %v2272_v19  ;;  %v1364_v59 = vmul.f32 %v1362_v12, %v2355_v45 }
0x131c   :  { %v1366_v5 = vadd.f32 %v1364_v59, %v1361_v7  ;;  %v1365_v15 = vadd.f32 %v1363_v1, %v2332_v38 }
0x131e   :  { %v1368_v35 = vadd.f32 %v1366_v5, %v2361_v50  ;;  %v1367_v63 = vadd.f32 %v1365_v15, %v2292_v29 }
0x1320   :  { %v1370_v31 = vmul.f32 0.5, %v1368_v35  ;;  %v1369_v17 = vmul.f32 0.5, %v1367_v63 }
0x1322   :  { %2118 = vtanh.f32 %v1370_v31 }
0x1323   :  { %2120 = vtanh.f32 %v1369_v17 }
0x1328   :  { %v2119_v37 = vpop.eup %2118 }
0x1329   :  { %v2121_v34 = vpop.eup %2120  ;;  %v1374_v55 = vmul.f32 0.5, %v2119_v37 }
0x132a   :  { %v1373_v53 = vmul.f32 0.5, %v2121_v34 }
0x132b   :  { %v2780_v56 = vadd.f32 0.5, %v1374_v55 }
0x132c   :  { %v2782_v54 = vadd.f32 0.5, %v1373_v53 }
0x132d   :  { %1379 = vadd.xlane.f32.xlu0 %v2780_v56  ;;  %v1382_v38 = vmul.f32 %v2780_v56, %v2780_v56 }
0x132e   :  { %1377 = vadd.xlane.f32.xlu2 %v2782_v54  ;;  %v1381_v18 = vmul.f32 %v2782_v54, %v2782_v54 }
0x1330   :  { %1383 = vadd.xlane.f32.xlu1 %v1381_v18 }
0x1336   :  { %1385 = vadd.xlane.f32.xlu2 %v1382_v38 }
0x13a0   :  { %v1380_v57 = vpop.xlane.xlu0 %1379 }
0x13a1   :  { %v1378_v11 = vpop.xlane.xlu2 %1377  ;;  %v1388_v13 = vmul.f32 0.0078125, %v1380_v57 }
0x13a2   :  { %v1387_v30 = vmul.f32 0.0078125, %v1378_v11 }
0x13a3   :  { %v1384_v14 = vpop.xlane.xlu1 %1383  ;;  %v1392_v41 = vmul.f32 %v1388_v13, %v1388_v13 }
0x13a4   :  { %v1391_v33 = vmul.f32 %v1387_v30, %v1387_v30  ;;  %v1389_v25 = vmul.f32 0.0078125, %v1384_v14 }
0x13a6   :  { %v1393_v32 = vsub.f32 %v1389_v25, %v1391_v33 }
0x13a8   :  { %v1395_v26 = vmax.f32 %v1393_v32, 0.0 }
0x13a9   :  { %v1386_v27 = vpop.xlane.xlu2 %1385 }
0x13aa   :  { %v1397_v48 = vadd.f32 1e-05, %v1395_v26  ;;  %v1390_v20 = vmul.f32 0.0078125, %v1386_v27 }
0x13ac   :  { %2122 = vrsqrt.f32 %v1397_v48  ;;  %v1394_v61 = vsub.f32 %v1390_v20, %v1392_v41  ;;  %vm1405_vm8 = vweird.f32 %v1397_v48 }
0x13ae   :  { %v1396_v0 = vmax.f32 %v1394_v61, 0.0 }
0x13b0   :  { %v1398_v51 = vadd.f32 1e-05, %v1396_v0 }
0x13b2   :  { %v2123_v4 = vpop.eup %2122  ;;  %2124 = vrsqrt.f32 %v1398_v51  ;;  %vm1415_vm11 = vweird.f32 %v1398_v51 }
0x13b3   :  { %v1400_v3 = vmul.f32 %v2123_v4, %v1397_v48  ;;  %vm1406_vm7 = vweird.f32 %v2123_v4 }
0x13b4   :  { %vm1407_vm9 = vmor %vm1405_vm8, %vm1406_vm7 }
0x13b5   :  { %v1401_v10 = vmul.f32 %v2123_v4, %v1400_v3 }
0x13b7   :  { %v1402_v60 = vmul.f32 0.5, %v1401_v10 }
0x13b8   :  { %v2125_v24 = vpop.eup %2124 }
0x13b9   :  { %v1403_v8 = vsub.f32 1.5, %v1402_v60  ;;  %v1410_v58 = vmul.f32 %v2125_v24, %v1398_v51  ;;  %vm1416_vm10 = vweird.f32 %v2125_v24 }
0x13ba   :  { %vm1417_vm12 = vmor %vm1415_vm11, %vm1416_vm10 }
0x13bb   :  { %v1411_v16 = vmul.f32 %v2125_v24, %v1410_v58  ;;  %v1404_v36 = vmul.f32 %v2123_v4, %v1403_v8 }
0x13bd   :  { %v1412_v12 = vmul.f32 0.5, %v1411_v16  ;;  %v1408_v1 = vsel %vm1407_vm9, %v2123_v4, %v1404_v36 }
0x13be   :  { %v1419_v59 = vmul.f32 %v2716_v28, %v1408_v1 }
0x13bf   :  { %v1413_v7 = vsub.f32 1.5, %v1412_v12 }
0x13c0   :  { %v1433_v5 = vmul.f32 %v1419_v59, %v2398_v2  ;;  %v1421_v15 = vmul.f32 %v1419_v59, %v1387_v30 }
0x13c1   :  { %v1414_v35 = vmul.f32 %v2125_v24, %v1413_v7 }
0x13c2   :  { %1449 = vperm.xlu2 %1998, %v1433_v5   ;;  %1425 = vrot.lane.b32.xlu0 %v1421_v15, %s2205_s22  ;;  %v1479_v5 = vmul.f32 %v1477_v21, %v2357_v46 }
0x13c3   :  { %v1418_v63 = vsel %vm1417_vm12, %v2125_v24, %v1414_v35 }
0x13c4   :  { %v1420_v31 = vmul.f32 %v2724_v9, %v1418_v63 }
0x13c6   :  { %v1422_v17 = vmul.f32 %v1420_v31, %v1388_v13  ;;  %v1434_v37 = vmul.f32 %v1420_v31, %v2390_v52 }
0x13c8   :  { %1427 = vrot.lane.b32.xlu1 %v1422_v17, %s2205_s22 }
0x13ca   :  { %1454 = vperm.xlu0 %1995, %v1434_v37   ;;  %2003 = vset.pattern.permute.xlu2 %v2208_v44 }
0x13d2   :  { %2000 = vset.pattern.permute.xlu0 %v2208_v44 }
0x141c   :  { %v1450_v20 = vpop.permute.xlu2 %1449 }
0x141d   :  { %v1457_v0 = vmul.f32 %v1450_v20, %v2782_v54 }
0x1434   :  { %v1426_v34 = vpop.permute.xlu0 %1425 }
0x1435   :  { %v1431_v55 = vsub.f32 %v2716_v28, %v1426_v34 }
0x1437   :  { %v1435_v18 = vmul.f32 %v1431_v55, %v2388_v49 }
0x1439   :  { %v1437_v30 = vsel %vm138_vm6, %v1435_v18, 0.0 }
0x143a   :  { %v1428_v53 = vpop.permute.xlu1 %1427 }
0x143b   :  { %v1432_v38 = vsub.f32 %v2724_v9, %v1428_v53 }
0x143c   :  { %v1455_v48 = vpop.permute.xlu0 %1454 }
0x143d   :  { %v1436_v11 = vmul.f32 %v1432_v38, %v2385_v47  ;;  %v1458_v61 = vmul.f32 %v1455_v48, %v2780_v56 }
0x143f   :  { %v1438_v57 = vsel %vm138_vm6, %v1436_v11, 0.0  ;;  %v1459_v51 = vadd.f32 %v1458_v61, %v1457_v0 }
0x1440   :  { %v1439_v14 = vadd.f32 %v1438_v57, %v1437_v30 }
0x1441   :  { %v1460_v4 = vrot.slane %v1459_v51, 4 }
0x1442   :  { %v1440_v33 = vrot.slane %v1439_v14, 4 }
0x1443   :  { %v1461_v3 = vadd.f32 %v1460_v4, %v1459_v51 }
0x1444   :  { %v1441_v25 = vadd.f32 %v1440_v33, %v1439_v14 }
0x1445   :  { %v1462_v10 = vrot.slane %v1461_v3, 2 }
0x1446   :  { %v1442_v13 = vrot.slane %v1441_v25, 2 }
0x1447   :  { %v1463_v60 = vadd.f32 %v1462_v10, %v1461_v3 }
0x1448   :  { %v1443_v32 = vadd.f32 %v1442_v13, %v1441_v25 }
0x1449   :  { %v1464_v24 = vrot.slane %v1463_v60, 1 }
0x144a   :  { %v1444_v26 = vrot.slane %v1443_v32, 1 }
0x144b   :  { %v1465_v8 = vadd.f32 %v1464_v24, %v1463_v60 }
0x144c   :  { %v1445_v27 = vadd.f32 %v1444_v26, %v1443_v32 }
0x144e   :  { %v1446_v41 = vadd.f32 %v1445_v27, %v2398_v2 }
0x1450   :  { %1468 = vperm.xlu0 %2000, %v1446_v41  }
0x1458   :  { %2001 = vset.pattern.permute.xlu0 %v2207_v62 }
0x14c2   :  { %v1469_v58 = vpop.permute.xlu0 %1468 }
0x14c3   :  { %v1471_v16 = vadd.f32 %v1469_v58, %v1465_v8 }
0x14c5   :  { %v1472_v36 = vmul.f32 0.5, %v1471_v16 }
0x14c7   :  { %2126 = vtanh.f32 %v1472_v36 }
0x14cd   :  { %v2127_v12 = vpop.eup %2126 }
0x14ce   :  { %v1474_v1 = vmul.f32 0.5, %v2127_v12 }
0x14d0   :  { %v1475_v59 = vadd.f32 0.5, %v1474_v1 }
0x14d2   :  { %1476 = vst [vmem:[#allocation2 + $0xb] sm:$0x1] %v1475_v59  ;;  %v1480_v7 = vperm.slane %v1475_v59, 0 }
0x14d4   :  { %v1481_v56 = vmul.f32 %v1480_v7, %v2272_v19  ;;  %v1482_v54 = vmul.f32 %v1480_v7, %v2355_v45 }
0x14d6   :  { %v1484_v15 = vadd.f32 %v1482_v54, %v1479_v5  ;;  %v1483_v35 = vadd.f32 %v1481_v56, %v2337_v39 }
0x14d8   :  { %v1486_v63 = vadd.f32 %v1484_v15, %v2361_v50  ;;  %v1485_v31 = vadd.f32 %v1483_v35, %v2292_v29 }
0x14da   :  { %v1488_v17 = vmul.f32 0.5, %v1486_v63  ;;  %v1487_v37 = vmul.f32 0.5, %v1485_v31 }
0x14dc   :  { %2128 = vtanh.f32 %v1488_v17 }
0x14dd   :  { %2130 = vtanh.f32 %v1487_v37 }
0x14e2   :  { %v2129_v34 = vpop.eup %2128 }
0x14e3   :  { %v2131_v55 = vpop.eup %2130  ;;  %v1492_v53 = vmul.f32 0.5, %v2129_v34 }
0x14e4   :  { %v1491_v18 = vmul.f32 0.5, %v2131_v55 }
0x14e5   :  { %v2816_v38 = vadd.f32 0.5, %v1492_v53 }
0x14e6   :  { %v2818_v11 = vadd.f32 0.5, %v1491_v18 }
0x14e7   :  { %1497 = vadd.xlane.f32.xlu2 %v2816_v38  ;;  %v1500_v39 = vmul.f32 %v2816_v38, %v2816_v38 }
0x14e8   :  { %1495 = vadd.xlane.f32.xlu1 %v2818_v11  ;;  %v1499_v21 = vmul.f32 %v2818_v11, %v2818_v11 }
0x14ea   :  { %1501 = vadd.xlane.f32.xlu0 %v1499_v21 }
0x14ef   :  { %1503 = vadd.xlane.f32.xlu2 %v1500_v39 }
0x155a   :  { %v1498_v30 = vpop.xlane.xlu2 %1497 }
0x155b   :  { %v1496_v57 = vpop.xlane.xlu1 %1495  ;;  %v1506_v32 = vmul.f32 0.0078125, %v1498_v30 }
0x155c   :  { %v1505_v14 = vmul.f32 0.0078125, %v1496_v57 }
0x155d   :  { %v1502_v33 = vpop.xlane.xlu0 %1501  ;;  %v1510_v48 = vmul.f32 %v1506_v32, %v1506_v32 }
0x155e   :  { %v1509_v25 = vmul.f32 %v1505_v14, %v1505_v14  ;;  %v1507_v13 = vmul.f32 0.0078125, %v1502_v33 }
0x1560   :  { %v1511_v26 = vsub.f32 %v1507_v13, %v1509_v25 }
0x1562   :  { %v1513_v27 = vmax.f32 %v1511_v26, 0.0  ;;  %v1504_v41 = vpop.xlane.xlu2 %1503 }
0x1563   :  { %v1508_v20 = vmul.f32 0.0078125, %v1504_v41 }
0x1564   :  { %v1515_v61 = vadd.f32 1e-05, %v1513_v27 }
0x1565   :  { %v1512_v0 = vsub.f32 %v1508_v20, %v1510_v48 }
0x1566   :  { %2132 = vrsqrt.f32 %v1515_v61  ;;  %vm1523_vm14 = vweird.f32 %v1515_v61 }
0x1567   :  { %v1514_v51 = vmax.f32 %v1512_v0, 0.0 }
0x1569   :  { %v1516_v4 = vadd.f32 1e-05, %v1514_v51 }
0x156b   :  { %2134 = vrsqrt.f32 %v1516_v4  ;;  %vm1533_vm1 = vweird.f32 %v1516_v4 }
0x156c   :  { %v2133_v3 = vpop.eup %2132 }
0x156d   :  { %v1518_v10 = vmul.f32 %v2133_v3, %v1515_v61  ;;  %vm1524_vm13 = vweird.f32 %v2133_v3 }
0x156e   :  { %vm1525_vm15 = vmor %vm1523_vm14, %vm1524_vm13 }
0x156f   :  { %v1519_v60 = vmul.f32 %v2133_v3, %v1518_v10 }
0x1571   :  { %v2135_v24 = vpop.eup %2134  ;;  %v1520_v8 = vmul.f32 0.5, %v1519_v60 }
0x1572   :  { %v1528_v58 = vmul.f32 %v2135_v24, %v1516_v4  ;;  %vm1534_vm0 = vweird.f32 %v2135_v24 }
0x1573   :  { %v1521_v16 = vsub.f32 1.5, %v1520_v8  ;;  %vm1535_vm2 = vmor %vm1533_vm1, %vm1534_vm0 }
0x1574   :  { %v1529_v36 = vmul.f32 %v2135_v24, %v1528_v58 }
0x1575   :  { %v1522_v12 = vmul.f32 %v2133_v3, %v1521_v16 }
0x1576   :  { %v1530_v1 = vmul.f32 0.5, %v1529_v36 }
0x1577   :  { %v1526_v59 = vsel %vm1525_vm15, %v2133_v3, %v1522_v12 }
0x1578   :  { %v1531_v7 = vsub.f32 1.5, %v1530_v1  ;;  %v1537_v56 = vmul.f32 %v2716_v28, %v1526_v59  ;;  %v1597_v59 = vmul.f32 %v1595_v22, %v2357_v46 }
0x157a   :  { %v1551_v54 = vmul.f32 %v1537_v56, %v2398_v2  ;;  %v1539_v5 = vmul.f32 %v1537_v56, %v1505_v14  ;;  %v1532_v15 = vmul.f32 %v2135_v24, %v1531_v7 }
0x157c   :  { %1567 = vperm.xlu0 %2001, %v1551_v54   ;;  %1543 = vrot.lane.b32.xlu1 %v1539_v5, %s2205_s22  ;;  %v1536_v35 = vsel %vm1535_vm2, %v2135_v24, %v1532_v15 }
0x157d   :  { %v1538_v63 = vmul.f32 %v2724_v9, %v1536_v35 }
0x157f   :  { %v1540_v31 = vmul.f32 %v1538_v63, %v1506_v32  ;;  %v1552_v17 = vmul.f32 %v1538_v63, %v2390_v52 }
0x1581   :  { %1545 = vrot.lane.b32.xlu2 %v1540_v31, %s2205_s22 }
0x1584   :  { %1572 = vperm.xlu1 %2002, %v1552_v17  }
0x158c   :  { %2005 = vset.pattern.permute.xlu1 %v2208_v44 }
0x15db   :  { %v1546_v37 = vpop.permute.xlu2 %1545 }
0x15dc   :  { %v1550_v34 = vsub.f32 %v2724_v9, %v1546_v37 }
0x15de   :  { %v1554_v53 = vmul.f32 %v1550_v34, %v2385_v47 }
0x15e0   :  { %v1556_v39 = vsel %vm138_vm6, %v1554_v53, 0.0 }
0x15ee   :  { %v1544_v55 = vpop.permute.xlu1 %1543  ;;  %v1568_v48 = vpop.permute.xlu0 %1567 }
0x15ef   :  { %v1549_v18 = vsub.f32 %v2716_v28, %v1544_v55  ;;  %v1575_v61 = vmul.f32 %v1568_v48, %v2818_v11 }
0x15f1   :  { %v1553_v21 = vmul.f32 %v1549_v18, %v2388_v49 }
0x15f3   :  { %v1555_v30 = vsel %vm138_vm6, %v1553_v21, 0.0 }
0x15f4   :  { %v1557_v57 = vadd.f32 %v1556_v39, %v1555_v30 }
0x15f6   :  { %v1558_v14 = vrot.slane %v1557_v57, 4  ;;  %v1573_v41 = vpop.permute.xlu1 %1572 }
0x15f7   :  { %v1576_v20 = vmul.f32 %v1573_v41, %v2816_v38 }
0x15f8   :  { %v1559_v33 = vadd.f32 %v1558_v14, %v1557_v57 }
0x15f9   :  { %v1577_v0 = vadd.f32 %v1576_v20, %v1575_v61 }
0x15fa   :  { %v1560_v25 = vrot.slane %v1559_v33, 2 }
0x15fb   :  { %v1578_v51 = vrot.slane %v1577_v0, 4 }
0x15fc   :  { %v1561_v13 = vadd.f32 %v1560_v25, %v1559_v33 }
0x15fd   :  { %v1579_v4 = vadd.f32 %v1578_v51, %v1577_v0 }
0x15fe   :  { %v1562_v32 = vrot.slane %v1561_v13, 1 }
0x15ff   :  { %v1580_v3 = vrot.slane %v1579_v4, 2 }
0x1600   :  { %v1563_v26 = vadd.f32 %v1562_v32, %v1561_v13 }
0x1601   :  { %v1581_v10 = vadd.f32 %v1580_v3, %v1579_v4 }
0x1602   :  { %v1564_v27 = vadd.f32 %v1563_v26, %v2398_v2 }
0x1603   :  { %v1582_v60 = vrot.slane %v1581_v10, 1 }
0x1604   :  { %1586 = vperm.xlu2 %2003, %v1564_v27  }
0x1605   :  { %v1583_v24 = vadd.f32 %v1582_v60, %v1581_v10 }
0x160c   :  { %2004 = vset.pattern.permute.xlu2 %v2207_v62 }
0x165e   :  { %v1587_v8 = vpop.permute.xlu2 %1586 }
0x165f   :  { %v1589_v58 = vadd.f32 %v1587_v8, %v1583_v24 }
0x1661   :  { %v1590_v16 = vmul.f32 0.5, %v1589_v58 }
0x1663   :  { %2136 = vtanh.f32 %v1590_v16 }
0x1669   :  { %v2137_v36 = vpop.eup %2136 }
0x166a   :  { %v1592_v12 = vmul.f32 0.5, %v2137_v36 }
0x166c   :  { %v1593_v62 = vadd.f32 0.5, %v1592_v12 }
0x166e   :  { %1594 = vst [vmem:[#allocation2 + $0xc] sm:$0x1] %v1593_v62  ;;  %v1598_v1 = vperm.slane %v1593_v62, 0 }
0x1670   :  { %v1599_v38 = vmul.f32 %v1598_v1, %v2272_v19  ;;  %v1600_v11 = vmul.f32 %v1598_v1, %v2355_v45 }
0x1672   :  { %v1602_v7 = vadd.f32 %v1600_v11, %v1597_v59  ;;  %v1601_v56 = vadd.f32 %v1599_v38, %v2342_v40 }
0x1674   :  { %v1604_v54 = vadd.f32 %v1602_v7, %v2361_v50  ;;  %v1603_v5 = vadd.f32 %v1601_v56, %v2292_v29 }
0x1676   :  { %v1606_v15 = vmul.f32 0.5, %v1604_v54  ;;  %v1605_v35 = vmul.f32 0.5, %v1603_v5 }
0x1678   :  { %2138 = vtanh.f32 %v1606_v15 }
0x1679   :  { %2140 = vtanh.f32 %v1605_v35 }
0x167e   :  { %v2139_v63 = vpop.eup %2138 }
0x167f   :  { %v2141_v31 = vpop.eup %2140  ;;  %v1610_v17 = vmul.f32 0.5, %v2139_v63 }
0x1680   :  { %v1609_v37 = vmul.f32 0.5, %v2141_v31 }
0x1681   :  { %v2851_v34 = vadd.f32 0.5, %v1610_v17 }
0x1682   :  { %v2853_v55 = vadd.f32 0.5, %v1609_v37 }
0x1683   :  { %1615 = vadd.xlane.f32.xlu2 %v2851_v34  ;;  %v1618_v40 = vmul.f32 %v2851_v34, %v2851_v34 }
0x1684   :  { %1613 = vadd.xlane.f32.xlu1 %v2853_v55  ;;  %v1617_v22 = vmul.f32 %v2853_v55, %v2853_v55 }
0x1686   :  { %1619 = vadd.xlane.f32.xlu0 %v1617_v22 }
0x168c   :  { %1621 = vadd.xlane.f32.xlu1 %v1618_v40 }
0x16f6   :  { %v1616_v21 = vpop.xlane.xlu2 %1615 }
0x16f7   :  { %v1614_v53 = vpop.xlane.xlu1 %1613  ;;  %v1624_v14 = vmul.f32 0.0078125, %v1616_v21 }
0x16f8   :  { %v1623_v18 = vmul.f32 0.0078125, %v1614_v53 }
0x16f9   :  { %v1620_v39 = vpop.xlane.xlu0 %1619  ;;  %v1628_v32 = vmul.f32 %v1624_v14, %v1624_v14 }
0x16fa   :  { %v1627_v30 = vmul.f32 %v1623_v18, %v1623_v18  ;;  %v1625_v57 = vmul.f32 0.0078125, %v1620_v39 }
0x16fc   :  { %v1629_v33 = vsub.f32 %v1625_v57, %v1627_v30 }
0x16fe   :  { %v1631_v25 = vmax.f32 %v1629_v33, 0.0 }
0x16ff   :  { %v1622_v13 = vpop.xlane.xlu1 %1621 }
0x1700   :  { %v1633_v26 = vadd.f32 1e-05, %v1631_v25  ;;  %v1626_v27 = vmul.f32 0.0078125, %v1622_v13 }
0x1702   :  { %2142 = vrsqrt.f32 %v1633_v26  ;;  %v1630_v41 = vsub.f32 %v1626_v27, %v1628_v32  ;;  %vm1641_vm4 = vweird.f32 %v1633_v26 }
0x1704   :  { %v1632_v48 = vmax.f32 %v1630_v41, 0.0 }
0x1706   :  { %v1634_v20 = vadd.f32 1e-05, %v1632_v48 }
0x1708   :  { %v2143_v61 = vpop.eup %2142  ;;  %2144 = vrsqrt.f32 %v1634_v20  ;;  %vm1651_vm8 = vweird.f32 %v1634_v20 }
0x1709   :  { %v1636_v0 = vmul.f32 %v2143_v61, %v1633_v26  ;;  %vm1642_vm3 = vweird.f32 %v2143_v61 }
0x170a   :  { %vm1643_vm5 = vmor %vm1641_vm4, %vm1642_vm3 }
0x170b   :  { %v1637_v51 = vmul.f32 %v2143_v61, %v1636_v0 }
0x170d   :  { %v1638_v4 = vmul.f32 0.5, %v1637_v51 }
0x170e   :  { %v2145_v3 = vpop.eup %2144 }
0x170f   :  { %v1639_v10 = vsub.f32 1.5, %v1638_v4  ;;  %v1646_v60 = vmul.f32 %v2145_v3, %v1634_v20  ;;  %vm1652_vm7 = vweird.f32 %v2145_v3 }
0x1710   :  { %vm1653_vm9 = vmor %vm1651_vm8, %vm1652_vm7 }
0x1711   :  { %v1647_v24 = vmul.f32 %v2145_v3, %v1646_v60  ;;  %v1640_v8 = vmul.f32 %v2143_v61, %v1639_v10  ;;  %v1715_v60 = vmul.f32 %v1713_v23, %v2357_v46 }
0x1713   :  { %v1648_v58 = vmul.f32 0.5, %v1647_v24  ;;  %v1644_v16 = vsel %vm1643_vm5, %v2143_v61, %v1640_v8 }
0x1714   :  { %v1655_v36 = vmul.f32 %v2716_v28, %v1644_v16 }
0x1715   :  { %v1649_v12 = vsub.f32 1.5, %v1648_v58 }
0x1716   :  { %v1669_v62 = vmul.f32 %v1655_v36, %v2398_v2  ;;  %v1657_v1 = vmul.f32 %v1655_v36, %v1623_v18 }
0x1717   :  { %v1650_v38 = vmul.f32 %v2145_v3, %v1649_v12 }
0x1718   :  { %1685 = vperm.xlu0 %2001, %v1669_v62   ;;  %1661 = vrot.lane.b32.xlu2 %v1657_v1, %s2205_s22 }
0x1719   :  { %v1654_v11 = vsel %vm1653_vm9, %v2145_v3, %v1650_v38 }
0x171a   :  { %v1656_v59 = vmul.f32 %v2724_v9, %v1654_v11 }
0x171c   :  { %v1658_v7 = vmul.f32 %v1656_v59, %v1624_v14  ;;  %v1670_v56 = vmul.f32 %v1656_v59, %v2390_v52 }
0x171e   :  { %1663 = vrot.lane.b32.xlu1 %v1658_v7, %s2205_s22 }
0x1720   :  { %1690 = vperm.xlu2 %2004, %v1670_v56  }
0x1772   :  { %v1662_v54 = vpop.permute.xlu2 %1661 }
0x1773   :  { %v1667_v5 = vsub.f32 %v2716_v28, %v1662_v54 }
0x1775   :  { %v1671_v35 = vmul.f32 %v1667_v5, %v2388_v49 }
0x1777   :  { %v1673_v17 = vsel %vm138_vm6, %v1671_v35, 0.0 }
0x177a   :  { %v1691_v14 = vpop.permute.xlu2 %1690 }
0x177b   :  { %v1694_v33 = vmul.f32 %v1691_v14, %v2851_v34 }
0x178a   :  { %v1686_v57 = vpop.permute.xlu0 %1685 }
0x1790   :  { %v1664_v15 = vpop.permute.xlu1 %1663 }
0x1791   :  { %v1668_v63 = vsub.f32 %v2724_v9, %v1664_v15  ;;  %v1693_v9 = vmul.f32 %v1686_v57, %v2853_v55 }
0x1793   :  { %v1672_v31 = vmul.f32 %v1668_v63, %v2385_v47  ;;  %v1695_v25 = vadd.f32 %v1694_v33, %v1693_v9 }
0x1795   :  { %v1674_v37 = vsel %vm138_vm6, %v1672_v31, 0.0  ;;  %v1696_v13 = vrot.slane %v1695_v25, 4 }
0x1796   :  { %v1675_v22 = vadd.f32 %v1674_v37, %v1673_v17 }
0x1797   :  { %v1697_v32 = vadd.f32 %v1696_v13, %v1695_v25 }
0x1798   :  { %v1676_v40 = vrot.slane %v1675_v22, 4 }
0x1799   :  { %v1698_v26 = vrot.slane %v1697_v32, 2 }
0x179a   :  { %v1677_v53 = vadd.f32 %v1676_v40, %v1675_v22 }
0x179b   :  { %v1699_v27 = vadd.f32 %v1698_v26, %v1697_v32 }
0x179c   :  { %v1678_v18 = vrot.slane %v1677_v53, 2 }
0x179d   :  { %v1700_v41 = vrot.slane %v1699_v27, 1 }
0x179e   :  { %v1679_v21 = vadd.f32 %v1678_v18, %v1677_v53 }
0x179f   :  { %v1701_v48 = vadd.f32 %v1700_v41, %v1699_v27 }
0x17a0   :  { %v1680_v39 = vrot.slane %v1679_v21, 1 }
0x17a2   :  { %v1681_v30 = vadd.f32 %v1680_v39, %v1679_v21 }
0x17a4   :  { %v1682_v28 = vadd.f32 %v1681_v30, %v2398_v2 }
0x17a6   :  { %1704 = vperm.xlu1 %2005, %v1682_v28  }
0x1818   :  { %v1705_v20 = vpop.permute.xlu1 %1704 }
0x1819   :  { %v1707_v61 = vadd.f32 %v1705_v20, %v1701_v48  ;;  %v2897_v48 = vld [vmem:[%s2958_s2] sm:$0xff] }
0x181b   :  { %v1708_v0 = vmul.f32 0.5, %v1707_v61 }
0x181d   :  { %2146 = vtanh.f32 %v1708_v0 }
0x1823   :  { %v2147_v51 = vpop.eup %2146 }
0x1824   :  { %v1710_v4 = vmul.f32 0.5, %v2147_v51 }
0x1826   :  { %v1711_v3 = vadd.f32 0.5, %v1710_v4 }
0x1828   :  { %1712 = vst [vmem:[#allocation2 + $0xd] sm:$0x1] %v1711_v3  ;;  %v1716_v10 = vperm.slane %v1711_v3, 0 }
0x182a   :  { %v1717_v55 = vmul.f32 %v1716_v10, %v2272_v19  ;;  %v1718_v34 = vmul.f32 %v1716_v10, %v2355_v45  ;;  %v2905_v10 = vld [vmem:[%s2958_s2 + $0x8] sm:$0xff]  ;;  %s2209_s2 = smov [#allocation2]  }
0x182b   :  { %s1953_s10 = sshll.u32 %s2209_s2, 4  ;;  %s1954_s10 = int_to_ptr.vmem [resolvable:$true] %s1953_s10 }
0x182c   :  { %v1720_v24 = vadd.f32 %v1718_v34, %v1715_v60  ;;  %v1719_v8 = vadd.f32 %v1717_v55, %v2348_v42 }
0x182e   :  { %v1722_v58 = vadd.f32 %v1720_v24, %v2361_v50  ;;  %v1721_v16 = vadd.f32 %v1719_v8, %v2292_v29 }
0x1830   :  { %v1724_v36 = vmul.f32 0.5, %v1722_v58  ;;  %v1723_v12 = vmul.f32 0.5, %v1721_v16 }
0x1832   :  { %2148 = vtanh.f32 %v1724_v36 }
0x1833   :  { %2150 = vtanh.f32 %v1723_v12 }
0x1838   :  { %v2149_v62 = vpop.eup %2148 }
0x1839   :  { %v2151_v1 = vpop.eup %2150  ;;  %v1728_v38 = vmul.f32 0.5, %v2149_v62 }
0x183a   :  { %v1727_v11 = vmul.f32 0.5, %v2151_v1 }
0x183b   :  { %v2884_v59 = vadd.f32 0.5, %v1728_v38 }
0x183c   :  { %v2886_v7 = vadd.f32 0.5, %v1727_v11 }
0x183d   :  { %1733 = vadd.xlane.f32.xlu1 %v2884_v59  ;;  %v1736_v42 = vmul.f32 %v2884_v59, %v2884_v59 }
0x183e   :  { %1731 = vadd.xlane.f32.xlu2 %v2886_v7  ;;  %v1735_v23 = vmul.f32 %v2886_v7, %v2886_v7 }
0x1840   :  { %1737 = vadd.xlane.f32.xlu0 %v1735_v23 }
0x1846   :  { %1739 = vadd.xlane.f32.xlu2 %v1736_v42 }
0x18b0   :  { %v1734_v5 = vpop.xlane.xlu1 %1733 }
0x18b1   :  { %v1732_v56 = vpop.xlane.xlu2 %1731  ;;  %v1742_v31 = vmul.f32 0.0078125, %v1734_v5 }
0x18b2   :  { %v1741_v54 = vmul.f32 0.0078125, %v1732_v56 }
0x18b3   :  { %v1738_v15 = vpop.xlane.xlu0 %1737  ;;  %v1746_v40 = vmul.f32 %v1742_v31, %v1742_v31 }
0x18b4   :  { %v1745_v35 = vmul.f32 %v1741_v54, %v1741_v54  ;;  %v1743_v63 = vmul.f32 0.0078125, %v1738_v15 }
0x18b6   :  { %v1747_v17 = vsub.f32 %v1743_v63, %v1745_v35 }
0x18b8   :  { %v1749_v37 = vmax.f32 %v1747_v17, 0.0 }
0x18b9   :  { %v1740_v22 = vpop.xlane.xlu2 %1739 }
0x18ba   :  { %v1751_v53 = vadd.f32 1e-05, %v1749_v37  ;;  %v1744_v18 = vmul.f32 0.0078125, %v1740_v22 }
0x18bc   :  { %2152 = vrsqrt.f32 %v1751_v53  ;;  %v1748_v21 = vsub.f32 %v1744_v18, %v1746_v40  ;;  %vm1759_vm11 = vweird.f32 %v1751_v53 }
0x18be   :  { %v1750_v39 = vmax.f32 %v1748_v21, 0.0 }
0x18c0   :  { %v1752_v30 = vadd.f32 1e-05, %v1750_v39 }
0x18c2   :  { %v2153_v28 = vpop.eup %2152  ;;  %2154 = vrsqrt.f32 %v1752_v30  ;;  %vm1769_vm14 = vweird.f32 %v1752_v30 }
0x18c3   :  { %v1754_v57 = vmul.f32 %v2153_v28, %v1751_v53  ;;  %vm1760_vm10 = vweird.f32 %v2153_v28 }
0x18c4   :  { %vm1761_vm12 = vmor %vm1759_vm11, %vm1760_vm10 }
0x18c5   :  { %v1755_v14 = vmul.f32 %v2153_v28, %v1754_v57 }
0x18c7   :  { %v1756_v9 = vmul.f32 0.5, %v1755_v14 }
0x18c8   :  { %v2155_v33 = vpop.eup %2154 }
0x18c9   :  { %v1757_v25 = vsub.f32 1.5, %v1756_v9  ;;  %v1764_v13 = vmul.f32 %v2155_v33, %v1752_v30  ;;  %vm1770_vm13 = vweird.f32 %v2155_v33 }
0x18ca   :  { %vm1771_vm15 = vmor %vm1769_vm14, %vm1770_vm13 }
0x18cb   :  { %v1758_v32 = vmul.f32 %v2153_v28, %v1757_v25  ;;  %v1765_v26 = vmul.f32 %v2155_v33, %v1764_v13  ;;  %v2961_v13 = vperm.slane %v2256_v6, 7 }
0x18cd   :  { %v1766_v27 = vmul.f32 0.5, %v1765_v26  ;;  %v1762_v41 = vsel %vm1761_vm12, %v2153_v28, %v1758_v32  ;;  %v1833_v32 = vmul.f32 %v2961_v13, %v2357_v46 }
0x18ce   :  { %v1773_v20 = vmul.f32 %v2897_v48, %v1762_v41 }
0x18cf   :  { %v1767_v61 = vsub.f32 1.5, %v1766_v27 }
0x18d0   :  { %v1787_v0 = vmul.f32 %v1773_v20, %v2398_v2  ;;  %v1775_v51 = vmul.f32 %v1773_v20, %v1741_v54 }
0x18d1   :  { %v1768_v4 = vmul.f32 %v2155_v33, %v1767_v61 }
0x18d2   :  { %1803 = vperm.xlu2 %2004, %v1787_v0   ;;  %1779 = vrot.lane.b32.xlu1 %v1775_v51, %s2205_s22 }
0x18d3   :  { %v1772_v3 = vsel %vm1771_vm15, %v2155_v33, %v1768_v4 }
0x18d4   :  { %v1774_v55 = vmul.f32 %v2905_v10, %v1772_v3 }
0x18d6   :  { %v1776_v34 = vmul.f32 %v1774_v55, %v1742_v31  ;;  %v1788_v60 = vmul.f32 %v1774_v55, %v2390_v52 }
0x18d8   :  { %1781 = vrot.lane.b32.xlu0 %v1776_v34, %s2205_s22 }
0x18e0   :  { %1808 = vperm.xlu0 %2001, %v1788_v60  }
0x192c   :  { %v1804_v63 = vpop.permute.xlu2 %1803 }
0x192d   :  { %v1811_v17 = vmul.f32 %v1804_v63, %v2886_v7 }
0x1944   :  { %v1780_v24 = vpop.permute.xlu1 %1779 }
0x1945   :  { %v1785_v8 = vsub.f32 %v2897_v48, %v1780_v24 }
0x1947   :  { %v1789_v16 = vmul.f32 %v1785_v8, %v2388_v49 }
0x1949   :  { %v1791_v62 = vsel %vm138_vm6, %v1789_v16, 0.0 }
0x194a   :  { %v1782_v58 = vpop.permute.xlu0 %1781 }
0x194b   :  { %v1786_v36 = vsub.f32 %v2905_v10, %v1782_v58 }
0x194d   :  { %v1790_v12 = vmul.f32 %v1786_v36, %v2385_v47 }
0x194f   :  { %v1792_v1 = vsel %vm138_vm6, %v1790_v12, 0.0 }
0x1950   :  { %v1793_v38 = vadd.f32 %v1792_v1, %v1791_v62 }
0x1952   :  { %v1794_v11 = vrot.slane %v1793_v38, 4  ;;  %v1809_v35 = vpop.permute.xlu0 %1808 }
0x1953   :  { %v1812_v31 = vmul.f32 %v1809_v35, %v2884_v59 }
0x1954   :  { %v1795_v23 = vadd.f32 %v1794_v11, %v1793_v38 }
0x1955   :  { %v1813_v37 = vadd.f32 %v1812_v31, %v1811_v17 }
0x1956   :  { %v1796_v42 = vrot.slane %v1795_v23, 2 }
0x1957   :  { %v1814_v22 = vrot.slane %v1813_v37, 4 }
0x1958   :  { %v1797_v56 = vadd.f32 %v1796_v42, %v1795_v23 }
0x1959   :  { %v1815_v40 = vadd.f32 %v1814_v22, %v1813_v37 }
0x195a   :  { %v1798_v54 = vrot.slane %v1797_v56, 1 }
0x195b   :  { %v1816_v53 = vrot.slane %v1815_v40, 2 }
0x195c   :  { %v1799_v5 = vadd.f32 %v1798_v54, %v1797_v56 }
0x195d   :  { %v1817_v18 = vadd.f32 %v1816_v53, %v1815_v40 }
0x195e   :  { %v1800_v15 = vadd.f32 %v1799_v5, %v2398_v2 }
0x195f   :  { %v1818_v21 = vrot.slane %v1817_v18, 1 }
0x1960   :  { %1822 = vperm.xlu1 %2005, %v1800_v15  }
0x1961   :  { %v1819_v39 = vadd.f32 %v1818_v21, %v1817_v18 }
0x19d2   :  { %v1823_v30 = vpop.permute.xlu1 %1822 }
0x19d3   :  { %v1825_v28 = vadd.f32 %v1823_v30, %v1819_v39 }
0x19d5   :  { %v1826_v57 = vmul.f32 0.5, %v1825_v28 }
0x19d7   :  { %2156 = vtanh.f32 %v1826_v57 }
0x19dd   :  { %v2157_v14 = vpop.eup %2156 }
0x19de   :  { %v1828_v9 = vmul.f32 0.5, %v2157_v14 }
0x19e0   :  { %v1829_v33 = vadd.f32 0.5, %v1828_v9 }
0x19e2   :  { %1830 = vst [vmem:[#allocation2 + $0xe] sm:$0x1] %v1829_v33  ;;  %v1834_v25 = vperm.slane %v1829_v33, 0 }
0x19e4   :  { %v1835_v59 = vmul.f32 %v1834_v25, %v2272_v19  ;;  %v1836_v7 = vmul.f32 %v1834_v25, %v2355_v45 }
0x19e6   :  { %v1838_v26 = vadd.f32 %v1836_v7, %v1833_v32  ;;  %v1837_v27 = vadd.f32 %v1835_v59, %v2353_v43 }
0x19e8   :  { %v1840_v41 = vadd.f32 %v1838_v26, %v2361_v50  ;;  %v1839_v20 = vadd.f32 %v1837_v27, %v2292_v29 }
0x19ea   :  { %v1842_v61 = vmul.f32 0.5, %v1840_v41  ;;  %v1841_v0 = vmul.f32 0.5, %v1839_v20 }
0x19ec   :  { %2158 = vtanh.f32 %v1842_v61 }
0x19ed   :  { %2160 = vtanh.f32 %v1841_v0 }
0x19f2   :  { %v2159_v51 = vpop.eup %2158 }
0x19f3   :  { %v2161_v4 = vpop.eup %2160  ;;  %v1846_v19 = vmul.f32 0.5, %v2159_v51 }
0x19f4   :  { %v1845_v3 = vmul.f32 0.5, %v2161_v4 }
0x19f5   :  { %v2927_v45 = vadd.f32 0.5, %v1846_v19 }
0x19f6   :  { %v2929_v55 = vadd.f32 0.5, %v1845_v3 }
0x19f7   :  { %1851 = vadd.xlane.f32.xlu0 %v2927_v45  ;;  %v1854_v29 = vmul.f32 %v2927_v45, %v2927_v45 }
0x19f8   :  { %1849 = vadd.xlane.f32.xlu2 %v2929_v55  ;;  %v1853_v6 = vmul.f32 %v2929_v55, %v2929_v55 }
0x19fa   :  { %1855 = vadd.xlane.f32.xlu1 %v1853_v6 }
0x1a00   :  { %1857 = vadd.xlane.f32.xlu2 %v1854_v29 }
0x1a6a   :  { %v1852_v50 = vpop.xlane.xlu0 %1851 }
0x1a6b   :  { %v1850_v43 = vpop.xlane.xlu2 %1849  ;;  %v1860_v8 = vmul.f32 0.0078125, %v1852_v50 }
0x1a6c   :  { %v1859_v46 = vmul.f32 0.0078125, %v1850_v43 }
0x1a6d   :  { %v1856_v34 = vpop.xlane.xlu1 %1855  ;;  %v1864_v12 = vmul.f32 %v1860_v8, %v1860_v8 }
0x1a6e   :  { %v1863_v60 = vmul.f32 %v1859_v46, %v1859_v46  ;;  %v1861_v24 = vmul.f32 0.0078125, %v1856_v34 }
0x1a70   :  { %v1865_v58 = vsub.f32 %v1861_v24, %v1863_v60 }
0x1a72   :  { %v1867_v16 = vmax.f32 %v1865_v58, 0.0 }
0x1a73   :  { %v1858_v36 = vpop.xlane.xlu2 %1857 }
0x1a74   :  { %v1869_v62 = vadd.f32 1e-05, %v1867_v16  ;;  %v1862_v1 = vmul.f32 0.0078125, %v1858_v36 }
0x1a76   :  { %2162 = vrsqrt.f32 %v1869_v62  ;;  %v1866_v38 = vsub.f32 %v1862_v1, %v1864_v12  ;;  %vm1877_vm1 = vweird.f32 %v1869_v62 }
0x1a78   :  { %v1868_v11 = vmax.f32 %v1866_v38, 0.0 }
0x1a7a   :  { %v1870_v23 = vadd.f32 1e-05, %v1868_v11 }
0x1a7c   :  { %v2163_v42 = vpop.eup %2162  ;;  %2164 = vrsqrt.f32 %v1870_v23  ;;  %vm1887_vm4 = vweird.f32 %v1870_v23 }
0x1a7d   :  { %v1872_v56 = vmul.f32 %v2163_v42, %v1869_v62  ;;  %vm1878_vm0 = vweird.f32 %v2163_v42 }
0x1a7e   :  { %vm1879_vm2 = vmor %vm1877_vm1, %vm1878_vm0 }
0x1a7f   :  { %v1873_v54 = vmul.f32 %v2163_v42, %v1872_v56 }
0x1a81   :  { %v1874_v5 = vmul.f32 0.5, %v1873_v54 }
0x1a82   :  { %v2165_v15 = vpop.eup %2164 }
0x1a83   :  { %v1875_v35 = vsub.f32 1.5, %v1874_v5  ;;  %v1882_v63 = vmul.f32 %v2165_v15, %v1870_v23  ;;  %vm1888_vm3 = vweird.f32 %v2165_v15 }
0x1a84   :  { %vm1889_vm5 = vmor %vm1887_vm4, %vm1888_vm3 }
0x1a85   :  { %v1876_v31 = vmul.f32 %v2163_v42, %v1875_v35  ;;  %v1883_v17 = vmul.f32 %v2165_v15, %v1882_v63 }
0x1a87   :  { %v1884_v37 = vmul.f32 0.5, %v1883_v17  ;;  %v1880_v22 = vsel %vm1879_vm2, %v2163_v42, %v1876_v31 }
0x1a88   :  { %v1891_v40 = vmul.f32 %v2897_v48, %v1880_v22 }
0x1a89   :  { %v1885_v53 = vsub.f32 1.5, %v1884_v37 }
0x1a8a   :  { %v1905_v18 = vmul.f32 %v1891_v40, %v2398_v2  ;;  %v1893_v21 = vmul.f32 %v1891_v40, %v1859_v46 }
0x1a8b   :  { %v1886_v39 = vmul.f32 %v2165_v15, %v1885_v53 }
0x1a8c   :  { %1921 = vperm.xlu2 %2004, %v1905_v18   ;;  %1897 = vrot.lane.b32.xlu0 %v1893_v21, %s2205_s22 }
0x1a8d   :  { %v1890_v30 = vsel %vm1889_vm5, %v2165_v15, %v1886_v39 }
0x1a8e   :  { %v1892_v28 = vmul.f32 %v2905_v10, %v1890_v30 }
0x1a90   :  { %v1894_v57 = vmul.f32 %v1892_v28, %v1860_v8  ;;  %v1906_v14 = vmul.f32 %v1892_v28, %v2390_v52 }
0x1a92   :  { %1899 = vrot.lane.b32.xlu1 %v1894_v57, %s2205_s22 }
0x1a94   :  { %1926 = vperm.xlu0 %2001, %v1906_v14  }
0x1a9c   :  { %2006 = vset.pattern.permute.xlu0 %v2208_v44 }
0x1afe   :  { %v1898_v9 = vpop.permute.xlu0 %1897 }
0x1aff   :  { %v1903_v33 = vsub.f32 %v2897_v48, %v1898_v9 }
0x1b01   :  { %v1907_v59 = vmul.f32 %v1903_v33, %v2388_v49  ;;  %v1922_v49 = vpop.permute.xlu2 %1921 }
0x1b03   :  { %v1909_v32 = vsel %vm138_vm6, %v1907_v59, 0.0 }
0x1b04   :  { %v1900_v25 = vpop.permute.xlu1 %1899 }
0x1b05   :  { %v1904_v7 = vsub.f32 %v2905_v10, %v1900_v25 }
0x1b06   :  { %v1927_v51 = vpop.permute.xlu0 %1926 }
0x1b07   :  { %v1908_v13 = vmul.f32 %v1904_v7, %v2385_v47  ;;  %v1930_v10 = vmul.f32 %v1927_v51, %v2927_v45  ;;  %v1929_v47 = vmul.f32 %v1922_v49, %v2929_v55 }
0x1b09   :  { %v1910_v26 = vsel %vm138_vm6, %v1908_v13, 0.0  ;;  %v1931_v4 = vadd.f32 %v1930_v10, %v1929_v47 }
0x1b0a   :  { %v1911_v27 = vadd.f32 %v1910_v26, %v1909_v32 }
0x1b0b   :  { %v1932_v19 = vrot.slane %v1931_v4, 4 }
0x1b0c   :  { %v1912_v41 = vrot.slane %v1911_v27, 4 }
0x1b0d   :  { %v1933_v3 = vadd.f32 %v1932_v19, %v1931_v4 }
0x1b0e   :  { %v1913_v52 = vadd.f32 %v1912_v41, %v1911_v27 }
0x1b0f   :  { %v1934_v6 = vrot.slane %v1933_v3, 2 }
0x1b10   :  { %v1914_v20 = vrot.slane %v1913_v52, 2 }
0x1b11   :  { %v1935_v29 = vadd.f32 %v1934_v6, %v1933_v3 }
0x1b12   :  { %v1915_v61 = vadd.f32 %v1914_v20, %v1913_v52 }
0x1b13   :  { %v1936_v43 = vrot.slane %v1935_v29, 1 }
0x1b14   :  { %v1916_v44 = vrot.slane %v1915_v61, 1 }
0x1b15   :  { %v1937_v46 = vadd.f32 %v1936_v43, %v1935_v29 }
0x1b16   :  { %v1917_v0 = vadd.f32 %v1916_v44, %v1915_v61 }
0x1b18   :  { %v1918_v48 = vadd.f32 %v1917_v0, %v2398_v2 }
0x1b1a   :  { %1940 = vperm.xlu0 %2006, %v1918_v48  }
0x1b8c   :  { %v1941_v50 = vpop.permute.xlu0 %1940 }
0x1b8d   :  { %v1943_v34 = vadd.f32 %v1941_v50, %v1937_v46 }
0x1b8f   :  { %v1944_v60 = vmul.f32 0.5, %v1943_v34 }
0x1b91   :  { %2166 = vtanh.f32 %v1944_v60 }
0x1b97   :  { %v2167_v2 = vpop.eup %2166 }
0x1b98   :  { %v1946_v45 = vmul.f32 0.5, %v2167_v2 }
0x1b9a   :  { %v1947_v55 = vadd.f32 0.5, %v1946_v45 }
0x1b9c   :  { %1948 = vst [vmem:[#allocation2 + $0xf] sm:$0x1] %v1947_v55 }
0x1b9d   :  { %1961 = dma.vmem_to_hbm [thread:$0]  %s1954_s10, 256, %s1956_s13, [#allocation3], %s2210_s14, %s2210_s14, %s2211_s15  }
0x1b9e   :  { %2199 = dma.done.wait [#allocation3], 256  }
0x1b9f   :  { %2200 = vsyncadd [#allocation3], 4294967040 }
0x1ba0   :  { %1966 = vsyncpa [#allocation3], 1 }

</bundles_post_ra>
